<compile_context>
chip_gen: v5e
topology: v5e:2x2
jax: 0.10.0
libtpu: 0.0.40
codegen_flags: <defaults>
</compile_context>

<pallas_src>
import jax
import jax.numpy as jnp
from jax.experimental import pallas as pl
from jax.experimental.pallas import tpu as pltpu


def _round_up(v, m):
    return (v + m - 1) // m * m


# ------------------------------ fused kernel -------------------------------- #

def convnet_kernel(x_ref, m1_ref, b1_ref, m2_ref, b2_ref,
                   w1_ref, fb1_ref, w2_ref, fb2_ref, o_ref):
    """One grid step = TB images, stacked along the matmul M dimension."""
    f32 = jnp.float32
    bf16 = jnp.bfloat16
    tb = x_ref.shape[2]
    X = x_ref[...]                                       # (4, 7, TB, 28) bf16

    # ---- conv1 (1->10, 5x5) + bias + maxpool2x2 + relu ---------------------
    # Computed directly at pooled resolution.  h1[s]: (6*TB, 128) f32 where
    # row = i*TB + n  <->  pooled row (2i + s) of image n, lane = w*10 + c
    # (lanes 0..119 valid, 120..127 forced to 0).  The two dw pooling
    # candidates live in the two 128-lane halves of each 256-wide tap matrix.
    h1 = []
    for s in range(2):
        cands = []
        for dh in range(2):
            acc = jnp.zeros((6 * tb, 256), f32)
            for kh in range(5):
                r = 2 * s + dh + kh                      # input row = 4*i + r
                xs = X[r % 4, (r // 4):(r // 4) + 6].reshape(6 * tb, 28)
                acc = acc + jnp.dot(xs, m1_ref[kh],
                                    preferred_element_type=f32)
            cands.append(acc)
        mx = jnp.maximum(cands[0], cands[1])             # max over dh
        mx = jnp.maximum(mx[:, 0:128], mx[:, 128:256])   # max over dw halves
        h1.append(jnp.maximum(mx + b1_ref[...], 0.0))    # (6*TB, 128)

    # ---- conv2 (10->20, 5x5) + bias + maxpool2x2 + relu --------------------
    # h2: (4*TB, 128) f32, row = P*TB + n, lane = Q*20 + co (0..79 valid).
    cands2 = []
    for dh in range(2):
        acc = jnp.zeros((4 * tb, 256), f32)
        for kh in range(5):
            u = dh + kh                                  # h1 row offset
            sl = h1[u % 2][(u // 2) * tb:(u // 2 + 4) * tb, :]   # (4*TB, 128)
            acc = acc + jnp.dot(sl.astype(bf16), m2_ref[kh],
                                preferred_element_type=f32)
        cands2.append(acc)
    mx2 = jnp.maximum(cands2[0], cands2[1])
    mx2 = jnp.maximum(mx2[:, 0:128], mx2[:, 128:256])
    h2 = jnp.maximum(mx2 + b2_ref[...], 0.0)             # (4*TB, 128)

    # ---- fc1 (320 -> 50) + relu: ONE matmul ---------------------------------
    # Lay the four P-slices out along lanes (each 128-padded) -> (TB, 512) and
    # contract against the (512, 64) weight (NCHW flatten folded in host-side).
    h2c = jnp.concatenate([h2[p * tb:(p + 1) * tb, :] for p in range(4)],
                          axis=1)                        # (TB, 512)
    z1 = jnp.dot(h2c.astype(bf16), w1_ref[...], preferred_element_type=f32)
    z1 = jnp.maximum(z1 + fb1_ref[...], 0.0)             # (TB, 64), 50 valid

    # ---- fc2 (50 -> 10) + log_softmax (classes padded to 128 lanes) --------
    z2 = jnp.dot(z1.astype(bf16), w2_ref[...], preferred_element_type=f32)
    z2 = z2 + fb2_ref[...]                               # (TB, 128), 10 valid
    lane = jax.lax.broadcasted_iota(jnp.int32, z2.shape, 1)
    z2 = jnp.where(lane < 10, z2, -1e30)                 # mask padded classes
    m = jnp.max(z2, axis=-1, keepdims=True)
    sh = z2 - m
    lse = jnp.log(jnp.sum(jnp.exp(sh), axis=-1, keepdims=True))
    o_ref[...] = (sh - lse).astype(o_ref.dtype)          # (TB, 128) lane-dense


# -------------------------- host-side operand prep -------------------------- #

def _prepare_operands(x, params):
    """Batch-independent weight re-layouts (bf16) + cheap input permute."""
    f32, bf16 = jnp.float32, jnp.bfloat16
    x = x.reshape(-1, 28, 28).astype(f32)                # == x.view(-1, 1, 28, 28)
    n = x.shape[0]
    tb = min(64, _round_up(n, 16))                       # batch tile (mult of 16)
    n_pad = _round_up(n, tb)
    if n_pad != n:
        x = jnp.pad(x, ((0, n_pad - n), (0, 0), (0, 0)))
    # Row-phase split mod 4, batch on the sublane axis: xr[a, i, n, j] = x[n, 4i+a, j]
    xr = x.reshape(n_pad, 7, 4, 28).transpose(2, 1, 0, 3).astype(bf16)  # (4,7,N,28)

    k_idx = jnp.arange(5)[None, None, :]

    # conv1 taps: per tap-row kh a (28, 256) matrix; dw candidates in lane halves.
    #   m1[kh][m, 128*dw + w*10 + c] = w1[c, kh, m - 2w - dw]  (when in [0, 4])
    w1k = params["conv1_w"][:, 0].transpose(1, 2, 0).astype(f32)        # (5,5,10)
    m_idx = jnp.arange(28)[:, None, None]
    w_idx = jnp.arange(12)[None, :, None]
    m1_parts = []
    for dw in range(2):
        sel = (m_idx == 2 * w_idx + k_idx + dw).astype(f32)             # (28,12,5)
        t = jnp.einsum('mwk,hkc->hmwc', sel, w1k).reshape(5, 28, 120)
        m1_parts.append(jnp.pad(t, ((0, 0), (0, 0), (0, 8))))
    m1 = jnp.concatenate(m1_parts, axis=-1).astype(bf16)                # (5,28,256)
    b1 = jnp.pad(jnp.tile(params["conv1_b"].astype(f32), 12), (0, 8)).reshape(1, 128)

    # conv2 taps: per kh a (128, 256) matrix (K rows = h1 lane layout, zero-padded).
    #   m2[kh][w*10 + c, 128*dw + Q*20 + co] = w2[co, c, kh, w - 2Q - dw]
    w2t = params["conv2_w"].transpose(2, 3, 1, 0).astype(f32)           # (5,5,10,20)
    wi_idx = jnp.arange(12)[:, None, None]
    q_idx = jnp.arange(4)[None, :, None]
    m2_parts = []
    for dw in range(2):
        sel = (wi_idx == 2 * q_idx + k_idx + dw).astype(f32)            # (12,4,5)
        t = jnp.einsum('wqk,hkcd->hwcqd', sel, w2t).reshape(5, 120, 80)
        m2_parts.append(jnp.pad(t, ((0, 0), (0, 8), (0, 48))))
    m2 = jnp.concatenate(m2_parts, axis=-1).astype(bf16)                # (5,128,256)
    b2 = jnp.pad(jnp.tile(params["conv2_b"].astype(f32), 4), (0, 48)).reshape(1, 128)

    # fc1 with PyTorch's NCHW view(-1, 320) folded in; K laid out as 4 x 128-lane
    # blocks matching the kernel's lane-concat of the P-slices.
    w1r = (params["fc1_w"].astype(f32).reshape(50, 20, 4, 4)
           .transpose(2, 3, 1, 0).reshape(4, 80, 50))                   # [P, Q*20+co, o]
    w1 = jnp.pad(w1r, ((0, 0), (0, 48), (0, 14))).reshape(512, 64).astype(bf16)
    fb1 = jnp.pad(params["fc1_b"].astype(f32), (0, 14)).reshape(1, 64)

    w2f = jnp.pad(params["fc2_w"].astype(f32).T, ((0, 14), (0, 118))).astype(bf16)  # (64,128)
    fb2 = jnp.pad(params["fc2_b"].astype(f32), (0, 118)).reshape(1, 128)

    return (xr, m1, b1, m2, b2, w1, fb1, w2f, fb2), n, n_pad, tb


# ------------------------------- forward pass -------------------------------- #

def mnist_convnet_forward(x, params):
    ops, n, n_pad, tb = _prepare_operands(x, params)
    grid = n_pad // tb

    def _const(shape):
        nd = len(shape)
        return pl.BlockSpec(shape, lambda i, _nd=nd: (0,) * _nd)

    out = pl.pallas_call(
        convnet_kernel,
        out_shape=jax.ShapeDtypeStruct((n_pad, 128), jnp.float32),
        grid=(grid,),
        in_specs=[
            pl.BlockSpec((4, 7, tb, 28), lambda i: (0, 0, i, 0)),  # input (batch tile)
            _const((5, 28, 256)),                                  # conv1 taps (bf16)
            _const((1, 128)),                                      # conv1 bias
            _const((5, 128, 256)),                                 # conv2 taps (bf16)
            _const((1, 128)),                                      # conv2 bias
            _const((512, 64)),                                     # fc1 (permuted, bf16)
            _const((1, 64)),                                       # fc1 bias
            _const((64, 128)),                                     # fc2 (bf16)
            _const((1, 128)),                                      # fc2 bias
        ],
        out_specs=pl.BlockSpec((tb, 128), lambda i: (i, 0)),       # lane-dense output
        compiler_params=pltpu.CompilerParams(
            dimension_semantics=("parallel",)),                    # v7x: 2 TCs share grid
    )(*ops)
    return out[:n, :10]


# ---------------------- pure-JAX reference (for checking) -------------------- #

def reference_forward(x, params):
    x = x.reshape(-1, 1, 28, 28)

    def conv(h, w, b):
        out = jax.lax.conv_general_dilated(
            h, w, window_strides=(1, 1), padding='VALID',
            dimension_numbers=('NCHW', 'OIHW', 'NCHW'))
        return out + b[None, :, None, None]

    def pool_relu(h):
        nb, c, hh, ww = h.shape
        h = h.reshape(nb, c, hh // 2, 2, ww // 2, 2).max(axis=(3, 5))
        return jnp.maximum(h, 0.0)

    h = pool_relu(conv(x, params["conv1_w"], params["conv1_b"]))
    h = pool_relu(conv(h, params["conv2_w"], params["conv2_b"]))
    h = h.reshape(h.shape[0], -1)                                   # NCHW flatten (320)
    h = jnp.maximum(h @ params["fc1_w"].T + params["fc1_b"], 0.0)
    h = h @ params["fc2_w"].T + params["fc2_b"]
    return jax.nn.log_softmax(h, axis=-1)


def init_params(key):
    """Deterministic synthetic init (PyTorch-style uniform(-1/sqrt(fan_in), ...))."""
    ks = jax.random.split(key, 8)

    def u(k, shape, fan_in):
        bound = 1.0 / jnp.sqrt(jnp.float32(fan_in))
        return jax.random.uniform(k, shape, jnp.float32, -bound, bound)

    return {
        "conv1_w": u(ks[0], (10, 1, 5, 5), 1 * 25),
        "conv1_b": u(ks[1], (10,), 1 * 25),
        "conv2_w": u(ks[2], (20, 10, 5, 5), 10 * 25),
        "conv2_b": u(ks[3], (20,), 10 * 25),
        "fc1_w":   u(ks[4], (50, 320), 320),
        "fc1_b":   u(ks[5], (50,), 320),
        "fc2_w":   u(ks[6], (10, 50), 50),
        "fc2_b":   u(ks[7], (10,), 50),
    }


if __name__ == "__main__":
    key = jax.random.PRNGKey(0)
    pkey, xkey = jax.random.split(key)
    params = init_params(pkey)
    x = jax.random.normal(xkey, (2, 1, 28, 28), jnp.float32)  # 28x28 forced by view()

    out = jax.jit(mnist_convnet_forward)(x, params)
    out = jax.block_until_ready(out)
    assert out.shape == (2, 10), out.shape

    # log_softmax rows must sum to ~1 in probability space.
    assert bool(jnp.all(jnp.abs(jnp.sum(jnp.exp(out), axis=1) - 1.0) < 1e-4))

    # Match the plain-JAX (PyTorch-equivalent) f32 reference (MXU ops are bf16).
    ref = jax.block_until_ready(jax.jit(reference_forward)(x, params))
    max_err = float(jnp.max(jnp.abs(out - ref)))
    assert max_err < 1e-2, f"mismatch vs reference: {max_err}"

    print("KERNEL_OK")
</pallas_src>

<mosaic_0001>
module attributes {stable_mosaic.version = 11 : i64} {
  func.func @convnet_kernel(%arg0: i32, %arg1: memref<4x7x16x28xbf16, #tpu.memory_space<vmem>>, %arg2: memref<5x28x256xbf16, #tpu.memory_space<vmem>>, %arg3: memref<1x128xf32, #tpu.memory_space<vmem>>, %arg4: memref<5x128x256xbf16, #tpu.memory_space<vmem>>, %arg5: memref<1x128xf32, #tpu.memory_space<vmem>>, %arg6: memref<512x64xbf16, #tpu.memory_space<vmem>>, %arg7: memref<1x64xf32, #tpu.memory_space<vmem>>, %arg8: memref<64x128xbf16, #tpu.memory_space<vmem>>, %arg9: memref<1x128xf32, #tpu.memory_space<vmem>>, %arg10: memref<16x128xf32, #tpu.memory_space<vmem>>) attributes {dimension_semantics = [#tpu.dimension_semantics<parallel>], iteration_bounds = array<i64: 1>, scalar_prefetch = 0 : i64, scratch_operands = 0 : i64, tpu.core_type = #tpu.core_type<tc>, window_params = [{transform_indices = @transform_0, window_bounds = array<i64: 4, 7, 16, 28>}, {pipeline_mode = #tpu.pipeline_mode<synchronous>, transform_indices = @transform_1, window_bounds = array<i64: 5, 28, 256>}, {pipeline_mode = #tpu.pipeline_mode<synchronous>, transform_indices = @transform_2, window_bounds = array<i64: 1, 128>}, {pipeline_mode = #tpu.pipeline_mode<synchronous>, transform_indices = @transform_3, window_bounds = array<i64: 5, 128, 256>}, {pipeline_mode = #tpu.pipeline_mode<synchronous>, transform_indices = @transform_4, window_bounds = array<i64: 1, 128>}, {pipeline_mode = #tpu.pipeline_mode<synchronous>, transform_indices = @transform_5, window_bounds = array<i64: 512, 64>}, {pipeline_mode = #tpu.pipeline_mode<synchronous>, transform_indices = @transform_6, window_bounds = array<i64: 1, 64>}, {pipeline_mode = #tpu.pipeline_mode<synchronous>, transform_indices = @transform_7, window_bounds = array<i64: 64, 128>}, {pipeline_mode = #tpu.pipeline_mode<synchronous>, transform_indices = @transform_8, window_bounds = array<i64: 1, 128>}, {transform_indices = @transform_9, window_bounds = array<i64: 16, 128>}]} {
    %c0 = arith.constant 0 : index
    %c0_0 = arith.constant 0 : index
    %c0_1 = arith.constant 0 : index
    %c0_2 = arith.constant 0 : index
    %0 = vector.load %arg1[%c0, %c0_0, %c0_1, %c0_2] : memref<4x7x16x28xbf16, #tpu.memory_space<vmem>>, vector<4x7x16x28xbf16>
    %cst = arith.constant 0.000000e+00 : f32
    %1 = vector.broadcast %cst : f32 to vector<96x256xf32>
    %2 = vector.extract_strided_slice %0 {offsets = [0, 0, 0, 0], sizes = [1, 6, 16, 28], strides = [1, 1, 1, 1]} : vector<4x7x16x28xbf16> to vector<1x6x16x28xbf16>
    %3 = vector.shape_cast %2 : vector<1x6x16x28xbf16> to vector<6x16x28xbf16>
    %4 = vector.shape_cast %3 : vector<6x16x28xbf16> to vector<96x28xbf16>
    %c0_3 = arith.constant 0 : index
    %c0_4 = arith.constant 0 : index
    %c0_5 = arith.constant 0 : index
    %5 = vector.load %arg2[%c0_3, %c0_4, %c0_5] : memref<5x28x256xbf16, #tpu.memory_space<vmem>>, vector<1x28x256xbf16>
    %6 = vector.shape_cast %5 : vector<1x28x256xbf16> to vector<28x256xbf16>
    %cst_6 = arith.constant dense<0.000000e+00> : vector<96x256xf32>
    %7 = tpu.matmul %4, %6, %cst_6 {dimension_numbers = #tpu.dot_dimension_numbers<[1], [0], [0], [1], [0, 0, 1, 1], [], []>} : vector<96x28xbf16>, vector<28x256xbf16>, vector<96x256xf32> -> vector<96x256xf32>
    %8 = arith.addf %1, %7 : vector<96x256xf32>
    %9 = vector.extract_strided_slice %0 {offsets = [1, 0, 0, 0], sizes = [1, 6, 16, 28], strides = [1, 1, 1, 1]} : vector<4x7x16x28xbf16> to vector<1x6x16x28xbf16>
    %10 = vector.shape_cast %9 : vector<1x6x16x28xbf16> to vector<6x16x28xbf16>
    %11 = vector.shape_cast %10 : vector<6x16x28xbf16> to vector<96x28xbf16>
    %c1 = arith.constant 1 : index
    %c0_7 = arith.constant 0 : index
    %c0_8 = arith.constant 0 : index
    %12 = vector.load %arg2[%c1, %c0_7, %c0_8] : memref<5x28x256xbf16, #tpu.memory_space<vmem>>, vector<1x28x256xbf16>
    %13 = vector.shape_cast %12 : vector<1x28x256xbf16> to vector<28x256xbf16>
    %cst_9 = arith.constant dense<0.000000e+00> : vector<96x256xf32>
    %14 = tpu.matmul %11, %13, %cst_9 {dimension_numbers = #tpu.dot_dimension_numbers<[1], [0], [0], [1], [0, 0, 1, 1], [], []>} : vector<96x28xbf16>, vector<28x256xbf16>, vector<96x256xf32> -> vector<96x256xf32>
    %15 = arith.addf %8, %14 : vector<96x256xf32>
    %16 = vector.extract_strided_slice %0 {offsets = [2, 0, 0, 0], sizes = [1, 6, 16, 28], strides = [1, 1, 1, 1]} : vector<4x7x16x28xbf16> to vector<1x6x16x28xbf16>
    %17 = vector.shape_cast %16 : vector<1x6x16x28xbf16> to vector<6x16x28xbf16>
    %18 = vector.shape_cast %17 : vector<6x16x28xbf16> to vector<96x28xbf16>
    %c2 = arith.constant 2 : index
    %c0_10 = arith.constant 0 : index
    %c0_11 = arith.constant 0 : index
    %19 = vector.load %arg2[%c2, %c0_10, %c0_11] : memref<5x28x256xbf16, #tpu.memory_space<vmem>>, vector<1x28x256xbf16>
    %20 = vector.shape_cast %19 : vector<1x28x256xbf16> to vector<28x256xbf16>
    %cst_12 = arith.constant dense<0.000000e+00> : vector<96x256xf32>
    %21 = tpu.matmul %18, %20, %cst_12 {dimension_numbers = #tpu.dot_dimension_numbers<[1], [0], [0], [1], [0, 0, 1, 1], [], []>} : vector<96x28xbf16>, vector<28x256xbf16>, vector<96x256xf32> -> vector<96x256xf32>
    %22 = arith.addf %15, %21 : vector<96x256xf32>
    %23 = vector.extract_strided_slice %0 {offsets = [3, 0, 0, 0], sizes = [1, 6, 16, 28], strides = [1, 1, 1, 1]} : vector<4x7x16x28xbf16> to vector<1x6x16x28xbf16>
    %24 = vector.shape_cast %23 : vector<1x6x16x28xbf16> to vector<6x16x28xbf16>
    %25 = vector.shape_cast %24 : vector<6x16x28xbf16> to vector<96x28xbf16>
    %c3 = arith.constant 3 : index
    %c0_13 = arith.constant 0 : index
    %c0_14 = arith.constant 0 : index
    %26 = vector.load %arg2[%c3, %c0_13, %c0_14] : memref<5x28x256xbf16, #tpu.memory_space<vmem>>, vector<1x28x256xbf16>
    %27 = vector.shape_cast %26 : vector<1x28x256xbf16> to vector<28x256xbf16>
    %cst_15 = arith.constant dense<0.000000e+00> : vector<96x256xf32>
    %28 = tpu.matmul %25, %27, %cst_15 {dimension_numbers = #tpu.dot_dimension_numbers<[1], [0], [0], [1], [0, 0, 1, 1], [], []>} : vector<96x28xbf16>, vector<28x256xbf16>, vector<96x256xf32> -> vector<96x256xf32>
    %29 = arith.addf %22, %28 : vector<96x256xf32>
    %30 = vector.extract_strided_slice %0 {offsets = [0, 1, 0, 0], sizes = [1, 6, 16, 28], strides = [1, 1, 1, 1]} : vector<4x7x16x28xbf16> to vector<1x6x16x28xbf16>
    %31 = vector.shape_cast %30 : vector<1x6x16x28xbf16> to vector<6x16x28xbf16>
    %32 = vector.shape_cast %31 : vector<6x16x28xbf16> to vector<96x28xbf16>
    %c4 = arith.constant 4 : index
    %c0_16 = arith.constant 0 : index
    %c0_17 = arith.constant 0 : index
    %33 = vector.load %arg2[%c4, %c0_16, %c0_17] : memref<5x28x256xbf16, #tpu.memory_space<vmem>>, vector<1x28x256xbf16>
    %34 = vector.shape_cast %33 : vector<1x28x256xbf16> to vector<28x256xbf16>
    %cst_18 = arith.constant dense<0.000000e+00> : vector<96x256xf32>
    %35 = tpu.matmul %32, %34, %cst_18 {dimension_numbers = #tpu.dot_dimension_numbers<[1], [0], [0], [1], [0, 0, 1, 1], [], []>} : vector<96x28xbf16>, vector<28x256xbf16>, vector<96x256xf32> -> vector<96x256xf32>
    %36 = arith.addf %29, %35 : vector<96x256xf32>
    %cst_19 = arith.constant 0.000000e+00 : f32
    %37 = vector.broadcast %cst_19 : f32 to vector<96x256xf32>
    %38 = vector.extract_strided_slice %0 {offsets = [1, 0, 0, 0], sizes = [1, 6, 16, 28], strides = [1, 1, 1, 1]} : vector<4x7x16x28xbf16> to vector<1x6x16x28xbf16>
    %39 = vector.shape_cast %38 : vector<1x6x16x28xbf16> to vector<6x16x28xbf16>
    %40 = vector.shape_cast %39 : vector<6x16x28xbf16> to vector<96x28xbf16>
    %c0_20 = arith.constant 0 : index
    %c0_21 = arith.constant 0 : index
    %c0_22 = arith.constant 0 : index
    %41 = vector.load %arg2[%c0_20, %c0_21, %c0_22] : memref<5x28x256xbf16, #tpu.memory_space<vmem>>, vector<1x28x256xbf16>
    %42 = vector.shape_cast %41 : vector<1x28x256xbf16> to vector<28x256xbf16>
    %cst_23 = arith.constant dense<0.000000e+00> : vector<96x256xf32>
    %43 = tpu.matmul %40, %42, %cst_23 {dimension_numbers = #tpu.dot_dimension_numbers<[1], [0], [0], [1], [0, 0, 1, 1], [], []>} : vector<96x28xbf16>, vector<28x256xbf16>, vector<96x256xf32> -> vector<96x256xf32>
    %44 = arith.addf %37, %43 : vector<96x256xf32>
    %45 = vector.extract_strided_slice %0 {offsets = [2, 0, 0, 0], sizes = [1, 6, 16, 28], strides = [1, 1, 1, 1]} : vector<4x7x16x28xbf16> to vector<1x6x16x28xbf16>
    %46 = vector.shape_cast %45 : vector<1x6x16x28xbf16> to vector<6x16x28xbf16>
    %47 = vector.shape_cast %46 : vector<6x16x28xbf16> to vector<96x28xbf16>
    %c1_24 = arith.constant 1 : index
    %c0_25 = arith.constant 0 : index
    %c0_26 = arith.constant 0 : index
    %48 = vector.load %arg2[%c1_24, %c0_25, %c0_26] : memref<5x28x256xbf16, #tpu.memory_space<vmem>>, vector<1x28x256xbf16>
    %49 = vector.shape_cast %48 : vector<1x28x256xbf16> to vector<28x256xbf16>
    %cst_27 = arith.constant dense<0.000000e+00> : vector<96x256xf32>
    %50 = tpu.matmul %47, %49, %cst_27 {dimension_numbers = #tpu.dot_dimension_numbers<[1], [0], [0], [1], [0, 0, 1, 1], [], []>} : vector<96x28xbf16>, vector<28x256xbf16>, vector<96x256xf32> -> vector<96x256xf32>
    %51 = arith.addf %44, %50 : vector<96x256xf32>
    %52 = vector.extract_strided_slice %0 {offsets = [3, 0, 0, 0], sizes = [1, 6, 16, 28], strides = [1, 1, 1, 1]} : vector<4x7x16x28xbf16> to vector<1x6x16x28xbf16>
    %53 = vector.shape_cast %52 : vector<1x6x16x28xbf16> to vector<6x16x28xbf16>
    %54 = vector.shape_cast %53 : vector<6x16x28xbf16> to vector<96x28xbf16>
    %c2_28 = arith.constant 2 : index
    %c0_29 = arith.constant 0 : index
    %c0_30 = arith.constant 0 : index
    %55 = vector.load %arg2[%c2_28, %c0_29, %c0_30] : memref<5x28x256xbf16, #tpu.memory_space<vmem>>, vector<1x28x256xbf16>
    %56 = vector.shape_cast %55 : vector<1x28x256xbf16> to vector<28x256xbf16>
    %cst_31 = arith.constant dense<0.000000e+00> : vector<96x256xf32>
    %57 = tpu.matmul %54, %56, %cst_31 {dimension_numbers = #tpu.dot_dimension_numbers<[1], [0], [0], [1], [0, 0, 1, 1], [], []>} : vector<96x28xbf16>, vector<28x256xbf16>, vector<96x256xf32> -> vector<96x256xf32>
    %58 = arith.addf %51, %57 : vector<96x256xf32>
    %59 = vector.extract_strided_slice %0 {offsets = [0, 1, 0, 0], sizes = [1, 6, 16, 28], strides = [1, 1, 1, 1]} : vector<4x7x16x28xbf16> to vector<1x6x16x28xbf16>
    %60 = vector.shape_cast %59 : vector<1x6x16x28xbf16> to vector<6x16x28xbf16>
    %61 = vector.shape_cast %60 : vector<6x16x28xbf16> to vector<96x28xbf16>
    %c3_32 = arith.constant 3 : index
    %c0_33 = arith.constant 0 : index
    %c0_34 = arith.constant 0 : index
    %62 = vector.load %arg2[%c3_32, %c0_33, %c0_34] : memref<5x28x256xbf16, #tpu.memory_space<vmem>>, vector<1x28x256xbf16>
    %63 = vector.shape_cast %62 : vector<1x28x256xbf16> to vector<28x256xbf16>
    %cst_35 = arith.constant dense<0.000000e+00> : vector<96x256xf32>
    %64 = tpu.matmul %61, %63, %cst_35 {dimension_numbers = #tpu.dot_dimension_numbers<[1], [0], [0], [1], [0, 0, 1, 1], [], []>} : vector<96x28xbf16>, vector<28x256xbf16>, vector<96x256xf32> -> vector<96x256xf32>
    %65 = arith.addf %58, %64 : vector<96x256xf32>
    %66 = vector.extract_strided_slice %0 {offsets = [1, 1, 0, 0], sizes = [1, 6, 16, 28], strides = [1, 1, 1, 1]} : vector<4x7x16x28xbf16> to vector<1x6x16x28xbf16>
    %67 = vector.shape_cast %66 : vector<1x6x16x28xbf16> to vector<6x16x28xbf16>
    %68 = vector.shape_cast %67 : vector<6x16x28xbf16> to vector<96x28xbf16>
    %c4_36 = arith.constant 4 : index
    %c0_37 = arith.constant 0 : index
    %c0_38 = arith.constant 0 : index
    %69 = vector.load %arg2[%c4_36, %c0_37, %c0_38] : memref<5x28x256xbf16, #tpu.memory_space<vmem>>, vector<1x28x256xbf16>
    %70 = vector.shape_cast %69 : vector<1x28x256xbf16> to vector<28x256xbf16>
    %cst_39 = arith.constant dense<0.000000e+00> : vector<96x256xf32>
    %71 = tpu.matmul %68, %70, %cst_39 {dimension_numbers = #tpu.dot_dimension_numbers<[1], [0], [0], [1], [0, 0, 1, 1], [], []>} : vector<96x28xbf16>, vector<28x256xbf16>, vector<96x256xf32> -> vector<96x256xf32>
    %72 = arith.addf %65, %71 : vector<96x256xf32>
    %73 = arith.maximumf %36, %72 : vector<96x256xf32>
    %74 = vector.extract_strided_slice %73 {offsets = [0, 0], sizes = [96, 128], strides = [1, 1]} : vector<96x256xf32> to vector<96x128xf32>
    %75 = vector.extract_strided_slice %73 {offsets = [0, 128], sizes = [96, 128], strides = [1, 1]} : vector<96x256xf32> to vector<96x128xf32>
    %76 = arith.maximumf %74, %75 : vector<96x128xf32>
    %c0_40 = arith.constant 0 : index
    %c0_41 = arith.constant 0 : index
    %77 = vector.load %arg3[%c0_40, %c0_41] : memref<1x128xf32, #tpu.memory_space<vmem>>, vector<1x128xf32>
    %78 = vector.broadcast %77 : vector<1x128xf32> to vector<96x128xf32>
    %79 = arith.addf %76, %78 : vector<96x128xf32>
    %cst_42 = arith.constant 0.000000e+00 : f32
    %80 = vector.broadcast %cst_42 : f32 to vector<96x128xf32>
    %81 = arith.maximumf %79, %80 : vector<96x128xf32>
    %cst_43 = arith.constant 0.000000e+00 : f32
    %82 = vector.broadcast %cst_43 : f32 to vector<96x256xf32>
    %83 = vector.extract_strided_slice %0 {offsets = [2, 0, 0, 0], sizes = [1, 6, 16, 28], strides = [1, 1, 1, 1]} : vector<4x7x16x28xbf16> to vector<1x6x16x28xbf16>
    %84 = vector.shape_cast %83 : vector<1x6x16x28xbf16> to vector<6x16x28xbf16>
    %85 = vector.shape_cast %84 : vector<6x16x28xbf16> to vector<96x28xbf16>
    %c0_44 = arith.constant 0 : index
    %c0_45 = arith.constant 0 : index
    %c0_46 = arith.constant 0 : index
    %86 = vector.load %arg2[%c0_44, %c0_45, %c0_46] : memref<5x28x256xbf16, #tpu.memory_space<vmem>>, vector<1x28x256xbf16>
    %87 = vector.shape_cast %86 : vector<1x28x256xbf16> to vector<28x256xbf16>
    %cst_47 = arith.constant dense<0.000000e+00> : vector<96x256xf32>
    %88 = tpu.matmul %85, %87, %cst_47 {dimension_numbers = #tpu.dot_dimension_numbers<[1], [0], [0], [1], [0, 0, 1, 1], [], []>} : vector<96x28xbf16>, vector<28x256xbf16>, vector<96x256xf32> -> vector<96x256xf32>
    %89 = arith.addf %82, %88 : vector<96x256xf32>
    %90 = vector.extract_strided_slice %0 {offsets = [3, 0, 0, 0], sizes = [1, 6, 16, 28], strides = [1, 1, 1, 1]} : vector<4x7x16x28xbf16> to vector<1x6x16x28xbf16>
    %91 = vector.shape_cast %90 : vector<1x6x16x28xbf16> to vector<6x16x28xbf16>
    %92 = vector.shape_cast %91 : vector<6x16x28xbf16> to vector<96x28xbf16>
    %c1_48 = arith.constant 1 : index
    %c0_49 = arith.constant 0 : index
    %c0_50 = arith.constant 0 : index
    %93 = vector.load %arg2[%c1_48, %c0_49, %c0_50] : memref<5x28x256xbf16, #tpu.memory_space<vmem>>, vector<1x28x256xbf16>
    %94 = vector.shape_cast %93 : vector<1x28x256xbf16> to vector<28x256xbf16>
    %cst_51 = arith.constant dense<0.000000e+00> : vector<96x256xf32>
    %95 = tpu.matmul %92, %94, %cst_51 {dimension_numbers = #tpu.dot_dimension_numbers<[1], [0], [0], [1], [0, 0, 1, 1], [], []>} : vector<96x28xbf16>, vector<28x256xbf16>, vector<96x256xf32> -> vector<96x256xf32>
    %96 = arith.addf %89, %95 : vector<96x256xf32>
    %97 = vector.extract_strided_slice %0 {offsets = [0, 1, 0, 0], sizes = [1, 6, 16, 28], strides = [1, 1, 1, 1]} : vector<4x7x16x28xbf16> to vector<1x6x16x28xbf16>
    %98 = vector.shape_cast %97 : vector<1x6x16x28xbf16> to vector<6x16x28xbf16>
    %99 = vector.shape_cast %98 : vector<6x16x28xbf16> to vector<96x28xbf16>
    %c2_52 = arith.constant 2 : index
    %c0_53 = arith.constant 0 : index
    %c0_54 = arith.constant 0 : index
    %100 = vector.load %arg2[%c2_52, %c0_53, %c0_54] : memref<5x28x256xbf16, #tpu.memory_space<vmem>>, vector<1x28x256xbf16>
    %101 = vector.shape_cast %100 : vector<1x28x256xbf16> to vector<28x256xbf16>
    %cst_55 = arith.constant dense<0.000000e+00> : vector<96x256xf32>
    %102 = tpu.matmul %99, %101, %cst_55 {dimension_numbers = #tpu.dot_dimension_numbers<[1], [0], [0], [1], [0, 0, 1, 1], [], []>} : vector<96x28xbf16>, vector<28x256xbf16>, vector<96x256xf32> -> vector<96x256xf32>
    %103 = arith.addf %96, %102 : vector<96x256xf32>
    %104 = vector.extract_strided_slice %0 {offsets = [1, 1, 0, 0], sizes = [1, 6, 16, 28], strides = [1, 1, 1, 1]} : vector<4x7x16x28xbf16> to vector<1x6x16x28xbf16>
    %105 = vector.shape_cast %104 : vector<1x6x16x28xbf16> to vector<6x16x28xbf16>
    %106 = vector.shape_cast %105 : vector<6x16x28xbf16> to vector<96x28xbf16>
    %c3_56 = arith.constant 3 : index
    %c0_57 = arith.constant 0 : index
    %c0_58 = arith.constant 0 : index
    %107 = vector.load %arg2[%c3_56, %c0_57, %c0_58] : memref<5x28x256xbf16, #tpu.memory_space<vmem>>, vector<1x28x256xbf16>
    %108 = vector.shape_cast %107 : vector<1x28x256xbf16> to vector<28x256xbf16>
    %cst_59 = arith.constant dense<0.000000e+00> : vector<96x256xf32>
    %109 = tpu.matmul %106, %108, %cst_59 {dimension_numbers = #tpu.dot_dimension_numbers<[1], [0], [0], [1], [0, 0, 1, 1], [], []>} : vector<96x28xbf16>, vector<28x256xbf16>, vector<96x256xf32> -> vector<96x256xf32>
    %110 = arith.addf %103, %109 : vector<96x256xf32>
    %111 = vector.extract_strided_slice %0 {offsets = [2, 1, 0, 0], sizes = [1, 6, 16, 28], strides = [1, 1, 1, 1]} : vector<4x7x16x28xbf16> to vector<1x6x16x28xbf16>
    %112 = vector.shape_cast %111 : vector<1x6x16x28xbf16> to vector<6x16x28xbf16>
    %113 = vector.shape_cast %112 : vector<6x16x28xbf16> to vector<96x28xbf16>
    %c4_60 = arith.constant 4 : index
    %c0_61 = arith.constant 0 : index
    %c0_62 = arith.constant 0 : index
    %114 = vector.load %arg2[%c4_60, %c0_61, %c0_62] : memref<5x28x256xbf16, #tpu.memory_space<vmem>>, vector<1x28x256xbf16>
    %115 = vector.shape_cast %114 : vector<1x28x256xbf16> to vector<28x256xbf16>
    %cst_63 = arith.constant dense<0.000000e+00> : vector<96x256xf32>
    %116 = tpu.matmul %113, %115, %cst_63 {dimension_numbers = #tpu.dot_dimension_numbers<[1], [0], [0], [1], [0, 0, 1, 1], [], []>} : vector<96x28xbf16>, vector<28x256xbf16>, vector<96x256xf32> -> vector<96x256xf32>
    %117 = arith.addf %110, %116 : vector<96x256xf32>
    %cst_64 = arith.constant 0.000000e+00 : f32
    %118 = vector.broadcast %cst_64 : f32 to vector<96x256xf32>
    %119 = vector.extract_strided_slice %0 {offsets = [3, 0, 0, 0], sizes = [1, 6, 16, 28], strides = [1, 1, 1, 1]} : vector<4x7x16x28xbf16> to vector<1x6x16x28xbf16>
    %120 = vector.shape_cast %119 : vector<1x6x16x28xbf16> to vector<6x16x28xbf16>
    %121 = vector.shape_cast %120 : vector<6x16x28xbf16> to vector<96x28xbf16>
    %c0_65 = arith.constant 0 : index
    %c0_66 = arith.constant 0 : index
    %c0_67 = arith.constant 0 : index
    %122 = vector.load %arg2[%c0_65, %c0_66, %c0_67] : memref<5x28x256xbf16, #tpu.memory_space<vmem>>, vector<1x28x256xbf16>
    %123 = vector.shape_cast %122 : vector<1x28x256xbf16> to vector<28x256xbf16>
    %cst_68 = arith.constant dense<0.000000e+00> : vector<96x256xf32>
    %124 = tpu.matmul %121, %123, %cst_68 {dimension_numbers = #tpu.dot_dimension_numbers<[1], [0], [0], [1], [0, 0, 1, 1], [], []>} : vector<96x28xbf16>, vector<28x256xbf16>, vector<96x256xf32> -> vector<96x256xf32>
    %125 = arith.addf %118, %124 : vector<96x256xf32>
    %126 = vector.extract_strided_slice %0 {offsets = [0, 1, 0, 0], sizes = [1, 6, 16, 28], strides = [1, 1, 1, 1]} : vector<4x7x16x28xbf16> to vector<1x6x16x28xbf16>
    %127 = vector.shape_cast %126 : vector<1x6x16x28xbf16> to vector<6x16x28xbf16>
    %128 = vector.shape_cast %127 : vector<6x16x28xbf16> to vector<96x28xbf16>
    %c1_69 = arith.constant 1 : index
    %c0_70 = arith.constant 0 : index
    %c0_71 = arith.constant 0 : index
    %129 = vector.load %arg2[%c1_69, %c0_70, %c0_71] : memref<5x28x256xbf16, #tpu.memory_space<vmem>>, vector<1x28x256xbf16>
    %130 = vector.shape_cast %129 : vector<1x28x256xbf16> to vector<28x256xbf16>
    %cst_72 = arith.constant dense<0.000000e+00> : vector<96x256xf32>
    %131 = tpu.matmul %128, %130, %cst_72 {dimension_numbers = #tpu.dot_dimension_numbers<[1], [0], [0], [1], [0, 0, 1, 1], [], []>} : vector<96x28xbf16>, vector<28x256xbf16>, vector<96x256xf32> -> vector<96x256xf32>
    %132 = arith.addf %125, %131 : vector<96x256xf32>
    %133 = vector.extract_strided_slice %0 {offsets = [1, 1, 0, 0], sizes = [1, 6, 16, 28], strides = [1, 1, 1, 1]} : vector<4x7x16x28xbf16> to vector<1x6x16x28xbf16>
    %134 = vector.shape_cast %133 : vector<1x6x16x28xbf16> to vector<6x16x28xbf16>
    %135 = vector.shape_cast %134 : vector<6x16x28xbf16> to vector<96x28xbf16>
    %c2_73 = arith.constant 2 : index
    %c0_74 = arith.constant 0 : index
    %c0_75 = arith.constant 0 : index
    %136 = vector.load %arg2[%c2_73, %c0_74, %c0_75] : memref<5x28x256xbf16, #tpu.memory_space<vmem>>, vector<1x28x256xbf16>
    %137 = vector.shape_cast %136 : vector<1x28x256xbf16> to vector<28x256xbf16>
    %cst_76 = arith.constant dense<0.000000e+00> : vector<96x256xf32>
    %138 = tpu.matmul %135, %137, %cst_76 {dimension_numbers = #tpu.dot_dimension_numbers<[1], [0], [0], [1], [0, 0, 1, 1], [], []>} : vector<96x28xbf16>, vector<28x256xbf16>, vector<96x256xf32> -> vector<96x256xf32>
    %139 = arith.addf %132, %138 : vector<96x256xf32>
    %140 = vector.extract_strided_slice %0 {offsets = [2, 1, 0, 0], sizes = [1, 6, 16, 28], strides = [1, 1, 1, 1]} : vector<4x7x16x28xbf16> to vector<1x6x16x28xbf16>
    %141 = vector.shape_cast %140 : vector<1x6x16x28xbf16> to vector<6x16x28xbf16>
    %142 = vector.shape_cast %141 : vector<6x16x28xbf16> to vector<96x28xbf16>
    %c3_77 = arith.constant 3 : index
    %c0_78 = arith.constant 0 : index
    %c0_79 = arith.constant 0 : index
    %143 = vector.load %arg2[%c3_77, %c0_78, %c0_79] : memref<5x28x256xbf16, #tpu.memory_space<vmem>>, vector<1x28x256xbf16>
    %144 = vector.shape_cast %143 : vector<1x28x256xbf16> to vector<28x256xbf16>
    %cst_80 = arith.constant dense<0.000000e+00> : vector<96x256xf32>
    %145 = tpu.matmul %142, %144, %cst_80 {dimension_numbers = #tpu.dot_dimension_numbers<[1], [0], [0], [1], [0, 0, 1, 1], [], []>} : vector<96x28xbf16>, vector<28x256xbf16>, vector<96x256xf32> -> vector<96x256xf32>
    %146 = arith.addf %139, %145 : vector<96x256xf32>
    %147 = vector.extract_strided_slice %0 {offsets = [3, 1, 0, 0], sizes = [1, 6, 16, 28], strides = [1, 1, 1, 1]} : vector<4x7x16x28xbf16> to vector<1x6x16x28xbf16>
    %148 = vector.shape_cast %147 : vector<1x6x16x28xbf16> to vector<6x16x28xbf16>
    %149 = vector.shape_cast %148 : vector<6x16x28xbf16> to vector<96x28xbf16>
    %c4_81 = arith.constant 4 : index
    %c0_82 = arith.constant 0 : index
    %c0_83 = arith.constant 0 : index
    %150 = vector.load %arg2[%c4_81, %c0_82, %c0_83] : memref<5x28x256xbf16, #tpu.memory_space<vmem>>, vector<1x28x256xbf16>
    %151 = vector.shape_cast %150 : vector<1x28x256xbf16> to vector<28x256xbf16>
    %cst_84 = arith.constant dense<0.000000e+00> : vector<96x256xf32>
    %152 = tpu.matmul %149, %151, %cst_84 {dimension_numbers = #tpu.dot_dimension_numbers<[1], [0], [0], [1], [0, 0, 1, 1], [], []>} : vector<96x28xbf16>, vector<28x256xbf16>, vector<96x256xf32> -> vector<96x256xf32>
    %153 = arith.addf %146, %152 : vector<96x256xf32>
    %154 = arith.maximumf %117, %153 : vector<96x256xf32>
    %155 = vector.extract_strided_slice %154 {offsets = [0, 0], sizes = [96, 128], strides = [1, 1]} : vector<96x256xf32> to vector<96x128xf32>
    %156 = vector.extract_strided_slice %154 {offsets = [0, 128], sizes = [96, 128], strides = [1, 1]} : vector<96x256xf32> to vector<96x128xf32>
    %157 = arith.maximumf %155, %156 : vector<96x128xf32>
    %c0_85 = arith.constant 0 : index
    %c0_86 = arith.constant 0 : index
    %158 = vector.load %arg3[%c0_85, %c0_86] : memref<1x128xf32, #tpu.memory_space<vmem>>, vector<1x128xf32>
    %159 = vector.broadcast %158 : vector<1x128xf32> to vector<96x128xf32>
    %160 = arith.addf %157, %159 : vector<96x128xf32>
    %cst_87 = arith.constant 0.000000e+00 : f32
    %161 = vector.broadcast %cst_87 : f32 to vector<96x128xf32>
    %162 = arith.maximumf %160, %161 : vector<96x128xf32>
    %cst_88 = arith.constant 0.000000e+00 : f32
    %163 = vector.broadcast %cst_88 : f32 to vector<64x256xf32>
    %164 = vector.extract_strided_slice %81 {offsets = [0, 0], sizes = [64, 128], strides = [1, 1]} : vector<96x128xf32> to vector<64x128xf32>
    %165 = arith.truncf %164 : vector<64x128xf32> to vector<64x128xbf16>
    %c0_89 = arith.constant 0 : index
    %c0_90 = arith.constant 0 : index
    %c0_91 = arith.constant 0 : index
    %166 = vector.load %arg4[%c0_89, %c0_90, %c0_91] : memref<5x128x256xbf16, #tpu.memory_space<vmem>>, vector<1x128x256xbf16>
    %167 = vector.shape_cast %166 : vector<1x128x256xbf16> to vector<128x256xbf16>
    %cst_92 = arith.constant dense<0.000000e+00> : vector<64x256xf32>
    %168 = tpu.matmul %165, %167, %cst_92 {dimension_numbers = #tpu.dot_dimension_numbers<[1], [0], [0], [1], [0, 0, 1, 1], [], []>} : vector<64x128xbf16>, vector<128x256xbf16>, vector<64x256xf32> -> vector<64x256xf32>
    %169 = arith.addf %163, %168 : vector<64x256xf32>
    %170 = vector.extract_strided_slice %162 {offsets = [0, 0], sizes = [64, 128], strides = [1, 1]} : vector<96x128xf32> to vector<64x128xf32>
    %171 = arith.truncf %170 : vector<64x128xf32> to vector<64x128xbf16>
    %c1_93 = arith.constant 1 : index
    %c0_94 = arith.constant 0 : index
    %c0_95 = arith.constant 0 : index
    %172 = vector.load %arg4[%c1_93, %c0_94, %c0_95] : memref<5x128x256xbf16, #tpu.memory_space<vmem>>, vector<1x128x256xbf16>
    %173 = vector.shape_cast %172 : vector<1x128x256xbf16> to vector<128x256xbf16>
    %cst_96 = arith.constant dense<0.000000e+00> : vector<64x256xf32>
    %174 = tpu.matmul %171, %173, %cst_96 {dimension_numbers = #tpu.dot_dimension_numbers<[1], [0], [0], [1], [0, 0, 1, 1], [], []>} : vector<64x128xbf16>, vector<128x256xbf16>, vector<64x256xf32> -> vector<64x256xf32>
    %175 = arith.addf %169, %174 : vector<64x256xf32>
    %176 = vector.extract_strided_slice %81 {offsets = [16, 0], sizes = [64, 128], strides = [1, 1]} : vector<96x128xf32> to vector<64x128xf32>
    %177 = arith.truncf %176 : vector<64x128xf32> to vector<64x128xbf16>
    %c2_97 = arith.constant 2 : index
    %c0_98 = arith.constant 0 : index
    %c0_99 = arith.constant 0 : index
    %178 = vector.load %arg4[%c2_97, %c0_98, %c0_99] : memref<5x128x256xbf16, #tpu.memory_space<vmem>>, vector<1x128x256xbf16>
    %179 = vector.shape_cast %178 : vector<1x128x256xbf16> to vector<128x256xbf16>
    %cst_100 = arith.constant dense<0.000000e+00> : vector<64x256xf32>
    %180 = tpu.matmul %177, %179, %cst_100 {dimension_numbers = #tpu.dot_dimension_numbers<[1], [0], [0], [1], [0, 0, 1, 1], [], []>} : vector<64x128xbf16>, vector<128x256xbf16>, vector<64x256xf32> -> vector<64x256xf32>
    %181 = arith.addf %175, %180 : vector<64x256xf32>
    %182 = vector.extract_strided_slice %162 {offsets = [16, 0], sizes = [64, 128], strides = [1, 1]} : vector<96x128xf32> to vector<64x128xf32>
    %183 = arith.truncf %182 : vector<64x128xf32> to vector<64x128xbf16>
    %c3_101 = arith.constant 3 : index
    %c0_102 = arith.constant 0 : index
    %c0_103 = arith.constant 0 : index
    %184 = vector.load %arg4[%c3_101, %c0_102, %c0_103] : memref<5x128x256xbf16, #tpu.memory_space<vmem>>, vector<1x128x256xbf16>
    %185 = vector.shape_cast %184 : vector<1x128x256xbf16> to vector<128x256xbf16>
    %cst_104 = arith.constant dense<0.000000e+00> : vector<64x256xf32>
    %186 = tpu.matmul %183, %185, %cst_104 {dimension_numbers = #tpu.dot_dimension_numbers<[1], [0], [0], [1], [0, 0, 1, 1], [], []>} : vector<64x128xbf16>, vector<128x256xbf16>, vector<64x256xf32> -> vector<64x256xf32>
    %187 = arith.addf %181, %186 : vector<64x256xf32>
    %188 = vector.extract_strided_slice %81 {offsets = [32, 0], sizes = [64, 128], strides = [1, 1]} : vector<96x128xf32> to vector<64x128xf32>
    %189 = arith.truncf %188 : vector<64x128xf32> to vector<64x128xbf16>
    %c4_105 = arith.constant 4 : index
    %c0_106 = arith.constant 0 : index
    %c0_107 = arith.constant 0 : index
    %190 = vector.load %arg4[%c4_105, %c0_106, %c0_107] : memref<5x128x256xbf16, #tpu.memory_space<vmem>>, vector<1x128x256xbf16>
    %191 = vector.shape_cast %190 : vector<1x128x256xbf16> to vector<128x256xbf16>
    %cst_108 = arith.constant dense<0.000000e+00> : vector<64x256xf32>
    %192 = tpu.matmul %189, %191, %cst_108 {dimension_numbers = #tpu.dot_dimension_numbers<[1], [0], [0], [1], [0, 0, 1, 1], [], []>} : vector<64x128xbf16>, vector<128x256xbf16>, vector<64x256xf32> -> vector<64x256xf32>
    %193 = arith.addf %187, %192 : vector<64x256xf32>
    %cst_109 = arith.constant 0.000000e+00 : f32
    %194 = vector.broadcast %cst_109 : f32 to vector<64x256xf32>
    %195 = vector.extract_strided_slice %162 {offsets = [0, 0], sizes = [64, 128], strides = [1, 1]} : vector<96x128xf32> to vector<64x128xf32>
    %196 = arith.truncf %195 : vector<64x128xf32> to vector<64x128xbf16>
    %c0_110 = arith.constant 0 : index
    %c0_111 = arith.constant 0 : index
    %c0_112 = arith.constant 0 : index
    %197 = vector.load %arg4[%c0_110, %c0_111, %c0_112] : memref<5x128x256xbf16, #tpu.memory_space<vmem>>, vector<1x128x256xbf16>
    %198 = vector.shape_cast %197 : vector<1x128x256xbf16> to vector<128x256xbf16>
    %cst_113 = arith.constant dense<0.000000e+00> : vector<64x256xf32>
    %199 = tpu.matmul %196, %198, %cst_113 {dimension_numbers = #tpu.dot_dimension_numbers<[1], [0], [0], [1], [0, 0, 1, 1], [], []>} : vector<64x128xbf16>, vector<128x256xbf16>, vector<64x256xf32> -> vector<64x256xf32>
    %200 = arith.addf %194, %199 : vector<64x256xf32>
    %201 = vector.extract_strided_slice %81 {offsets = [16, 0], sizes = [64, 128], strides = [1, 1]} : vector<96x128xf32> to vector<64x128xf32>
    %202 = arith.truncf %201 : vector<64x128xf32> to vector<64x128xbf16>
    %c1_114 = arith.constant 1 : index
    %c0_115 = arith.constant 0 : index
    %c0_116 = arith.constant 0 : index
    %203 = vector.load %arg4[%c1_114, %c0_115, %c0_116] : memref<5x128x256xbf16, #tpu.memory_space<vmem>>, vector<1x128x256xbf16>
    %204 = vector.shape_cast %203 : vector<1x128x256xbf16> to vector<128x256xbf16>
    %cst_117 = arith.constant dense<0.000000e+00> : vector<64x256xf32>
    %205 = tpu.matmul %202, %204, %cst_117 {dimension_numbers = #tpu.dot_dimension_numbers<[1], [0], [0], [1], [0, 0, 1, 1], [], []>} : vector<64x128xbf16>, vector<128x256xbf16>, vector<64x256xf32> -> vector<64x256xf32>
    %206 = arith.addf %200, %205 : vector<64x256xf32>
    %207 = vector.extract_strided_slice %162 {offsets = [16, 0], sizes = [64, 128], strides = [1, 1]} : vector<96x128xf32> to vector<64x128xf32>
    %208 = arith.truncf %207 : vector<64x128xf32> to vector<64x128xbf16>
    %c2_118 = arith.constant 2 : index
    %c0_119 = arith.constant 0 : index
    %c0_120 = arith.constant 0 : index
    %209 = vector.load %arg4[%c2_118, %c0_119, %c0_120] : memref<5x128x256xbf16, #tpu.memory_space<vmem>>, vector<1x128x256xbf16>
    %210 = vector.shape_cast %209 : vector<1x128x256xbf16> to vector<128x256xbf16>
    %cst_121 = arith.constant dense<0.000000e+00> : vector<64x256xf32>
    %211 = tpu.matmul %208, %210, %cst_121 {dimension_numbers = #tpu.dot_dimension_numbers<[1], [0], [0], [1], [0, 0, 1, 1], [], []>} : vector<64x128xbf16>, vector<128x256xbf16>, vector<64x256xf32> -> vector<64x256xf32>
    %212 = arith.addf %206, %211 : vector<64x256xf32>
    %213 = vector.extract_strided_slice %81 {offsets = [32, 0], sizes = [64, 128], strides = [1, 1]} : vector<96x128xf32> to vector<64x128xf32>
    %214 = arith.truncf %213 : vector<64x128xf32> to vector<64x128xbf16>
    %c3_122 = arith.constant 3 : index
    %c0_123 = arith.constant 0 : index
    %c0_124 = arith.constant 0 : index
    %215 = vector.load %arg4[%c3_122, %c0_123, %c0_124] : memref<5x128x256xbf16, #tpu.memory_space<vmem>>, vector<1x128x256xbf16>
    %216 = vector.shape_cast %215 : vector<1x128x256xbf16> to vector<128x256xbf16>
    %cst_125 = arith.constant dense<0.000000e+00> : vector<64x256xf32>
    %217 = tpu.matmul %214, %216, %cst_125 {dimension_numbers = #tpu.dot_dimension_numbers<[1], [0], [0], [1], [0, 0, 1, 1], [], []>} : vector<64x128xbf16>, vector<128x256xbf16>, vector<64x256xf32> -> vector<64x256xf32>
    %218 = arith.addf %212, %217 : vector<64x256xf32>
    %219 = vector.extract_strided_slice %162 {offsets = [32, 0], sizes = [64, 128], strides = [1, 1]} : vector<96x128xf32> to vector<64x128xf32>
    %220 = arith.truncf %219 : vector<64x128xf32> to vector<64x128xbf16>
    %c4_126 = arith.constant 4 : index
    %c0_127 = arith.constant 0 : index
    %c0_128 = arith.constant 0 : index
    %221 = vector.load %arg4[%c4_126, %c0_127, %c0_128] : memref<5x128x256xbf16, #tpu.memory_space<vmem>>, vector<1x128x256xbf16>
    %222 = vector.shape_cast %221 : vector<1x128x256xbf16> to vector<128x256xbf16>
    %cst_129 = arith.constant dense<0.000000e+00> : vector<64x256xf32>
    %223 = tpu.matmul %220, %222, %cst_129 {dimension_numbers = #tpu.dot_dimension_numbers<[1], [0], [0], [1], [0, 0, 1, 1], [], []>} : vector<64x128xbf16>, vector<128x256xbf16>, vector<64x256xf32> -> vector<64x256xf32>
    %224 = arith.addf %218, %223 : vector<64x256xf32>
    %225 = arith.maximumf %193, %224 : vector<64x256xf32>
    %226 = vector.extract_strided_slice %225 {offsets = [0, 0], sizes = [64, 128], strides = [1, 1]} : vector<64x256xf32> to vector<64x128xf32>
    %227 = vector.extract_strided_slice %225 {offsets = [0, 128], sizes = [64, 128], strides = [1, 1]} : vector<64x256xf32> to vector<64x128xf32>
    %228 = arith.maximumf %226, %227 : vector<64x128xf32>
    %c0_130 = arith.constant 0 : index
    %c0_131 = arith.constant 0 : index
    %229 = vector.load %arg5[%c0_130, %c0_131] : memref<1x128xf32, #tpu.memory_space<vmem>>, vector<1x128xf32>
    %230 = vector.broadcast %229 : vector<1x128xf32> to vector<64x128xf32>
    %231 = arith.addf %228, %230 : vector<64x128xf32>
    %cst_132 = arith.constant 0.000000e+00 : f32
    %232 = vector.broadcast %cst_132 : f32 to vector<64x128xf32>
    %233 = arith.maximumf %231, %232 : vector<64x128xf32>
    %234 = vector.extract_strided_slice %233 {offsets = [0, 0], sizes = [16, 128], strides = [1, 1]} : vector<64x128xf32> to vector<16x128xf32>
    %235 = vector.extract_strided_slice %233 {offsets = [16, 0], sizes = [16, 128], strides = [1, 1]} : vector<64x128xf32> to vector<16x128xf32>
    %236 = vector.extract_strided_slice %233 {offsets = [32, 0], sizes = [16, 128], strides = [1, 1]} : vector<64x128xf32> to vector<16x128xf32>
    %237 = vector.extract_strided_slice %233 {offsets = [48, 0], sizes = [16, 128], strides = [1, 1]} : vector<64x128xf32> to vector<16x128xf32>
    %238 = tpu.concatenate %234, %235, %236, %237 in 1 : vector<16x128xf32>, vector<16x128xf32>, vector<16x128xf32>, vector<16x128xf32> -> vector<16x512xf32>
    %239 = arith.truncf %238 : vector<16x512xf32> to vector<16x512xbf16>
    %c0_133 = arith.constant 0 : index
    %c0_134 = arith.constant 0 : index
    %240 = vector.load %arg6[%c0_133, %c0_134] : memref<512x64xbf16, #tpu.memory_space<vmem>>, vector<512x64xbf16>
    %cst_135 = arith.constant dense<0.000000e+00> : vector<16x64xf32>
    %241 = tpu.matmul %239, %240, %cst_135 {dimension_numbers = #tpu.dot_dimension_numbers<[1], [0], [0], [1], [0, 0, 1, 1], [], []>} : vector<16x512xbf16>, vector<512x64xbf16>, vector<16x64xf32> -> vector<16x64xf32>
    %c0_136 = arith.constant 0 : index
    %c0_137 = arith.constant 0 : index
    %242 = vector.load %arg7[%c0_136, %c0_137] : memref<1x64xf32, #tpu.memory_space<vmem>>, vector<1x64xf32>
    %243 = vector.broadcast %242 : vector<1x64xf32> to vector<16x64xf32>
    %244 = arith.addf %241, %243 : vector<16x64xf32>
    %cst_138 = arith.constant 0.000000e+00 : f32
    %245 = vector.broadcast %cst_138 : f32 to vector<16x64xf32>
    %246 = arith.maximumf %244, %245 : vector<16x64xf32>
    %247 = arith.truncf %246 : vector<16x64xf32> to vector<16x64xbf16>
    %c0_139 = arith.constant 0 : index
    %c0_140 = arith.constant 0 : index
    %248 = vector.load %arg8[%c0_139, %c0_140] : memref<64x128xbf16, #tpu.memory_space<vmem>>, vector<64x128xbf16>
    %cst_141 = arith.constant dense<0.000000e+00> : vector<16x128xf32>
    %249 = tpu.matmul %247, %248, %cst_141 {dimension_numbers = #tpu.dot_dimension_numbers<[1], [0], [0], [1], [0, 0, 1, 1], [], []>} : vector<16x64xbf16>, vector<64x128xbf16>, vector<16x128xf32> -> vector<16x128xf32>
    %c0_142 = arith.constant 0 : index
    %c0_143 = arith.constant 0 : index
    %250 = vector.load %arg9[%c0_142, %c0_143] : memref<1x128xf32, #tpu.memory_space<vmem>>, vector<1x128xf32>
    %251 = vector.broadcast %250 : vector<1x128xf32> to vector<16x128xf32>
    %252 = arith.addf %249, %251 : vector<16x128xf32>
    %253 = tpu.iota {dimensions = array<i32: 1>} : vector<16x128xi32>
    %c10_i32 = arith.constant 10 : i32
    %254 = vector.broadcast %c10_i32 : i32 to vector<16x128xi32>
    %255 = arith.cmpi slt, %253, %254 : vector<16x128xi32>
    %cst_144 = arith.constant -1.000000e+30 : f32
    %256 = vector.broadcast %cst_144 : f32 to vector<16x128xf32>
    %257 = arith.select %255, %252, %256 : vector<16x128xi1>, vector<16x128xf32>
    %cst_145 = arith.constant dense<0xFF800000> : vector<16xf32>
    %258 = vector.multi_reduction <maximumf>, %257, %cst_145 [1] : vector<16x128xf32> to vector<16xf32>
    %259 = vector.shape_cast %258 : vector<16xf32> to vector<16x1xf32>
    %260 = vector.broadcast %259 : vector<16x1xf32> to vector<16x128xf32>
    %261 = arith.subf %257, %260 : vector<16x128xf32>
    %262 = math.exp %261 : vector<16x128xf32>
    %cst_146 = arith.constant dense<0.000000e+00> : vector<16xf32>
    %263 = vector.multi_reduction <add>, %262, %cst_146 [1] : vector<16x128xf32> to vector<16xf32>
    %264 = vector.shape_cast %263 : vector<16xf32> to vector<16x1xf32>
    %265 = math.log %264 : vector<16x1xf32>
    %266 = vector.broadcast %265 : vector<16x1xf32> to vector<16x128xf32>
    %267 = arith.subf %261, %266 : vector<16x128xf32>
    %c0_147 = arith.constant 0 : index
    %c0_148 = arith.constant 0 : index
    %268 = vector.load %arg10[%c0_147, %c0_148] : memref<16x128xf32, #tpu.memory_space<vmem>>, vector<16x128xf32>
    tpu.vector_store %arg10[%c0_147, %c0_148], %267 {strides = array<i32>} : memref<16x128xf32, #tpu.memory_space<vmem>>, vector<16x128xf32>,
    return
  }
  func.func @transform_0(%arg0: i32) -> (i32, i32, i32, i32) {
    %c0_i32 = arith.constant 0 : i32
    %c0_i32_0 = arith.constant 0 : i32
    %c0_i32_1 = arith.constant 0 : i32
    %c0_i32_2 = arith.constant 0 : i32
    return %c0_i32, %c0_i32_0, %arg0, %c0_i32_1 : i32, i32, i32, i32
  }
  func.func @transform_1(%arg0: i32) -> (i32, i32, i32) {
    %c0_i32 = arith.constant 0 : i32
    %c0_i32_0 = arith.constant 0 : i32
    %c0_i32_1 = arith.constant 0 : i32
    %c0_i32_2 = arith.constant 0 : i32
    return %c0_i32, %c0_i32_0, %c0_i32_1 : i32, i32, i32
  }
  func.func @transform_2(%arg0: i32) -> (i32, i32) {
    %c0_i32 = arith.constant 0 : i32
    %c0_i32_0 = arith.constant 0 : i32
    %c0_i32_1 = arith.constant 0 : i32
    return %c0_i32, %c0_i32_0 : i32, i32
  }
  func.func @transform_3(%arg0: i32) -> (i32, i32, i32) {
    %c0_i32 = arith.constant 0 : i32
    %c0_i32_0 = arith.constant 0 : i32
    %c0_i32_1 = arith.constant 0 : i32
    %c0_i32_2 = arith.constant 0 : i32
    return %c0_i32, %c0_i32_0, %c0_i32_1 : i32, i32, i32
  }
  func.func @transform_4(%arg0: i32) -> (i32, i32) {
    %c0_i32 = arith.constant 0 : i32
    %c0_i32_0 = arith.constant 0 : i32
    %c0_i32_1 = arith.constant 0 : i32
    return %c0_i32, %c0_i32_0 : i32, i32
  }
  func.func @transform_5(%arg0: i32) -> (i32, i32) {
    %c0_i32 = arith.constant 0 : i32
    %c0_i32_0 = arith.constant 0 : i32
    %c0_i32_1 = arith.constant 0 : i32
    return %c0_i32, %c0_i32_0 : i32, i32
  }
  func.func @transform_6(%arg0: i32) -> (i32, i32) {
    %c0_i32 = arith.constant 0 : i32
    %c0_i32_0 = arith.constant 0 : i32
    %c0_i32_1 = arith.constant 0 : i32
    return %c0_i32, %c0_i32_0 : i32, i32
  }
  func.func @transform_7(%arg0: i32) -> (i32, i32) {
    %c0_i32 = arith.constant 0 : i32
    %c0_i32_0 = arith.constant 0 : i32
    %c0_i32_1 = arith.constant 0 : i32
    return %c0_i32, %c0_i32_0 : i32, i32
  }
  func.func @transform_8(%arg0: i32) -> (i32, i32) {
    %c0_i32 = arith.constant 0 : i32
    %c0_i32_0 = arith.constant 0 : i32
    %c0_i32_1 = arith.constant 0 : i32
    return %c0_i32, %c0_i32_0 : i32, i32
  }
  func.func @transform_9(%arg0: i32) -> (i32, i32) {
    %c0_i32 = arith.constant 0 : i32
    %c0_i32_0 = arith.constant 0 : i32
    return %arg0, %c0_i32 : i32, i32
  }
}

</mosaic_0001>

<bundles_post_ra>
// kernel: tile.13
= control target key start
LH: loop header
LB: loop body
LE: loop exit
PB: predicated region body
PF: predicated region fallthrough
CT: control target
= control target key end

     0   :  { %s28_s0 = inlined_call_operand.vmem [shape: f32[10], index: 0, kind: input, shape index: {}]   ;;  %s29_s1 = inlined_call_operand.vmem [shape: f32[12,10], index: 1, kind: output, shape index: {}]  }
   0x1   :  { %v4_v0 = vld [vmem:[%s28_s0] ss:$0 sm:$0xff] }
   0x2   :  { %5 = vst [vmem:[%s29_s1] sm:$0xff] %v4_v0 }
   0x3   :  { %8 = vst [vmem:[%s29_s1 + $0x8] sm:$0xff] %v4_v0 }

// kernel: tile.14
= control target key start
LH: loop header
LB: loop body
LE: loop exit
PB: predicated region body
PF: predicated region fallthrough
CT: control target
= control target key end

     0   :  { %s99_s10 = smov 110   ;;  %s100_s11 = smov 90   ;;  %vm3_vm0 = vcmask 80896   ;;  %vm9_vm1 = vcmask 982896   ;;  %vm15_vm2 = vcmask 900896   ;;  %vm21_vm3 = vcmask 818896   ;;  %s159_s0 = inlined_call_operand.vmem [shape: f32[12,10], index: 0, kind: input, shape index: {}]   ;;  %s160_s1 = inlined_call_operand.vmem [shape: f32[120], index: 1, kind: output, shape index: {}]  }
   0x1   :  { %v77_v0 = vld [vmem:[%s159_s0 + $0xb] sm:$0x1]   ;;  %v79_v1 = vld [vmem:[%s159_s0 + $0x9] sm:$0x1]   ;;  %v81_v2 = vld [vmem:[%s159_s0 + $0x7] sm:$0x1]  }
   0x2   :  { %7 = vrot.lane.b32.xlu0 %v77_v0, %s99_s10  ;;  %19 = vrot.lane.b32.xlu1 %v79_v1, %s100_s11  ;;  %s101_s14 = smov 70   ;;  %v78_v3 = vld [vmem:[%s159_s0 + $0xa] sm:$0x1]   ;;  %v80_v4 = vld [vmem:[%s159_s0 + $0x8] sm:$0x1]   ;;  %s102_s19 = smov 100  }
   0x3   :  { %31 = vrot.lane.b32.xlu2 %v81_v2, %s101_s14  ;;  %s103_s20 = smov 80   ;;  %v82_v5 = vld [vmem:[%s159_s0 + $0x6] sm:$0x1]   ;;  %s104_s23 = smov 60   ;;  %v83_v6 = vld [vmem:[%s159_s0 + $0x5] sm:$0x1]  }
   0x4   :  { %v84_v7 = vld [vmem:[%s159_s0 + $0x4] sm:$0x1]   ;;  %s105_s28 = smov 50   ;;  %s106_s29 = smov 40   ;;  %v85_v8 = vld [vmem:[%s159_s0 + $0x3] sm:$0x1]  }
   0x5   :  { %s107_s3 = smov 30   ;;  %v86_v9 = vld [vmem:[%s159_s0 + $0x2] sm:$0x1]   ;;  %v87_v10 = vld [vmem:[%s159_s0 + $0x1] sm:$0x1]   ;;  %s108_s8 = smov 20  }
   0x6   :  { %s109_s9 = smov 10   ;;  %v2_v11 = vld [vmem:[%s159_s0] sm:$0x1]   ;;  %vm27_vm4 = vcmask 736896   ;;  %vm33_vm5 = vcmask 654896   ;;  %vm39_vm6 = vcmask 572896  }
   0x7   :  { %4 = vst.msk [vmem:[#allocation0] sm:$0x1] %vm3_vm0, %v2_v11   ;;  %vm45_vm7 = vcmask 490896   ;;  %vm51_vm8 = vcmask 408896   ;;  %vm57_vm9 = vcmask 326896   ;;  %vm63_vm10 = vcmask 244896  }
   0x8   :  { %vm69_vm11 = vcmask 162896  }
   0xa   :  { %13 = vrot.lane.b32.xlu0 %v78_v3, %s102_s19  ;;  %25 = vrot.lane.b32.xlu1 %v80_v4, %s103_s20 }
   0xb   :  { %37 = vrot.lane.b32.xlu2 %v82_v5, %s104_s23 }
  0x12   :  { %43 = vrot.lane.b32.xlu0 %v83_v6, %s105_s28  ;;  %49 = vrot.lane.b32.xlu1 %v84_v7, %s106_s29 }
  0x13   :  { %55 = vrot.lane.b32.xlu2 %v85_v8, %s107_s3 }
  0x1a   :  { %61 = vrot.lane.b32.xlu0 %v86_v9, %s108_s8  ;;  %67 = vrot.lane.b32.xlu1 %v87_v10, %s109_s9 }
  0x5d   :  { %v32_v12 = vpop.permute.xlu2 %31  }
  0x65   :  { %v38_v13 = vpop.permute.xlu2 %37  }
  0x6d   :  { %v56_v14 = vpop.permute.xlu2 %55  }
  0x74   :  { %v8_v15 = vpop.permute.xlu0 %7   ;;  %v20_v16 = vpop.permute.xlu1 %19  }
  0x75   :  { %10 = vst.msk [vmem:[#allocation0] sm:$0x1] %vm9_vm1, %v8_v15  }
  0x7c   :  { %v14_v17 = vpop.permute.xlu0 %13   ;;  %v26_v18 = vpop.permute.xlu1 %25  }
  0x7d   :  { %16 = vst.msk [vmem:[#allocation0] sm:$0x1] %vm15_vm2, %v14_v17  }
  0x7e   :  { %22 = vst.msk [vmem:[#allocation0] sm:$0x1] %vm21_vm3, %v20_v16  }
  0x7f   :  { %28 = vst.msk [vmem:[#allocation0] sm:$0x1] %vm27_vm4, %v26_v18  }
  0x80   :  { %34 = vst.msk [vmem:[#allocation0] sm:$0x1] %vm33_vm5, %v32_v12  }
  0x81   :  { %40 = vst.msk [vmem:[#allocation0] sm:$0x1] %vm39_vm6, %v38_v13  }
  0x84   :  { %v44_v19 = vpop.permute.xlu0 %43   ;;  %v50_v20 = vpop.permute.xlu1 %49  }
  0x85   :  { %46 = vst.msk [vmem:[#allocation0] sm:$0x1] %vm45_vm7, %v44_v19  }
  0x86   :  { %52 = vst.msk [vmem:[#allocation0] sm:$0x1] %vm51_vm8, %v50_v20  }
  0x87   :  { %58 = vst.msk [vmem:[#allocation0] sm:$0x1] %vm57_vm9, %v56_v14  }
  0x8c   :  { %v62_v21 = vpop.permute.xlu0 %61   ;;  %v68_v22 = vpop.permute.xlu1 %67  }
  0x8d   :  { %64 = vst.msk [vmem:[#allocation0] sm:$0x1] %vm63_vm10, %v62_v21  }
  0x8e   :  { %70 = vst.msk [vmem:[#allocation0] sm:$0x1] %vm69_vm11, %v68_v22  }
  0x95   :  { %v73_v23 = vld [vmem:[#allocation0] sm:$0x1] }
  0x96   :  { %76 = vst [vmem:[%s160_s1] sm:$0x1] %v73_v23 }

// kernel: tile.18
= control target key start
LH: loop header
LB: loop body
LE: loop exit
PB: predicated region body
PF: predicated region fallthrough
CT: control target
= control target key end

     0   :  { %s22_s0 = inlined_call_operand.vmem [shape: f32[20], index: 0, kind: input, shape index: {}]   ;;  %s23_s1 = inlined_call_operand.vmem [shape: f32[4,20], index: 1, kind: output, shape index: {}]  }
   0x1   :  { %v4_v0 = vld [vmem:[%s22_s0] ss:$0 sm:$0xff] }
   0x2   :  { %5 = vst [vmem:[%s23_s1] sm:$0xf] %v4_v0 }

// kernel: tile.19
= control target key start
LH: loop header
LB: loop body
LE: loop exit
PB: predicated region body
PF: predicated region fallthrough
CT: control target
= control target key end

     0   :  { %s37_s8 = smov 20   ;;  %s38_s9 = smov 40   ;;  %vm7_vm0 = vcmask 162816   ;;  %vm13_vm1 = vcmask 654816   ;;  %vm19_vm2 = vcmask 490816   ;;  %vm25_vm3 = vcmask 326816   ;;  %s55_s0 = inlined_call_operand.vmem [shape: f32[4,20], index: 0, kind: input, shape index: {}]   ;;  %s56_s1 = inlined_call_operand.vmem [shape: f32[80], index: 1, kind: output, shape index: {}]  }
   0x1   :  { %v4_v0 = vld [vmem:[%s55_s0] sm:$0xf]  ;;  %s36_s0 = smov 60  }
   0x2   :  { %5 = vst [vmem:[#allocation1] sm:$0xf] %v4_v0 }
   0x9   :  { %v10_v1 = vld [vmem:[#allocation1 + $0x3] sm:$0x1]   ;;  %v22_v2 = vld [vmem:[#allocation1 + $0x1] sm:$0x1]   ;;  %v16_v3 = vld [vmem:[#allocation1 + $0x2] sm:$0x1]  }
   0xa   :  { %11 = vrot.lane.b32.xlu0 %v10_v1, %s36_s0  ;;  %23 = vrot.lane.b32.xlu1 %v22_v2, %s37_s8  ;;  %v6_v4 = vld [vmem:[#allocation1] sm:$0x1]  }
   0xb   :  { %8 = vst.msk [vmem:[#allocation0] sm:$0x1] %vm7_vm0, %v6_v4  }
  0x12   :  { %17 = vrot.lane.b32.xlu0 %v16_v3, %s38_s9 }
  0x7c   :  { %v12_v5 = vpop.permute.xlu0 %11   ;;  %v24_v6 = vpop.permute.xlu1 %23  }
  0x7d   :  { %14 = vst.msk [vmem:[#allocation0] sm:$0x1] %vm13_vm1, %v12_v5  }
  0x84   :  { %v18_v7 = vpop.permute.xlu0 %17  }
  0x85   :  { %20 = vst.msk [vmem:[#allocation0] sm:$0x1] %vm19_vm2, %v18_v7  }
  0x86   :  { %26 = vst.msk [vmem:[#allocation0] sm:$0x1] %vm25_vm3, %v24_v6  }
  0x8d   :  { %v29_v8 = vld [vmem:[#allocation0] sm:$0x1] }
  0x8e   :  { %32 = vst [vmem:[%s56_s1] sm:$0x1] %v29_v8 }

// kernel: mnist_convnet_forward.1
= control target key start
LH: loop header
LB: loop body
LE: loop exit
PB: predicated region body
PF: predicated region fallthrough
CT: control target
= control target key end

     0   :  { %vm165_vm0 = vcmask 1045504   ;;  %vm146_vm1 = vcmask 228352   ;;  %vm4006_vm2 = vcmask 523264   ;;  %s8328_s1 = inlined_call_operand.vmem [shape: bf16[5,28,256], index: 1, kind: input, shape index: {}]   ;;  %s8329_s0 = inlined_call_operand.vmem [shape: bf16[4,7,16,28], index: 0, kind: input, shape index: {}]   ;;  %s8330_s2 = inlined_call_operand.vmem [shape: f32[1,128], index: 2, kind: input, shape index: {}]   ;;  %s8331_s3 = inlined_call_operand.vmem [shape: bf16[5,128,256], index: 3, kind: input, shape index: {}]   ;;  %s8332_s4 = inlined_call_operand.vmem [shape: f32[1,128], index: 4, kind: input, shape index: {}]   ;;  %s8333_s6 = inlined_call_operand.vmem [shape: f32[1,64], index: 6, kind: input, shape index: {}]   ;;  %s8334_s5 = inlined_call_operand.vmem [shape: bf16[512,64], index: 5, kind: input, shape index: {}]   ;;  %s8335_s8 = inlined_call_operand.vmem [shape: f32[1,128], index: 8, kind: input, shape index: {}]   ;;  %s8336_s7 = inlined_call_operand.vmem [shape: bf16[64,128], index: 7, kind: input, shape index: {}]   ;;  %s8337_s9 = inlined_call_operand.vmem [shape: f32[16,128], index: 9, kind: output, shape index: {}]  }
   0x1   :  { %v4093_v0 = vld [vmem:[%s8328_s1 + $0x30] sm:$0xf]  ;;  %v5067_v1 = vld [vmem:[%s8328_s1 + $0x34] sm:$0x30]  ;;  %v5066_v2 = vld [vmem:[%s8328_s1 + $0x34] sm:$0xf] }
   0x2   :  { %v4094_v3 = vor.u32 %v5067_v1, %v4093_v0  ;;  %v4095_v4 = vld [vmem:[%s8328_s1 + $0x38] sm:$0x30]  ;;  %v4145_v5 = vld [vmem:[%s8328_s1 + $0x10] sm:$0xf]  ;;  %v5063_v6 = vld [vmem:[%s8328_s1 + $0x14] sm:$0x30] }
   0x3   :  { %v4098_v7 = vor.u32 %v5066_v2, %v4095_v4  ;;  %v4146_v8 = vor.u32 %v5063_v6, %v4145_v5  ;;  %v5062_v9 = vld [vmem:[%s8328_s1 + $0x14] sm:$0xf]  ;;  %v4147_v10 = vld [vmem:[%s8328_s1 + $0x18] sm:$0x30]  ;;  %v4085_v11 = vld [vmem:[%s8328_s1 + $0x20] sm:$0xf] }
   0x4   :  { %v5312_v12 = vsel %vm165_vm0, %v4094_v3, 0  ;;  %v4150_v13 = vor.u32 %v5062_v9, %v4147_v10  ;;  %v5065_v14 = vld [vmem:[%s8328_s1 + $0x24] sm:$0xf0]  ;;  %v5064_v15 = vld [vmem:[%s8328_s1 + $0x24] sm:$0xf]  ;;  %v5351_v25 = vld [vmem:[%s8329_s0 + $0x38] sm:$0xff] }
   0x5   :  { %178 = vmatpush.bf16.msra.mxu0 %v5312_v12  ;;  %v5322_v16 = vsel %vm165_vm0, %v4098_v7, 0  ;;  %v5325_v17 = vsel %vm165_vm0, %v4146_v8, 0  ;;  %v5327_v18 = vor.u32 %v5065_v14, %v4085_v11  ;;  %v4087_v19 = vld [vmem:[%s8328_s1 + $0x28] sm:$0xf0]  ;;  %v4137_v20 = vld [vmem:[%s8328_s1] sm:$0xf] }
   0x6   :  { %8413 = vst [vmem:[#allocation2_spill] sm:$0xff] %v5325_v17  ;;  %217 = vmatpush.bf16.msra.mxu1 %v5322_v16  ;;  %328 = vmatpush.bf16.msra.mxu2 %v5325_v17  ;;  %v5338_v21 = vsel %vm165_vm0, %v4150_v13, 0  ;;  %v5340_v22 = vor.u32 %v5064_v15, %v4087_v19  ;;  %v5061_v23 = vld [vmem:[%s8328_s1 + $0x4] sm:$0xf0]  ;;  %v5060_v24 = vld [vmem:[%s8328_s1 + $0x4] sm:$0xf] }
   0x7   :  { %8414 = vst [vmem:[#allocation3_spill] sm:$0xff] %v5338_v21  ;;  %367 = vmatpush.bf16.msra.mxu3 %v5338_v21  ;;  %v5354_v26 = vor.u32 %v5061_v23, %v4137_v20  ;;  %v4139_v27 = vld [vmem:[%s8328_s1 + $0x8] sm:$0xf0]  ;;  %v5032_v28 = vld [vmem:[%s8329_s0] sm:$0xff]  ;;  %v4257_v29 = vld [vmem:[%s8328_s1 + $0x70] sm:$0xf] }
   0x8   :  { %v5075_v30 = vld [vmem:[%s8328_s1 + $0x74] sm:$0x30]  ;;  %v5368_v31 = vor.u32 %v5060_v24, %v4139_v27  ;;  %v5074_v33 = vld [vmem:[%s8328_s1 + $0x74] sm:$0xf]  ;;  %v4259_v34 = vld [vmem:[%s8328_s1 + $0x78] sm:$0x30] }
   0x9   :  { %8415 = vst [vmem:[#allocation4_spill] sm:$0xff] %v5354_v26  ;;  %v4258_v32 = vor.u32 %v5075_v30, %v4257_v29  ;;  %v4201_v35 = vld [vmem:[%s8328_s1 + $0x50] sm:$0xf]  ;;  %179 = vmatpush.bf16.msra.mxu0 %v5327_v18  ;;  %v4262_v36 = vor.u32 %v5074_v33, %v4259_v34  ;;  %v5071_v37 = vld [vmem:[%s8328_s1 + $0x54] sm:$0x30]  ;;  %v5417_v46 = vld [vmem:[%s8329_s0 + $0x40] sm:$0xff] }
   0xa   :  { %8416 = vst [vmem:[#allocation5_spill] sm:$0xff] %v5368_v31  ;;  %v5070_v38 = vld [vmem:[%s8328_s1 + $0x54] sm:$0xf]  ;;  %v4203_v39 = vld [vmem:[%s8328_s1 + $0x58] sm:$0x30]  ;;  %218 = vmatpush.bf16.msra.mxu1 %v5340_v22  ;;  %329 = vmatpush.bf16.msra.mxu2 %v5354_v26  ;;  %v4202_v41 = vor.u32 %v5071_v37, %v4201_v35  ;;  %v5422_v47 = vld [vmem:[%s8329_s0 + $0x8] sm:$0xff] }
   0xb   :  { %v5392_v40 = vsel %vm165_vm0, %v4258_v32, 0  ;;  %v4206_v42 = vor.u32 %v5070_v38, %v4203_v39  ;;  %368 = vmatpush.bf16.msra.mxu3 %v5368_v31  ;;  %v5397_v43 = vsel %vm165_vm0, %v4262_v36, 0  ;;  %v4249_v48 = vld [vmem:[%s8328_s1 + $0x60] sm:$0xf]  ;;  %v5073_v49 = vld [vmem:[%s8328_s1 + $0x64] sm:$0xf0] }
   0xc   :  { %8417 = vst [vmem:[#allocation6_spill] sm:$0xff] %v5392_v40  ;;  %4099 = vmatmul.msk.bf16.vlgmr.msra.gmra.mxu0 %vm146_vm1, %v5351_v25  ;;  %v5403_v44 = vsel %vm165_vm0, %v4202_v41, 0  ;;  %v5072_v50 = vld [vmem:[%s8328_s1 + $0x64] sm:$0xf]  ;;  %v5441_v51 = vor.u32 %v5073_v49, %v4249_v48  ;;  %v4251_v52 = vld [vmem:[%s8328_s1 + $0x68] sm:$0xf0] }
   0xd   :  { %8418 = vst [vmem:[#allocation7_spill] sm:$0xff] %v5397_v43  ;;  %v5406_v45 = vsel %vm165_vm0, %v4206_v42, 0  ;;  %4105 = vmatmul.msk.bf16.vlgmr.msra.gmra.mxu1 %vm146_vm1, %v5351_v25  ;;  %4151 = vmatmul.msk.bf16.vlgmr.msra.gmra.mxu2 %vm146_vm1, %v5032_v28  ;;  %v4193_v53 = vld [vmem:[%s8328_s1 + $0x40] sm:$0xf]  ;;  %v5069_v54 = vld [vmem:[%s8328_s1 + $0x44] sm:$0xf0]  ;;  %v5452_v55 = vor.u32 %v5072_v50, %v4251_v52 }
   0xe   :  { %662 = vmatpush.bf16.msrb.mxu2 %v5392_v40  ;;  %8419 = vst [vmem:[#allocation8_spill] sm:$0xff] %v5403_v44  ;;  %4157 = vmatmul.msk.bf16.vlgmr.msra.gmra.mxu3 %vm146_vm1, %v5032_v28  ;;  %v5454_v56 = vor.u32 %v5069_v54, %v4193_v53  ;;  %v5068_v57 = vld [vmem:[%s8328_s1 + $0x44] sm:$0xf]  ;;  %v4195_v58 = vld [vmem:[%s8328_s1 + $0x48] sm:$0xf0]  ;;  %v5480_v61 = vld [vmem:[%s8329_s0 + $0x10] sm:$0xff] }
   0xf   :  { %701 = vmatpush.bf16.msrb.mxu3 %v5397_v43  ;;  %8420 = vst [vmem:[#allocation9_spill] sm:$0xff] %v5406_v45  ;;  %483 = vmatpush.bf16.msrb.mxu0 %v5403_v44  ;;  %v5463_v59 = vor.u32 %v5068_v57, %v4195_v58  ;;  %v5474_v60 = vld [vmem:[%s8329_s0 + $0x48] sm:$0xff]  ;;  %v5493_v62 = vld [vmem:[%s8329_s0 + $0x50] sm:$0xff]  ;;  %v5498_v63 = vld [vmem:[%s8329_s0 + $0x18] sm:$0xff] }
  0x10   :  { %522 = vmatpush.bf16.msrb.mxu1 %v5406_v45  ;;  %8421 = vst [vmem:[#allocation10_spill] sm:$0xff] %v5441_v51  ;;  %v5511_v0 = vld [vmem:[%s8329_s0 + $0x58] sm:$0xff]  ;;  %v5516_v1 = vld [vmem:[%s8329_s0 + $0x20] sm:$0xff]  ;;  %v4293_v2 = vld [vmem:[%s8328_s1 + $0x90] sm:$0xf] }
  0x11   :  { %8422 = vst [vmem:[#allocation11_spill] sm:$0xff] %v5452_v55  ;;  %v5079_v3 = vld [vmem:[%s8328_s1 + $0x94] sm:$0x30]  ;;  %v5078_v4 = vld [vmem:[%s8328_s1 + $0x94] sm:$0xf]  ;;  %v5549_v10 = vld [vmem:[%s8329_s0 + $0x60] sm:$0xff] }
  0x12   :  { %8423 = vst [vmem:[#allocation12_spill] sm:$0xff] %v5454_v56  ;;  %663 = vmatpush.bf16.msrb.mxu2 %v5441_v51  ;;  %v4294_v5 = vor.u32 %v5079_v3, %v4293_v2  ;;  %v4295_v6 = vld [vmem:[%s8328_s1 + $0x98] sm:$0x30]  ;;  %v5554_v11 = vld [vmem:[%s8329_s0 + $0x28] sm:$0xff]  ;;  %v5567_v13 = vld [vmem:[%s8329_s0 + $0x70] sm:$0xff] }
  0x13   :  { %8424 = vst [vmem:[#allocation13_spill] sm:$0xff] %v5463_v59  ;;  %702 = vmatpush.bf16.msrb.mxu3 %v5452_v55  ;;  %484 = vmatpush.bf16.msrb.mxu0 %v5454_v56  ;;  %v4298_v7 = vor.u32 %v5078_v4, %v4295_v6  ;;  %v5572_v14 = vld [vmem:[%s8329_s0 + $0xa8] sm:$0xff]  ;;  %v5589_v15 = vld [vmem:[%s8329_s0 + $0x78] sm:$0xff]  ;;  %v5594_v19 = vld [vmem:[%s8329_s0 + $0xb0] sm:$0xff] }
  0x14   :  { %523 = vmatpush.bf16.msrb.mxu1 %v5463_v59  ;;  %8425 = vst [vmem:[#allocation14_spill] sm:$0xff] %v5480_v61  ;;  %v5539_v8 = vsel %vm165_vm0, %v4294_v5, 0  ;;  %v4285_v20 = vld [vmem:[%s8328_s1 + $0x80] sm:$0xf]  ;;  %v5077_v23 = vld [vmem:[%s8328_s1 + $0x84] sm:$0xf0] }
  0x15   :  { %8426 = vst [vmem:[#allocation15_spill] sm:$0xff] %v5498_v63  ;;  %v5543_v9 = vsel %vm165_vm0, %v4298_v7, 0  ;;  %v5076_v24 = vld [vmem:[%s8328_s1 + $0x84] sm:$0xf]  ;;  %v5613_v27 = vor.u32 %v5077_v23, %v4285_v20  ;;  %v4287_v28 = vld [vmem:[%s8328_s1 + $0x88] sm:$0xf0] }
  0x16   :  { %903 = vmatpush.bf16.msra.mxu2 %v5312_v12  ;;  %8427 = vst [vmem:[#allocation16_spill] sm:$0xff] %v5539_v8  ;;  %v5618_v29 = vor.u32 %v5076_v24, %v4287_v28  ;;  %v5627_v30 = vld [vmem:[%s8329_s0 + $0x80] sm:$0xff]  ;;  %v5632_v33 = vld [vmem:[%s8329_s0 + $0xb8] sm:$0xff]  ;;  %v5651_v48 = vld [vmem:[%s8329_s0 + $0x88] sm:$0xff] }
  0x17   :  { %942 = vmatpush.bf16.msra.mxu3 %v5322_v16  ;;  %801 = vmatpush.bf16.msra.mxu0 %v5539_v8  ;;  %8428 = vst [vmem:[#allocation17_spill] sm:$0xff] %v5543_v9  ;;  %v5658_v53 = vld [vmem:[%s8329_s0 + $0xc0] sm:$0xff]  ;;  %v5677_v20 = vld [vmem:[%s8329_s0 + $0x90] sm:$0xff] }
  0x18   :  { %840 = vmatpush.bf16.msra.mxu1 %v5543_v9  ;;  %8429 = vst [vmem:[#allocation18_spill] sm:$0xff] %v5549_v10 }
  0x19   :  { %8430 = vst [vmem:[#allocation19_spill] sm:$0xff] %v5567_v13 }
  0x1a   :  { %904 = vmatpush.bf16.msra.mxu2 %v5327_v18  ;;  %8431 = vst [vmem:[#allocation20_spill] sm:$0xff] %v5589_v15 }
  0x1b   :  { %943 = vmatpush.bf16.msra.mxu3 %v5340_v22  ;;  %8432 = vst [vmem:[#allocation21_spill] sm:$0xff] %v5613_v27  ;;  %802 = vmatpush.bf16.msra.mxu0 %v5613_v27 }
  0x1c   :  { %4100 = vmatmul.msk.bf16.gmra.mxu0 %vm146_vm1, %v5417_v46  ;;  %8433 = vst [vmem:[#allocation22_spill] sm:$0xff] %v5618_v29  ;;  %841 = vmatpush.bf16.msra.mxu1 %v5618_v29 }
  0x1d   :  { %4106 = vmatmul.msk.bf16.gmra.mxu1 %vm146_vm1, %v5417_v46  ;;  %4152 = vmatmul.msk.bf16.gmra.mxu2 %vm146_vm1, %v5422_v47  ;;  %8434 = vst [vmem:[#allocation23_spill] sm:$0xff] %v5627_v30 }
  0x1e   :  { %4158 = vmatmul.msk.bf16.gmra.mxu3 %vm146_vm1, %v5422_v47 }
  0x2c   :  { %4101 = vmatmul.msk.bf16.gmra.mxu0 %vm146_vm1, %v5474_v60 }
  0x2d   :  { %4107 = vmatmul.msk.bf16.gmra.mxu1 %vm146_vm1, %v5474_v60  ;;  %4153 = vmatmul.msk.bf16.gmra.mxu2 %vm146_vm1, %v5480_v61 }
  0x2e   :  { %4159 = vmatmul.msk.bf16.gmra.mxu3 %vm146_vm1, %v5480_v61 }
  0x3c   :  { %4102 = vmatmul.msk.bf16.gmra.mxu0 %vm146_vm1, %v5493_v62 }
  0x3d   :  { %4108 = vmatmul.msk.bf16.gmra.mxu1 %vm146_vm1, %v5493_v62  ;;  %4154 = vmatmul.msk.bf16.gmra.mxu2 %vm146_vm1, %v5498_v63 }
  0x3e   :  { %4160 = vmatmul.msk.bf16.gmra.mxu3 %vm146_vm1, %v5498_v63 }
  0x4c   :  { %4103 = vmatmul.msk.bf16.gmra.mxu0 %vm146_vm1, %v5511_v0 }
  0x4d   :  { %4109 = vmatmul.msk.bf16.gmra.mxu1 %vm146_vm1, %v5511_v0  ;;  %4155 = vmatmul.msk.bf16.gmra.mxu2 %vm146_vm1, %v5516_v1 }
  0x4e   :  { %4161 = vmatmul.msk.bf16.gmra.mxu3 %vm146_vm1, %v5516_v1 }
  0x5c   :  { %4104 = vmatmul.msk.bf16.gmra.mxu0 %vm146_vm1, %v5549_v10 }
  0x5d   :  { %4110 = vmatmul.msk.bf16.gmra.mxu1 %vm146_vm1, %v5549_v10  ;;  %4156 = vmatmul.msk.bf16.gmra.mxu2 %vm146_vm1, %v5554_v11 }
  0x5e   :  { %4162 = vmatmul.msk.bf16.gmra.mxu3 %vm146_vm1, %v5554_v11 }
  0x6c   :  { %4207 = vmatmul.msk.bf16.vlgmr.msrb.gmra.mxu0 %vm146_vm1, %v5567_v13 }
  0x6d   :  { %4213 = vmatmul.msk.bf16.vlgmr.msrb.gmra.mxu1 %vm146_vm1, %v5567_v13  ;;  %4263 = vmatmul.msk.bf16.vlgmr.msrb.gmra.mxu2 %vm146_vm1, %v5572_v14 }
  0x6e   :  { %4269 = vmatmul.msk.bf16.vlgmr.msrb.gmra.mxu3 %vm146_vm1, %v5572_v14  ;;  %1059 = vmatpush.bf16.msrb.mxu2 %v5403_v44 }
  0x6f   :  { %1098 = vmatpush.bf16.msrb.mxu3 %v5406_v45  ;;  %981 = vmatpush.bf16.msrb.mxu0 %v5325_v17 }
  0x70   :  { %1020 = vmatpush.bf16.msrb.mxu1 %v5338_v21 }
  0x72   :  { %1060 = vmatpush.bf16.msrb.mxu2 %v5454_v56 }
  0x73   :  { %1099 = vmatpush.bf16.msrb.mxu3 %v5463_v59  ;;  %982 = vmatpush.bf16.msrb.mxu0 %v5354_v26 }
  0x74   :  { %1021 = vmatpush.bf16.msrb.mxu1 %v5368_v31 }
  0x7c   :  { %4208 = vmatmul.msk.bf16.gmra.mxu0 %vm146_vm1, %v5589_v15 }
  0x7d   :  { %4214 = vmatmul.msk.bf16.gmra.mxu1 %vm146_vm1, %v5589_v15  ;;  %4264 = vmatmul.msk.bf16.gmra.mxu2 %vm146_vm1, %v5594_v19 }
  0x7e   :  { %4270 = vmatmul.msk.bf16.gmra.mxu3 %vm146_vm1, %v5594_v19 }
  0x89   :  { %v181_v32 = vpop.f32.mrf.mxu0 }
  0x8a   :  { %v220_v34 = vpop.f32.mrf.mxu1 }
  0x8c   :  { %4209 = vmatmul.msk.bf16.gmra.mxu0 %vm146_vm1, %v5627_v30 }
  0x8d   :  { %4215 = vmatmul.msk.bf16.gmra.mxu1 %vm146_vm1, %v5627_v30  ;;  %4265 = vmatmul.msk.bf16.gmra.mxu2 %vm146_vm1, %v5632_v33 }
  0x8e   :  { %4271 = vmatmul.msk.bf16.gmra.mxu3 %vm146_vm1, %v5632_v33 }
  0x90   :  { %v331_v35 = vpop.f32.mrf.mxu2 }
  0x91   :  { %v5644_v36 = vadd.f32 %v331_v35, %v181_v32  ;;  %v370_v37 = vpop.f32.mrf.mxu3  ;;  %v183_v38 = vpop.f32.mrf.mxu0  ;;  %v5684_v32 = vld [vmem:[%s8329_s0 + $0xc8] sm:$0xff] }
  0x92   :  { %v5646_v39 = vadd.f32 %v370_v37, %v220_v34  ;;  %v222_v41 = vpop.f32.mrf.mxu1 }
  0x98   :  { %v333_v42 = vpop.f32.mrf.mxu2 }
  0x99   :  { %v5653_v49 = vadd.f32 %v333_v42, %v183_v38  ;;  %v372_v50 = vpop.f32.mrf.mxu3  ;;  %v186_v52 = vpop.f32.mrf.mxu0 }
  0x9a   :  { %v5660_v54 = vadd.f32 %v372_v50, %v222_v41  ;;  %v225_v57 = vpop.f32.mrf.mxu1 }
  0x9c   :  { %4210 = vmatmul.msk.bf16.gmra.mxu0 %vm146_vm1, %v5651_v48 }
  0x9d   :  { %4216 = vmatmul.msk.bf16.gmra.mxu1 %vm146_vm1, %v5651_v48  ;;  %4266 = vmatmul.msk.bf16.gmra.mxu2 %vm146_vm1, %v5658_v53 }
  0x9e   :  { %4272 = vmatmul.msk.bf16.gmra.mxu3 %vm146_vm1, %v5658_v53 }
  0xa0   :  { %v336_v58 = vpop.f32.mrf.mxu2 }
  0xa1   :  { %v5670_v2 = vadd.f32 %v336_v58, %v186_v52  ;;  %v375_v3 = vpop.f32.mrf.mxu3  ;;  %v188_v4 = vpop.f32.mrf.mxu0  ;;  %v5703_v58 = vld [vmem:[%s8329_s0 + $0x98] sm:$0xff] }
  0xa2   :  { %v5672_v5 = vadd.f32 %v375_v3, %v225_v57  ;;  %v227_v6 = vpop.f32.mrf.mxu1 }
  0xa8   :  { %v338_v7 = vpop.f32.mrf.mxu2 }
  0xa9   :  { %v5679_v23 = vadd.f32 %v338_v7, %v188_v4  ;;  %v377_v24 = vpop.f32.mrf.mxu3  ;;  %v191_v28 = vpop.f32.mrf.mxu0  ;;  %v5710_v7 = vld [vmem:[%s8329_s0 + $0xd0] sm:$0xff] }
  0xaa   :  { %v5686_v34 = vadd.f32 %v377_v24, %v227_v6  ;;  %v230_v35 = vpop.f32.mrf.mxu1 }
  0xac   :  { %4211 = vmatmul.msk.bf16.gmra.mxu0 %vm146_vm1, %v5677_v20 }
  0xad   :  { %4217 = vmatmul.msk.bf16.gmra.mxu1 %vm146_vm1, %v5677_v20  ;;  %4267 = vmatmul.msk.bf16.gmra.mxu2 %vm146_vm1, %v5684_v32 }
  0xae   :  { %4273 = vmatmul.msk.bf16.gmra.mxu3 %vm146_vm1, %v5684_v32 }
  0xb0   :  { %v341_v37 = vpop.f32.mrf.mxu2 }
  0xb1   :  { %v5696_v38 = vadd.f32 %v341_v37, %v191_v28  ;;  %v380_v41 = vpop.f32.mrf.mxu3  ;;  %v193_v42 = vpop.f32.mrf.mxu0 }
  0xb2   :  { %v5698_v50 = vadd.f32 %v380_v41, %v230_v35  ;;  %v232_v52 = vpop.f32.mrf.mxu1 }
  0xb8   :  { %v343_v57 = vpop.f32.mrf.mxu2 }
  0xb9   :  { %v5705_v3 = vadd.f32 %v343_v57, %v193_v42  ;;  %v382_v4 = vpop.f32.mrf.mxu3  ;;  %v196_v6 = vpop.f32.mrf.mxu0 }
  0xba   :  { %v5712_v24 = vadd.f32 %v382_v4, %v232_v52  ;;  %v235_v28 = vpop.f32.mrf.mxu1 }
  0xbc   :  { %4212 = vmatmul.msk.bf16.gmra.mxu0 %vm146_vm1, %v5703_v58 }
  0xbd   :  { %4218 = vmatmul.msk.bf16.gmra.mxu1 %vm146_vm1, %v5703_v58  ;;  %4268 = vmatmul.msk.bf16.gmra.mxu2 %vm146_vm1, %v5710_v7 }
  0xbe   :  { %4274 = vmatmul.msk.bf16.gmra.mxu3 %vm146_vm1, %v5710_v7 }
  0xc0   :  { %v346_v35 = vpop.f32.mrf.mxu2 }
  0xc1   :  { %v5722_v37 = vadd.f32 %v346_v35, %v196_v6  ;;  %v385_v41 = vpop.f32.mrf.mxu3  ;;  %v198_v42 = vpop.f32.mrf.mxu0 }
  0xc2   :  { %v5724_v52 = vadd.f32 %v385_v41, %v235_v28  ;;  %v237_v57 = vpop.f32.mrf.mxu1 }
  0xc8   :  { %v348_v4 = vpop.f32.mrf.mxu2 }
  0xc9   :  { %v5726_v59 = vadd.f32 %v348_v4, %v198_v42  ;;  %v387_v56 = vpop.f32.mrf.mxu3  ;;  %v201_v45 = vpop.f32.mrf.mxu0 }
  0xca   :  { %v5728_v44 = vadd.f32 %v387_v56, %v237_v57  ;;  %v240_v10 = vpop.f32.mrf.mxu1 }
  0xcc   :  { %4299 = vmatmul.msk.bf16.vlgmr.msra.gmra.mxu0 %vm146_vm1, %v5422_v47 }
  0xcd   :  { %4305 = vmatmul.msk.bf16.vlgmr.msra.gmra.mxu1 %vm146_vm1, %v5422_v47  ;;  %4311 = vmatmul.msk.bf16.vlgmr.msra.gmra.mxu2 %vm146_vm1, %v5567_v13 }
  0xce   :  { %4317 = vmatmul.msk.bf16.vlgmr.msra.gmra.mxu3 %vm146_vm1, %v5567_v13  ;;  %1271 = vmatpush.bf16.msra.mxu2 %v5539_v8 }
  0xcf   :  { %1310 = vmatpush.bf16.msra.mxu3 %v5543_v9  ;;  %1161 = vmatpush.bf16.msra.mxu0 %v5392_v40 }
  0xd0   :  { %v351_v56 = vpop.f32.mrf.mxu2  ;;  %1200 = vmatpush.bf16.msra.mxu1 %v5397_v43 }
  0xd1   :  { %v5742_v6 = vadd.f32 %v351_v56, %v201_v45  ;;  %v390_v28 = vpop.f32.mrf.mxu3  ;;  %v203_v35 = vpop.f32.mrf.mxu0 }
  0xd2   :  { %v5744_v41 = vadd.f32 %v390_v28, %v240_v10  ;;  %v242_v42 = vpop.f32.mrf.mxu1  ;;  %1272 = vmatpush.bf16.msra.mxu2 %v5613_v27 }
  0xd3   :  { %1311 = vmatpush.bf16.msra.mxu3 %v5618_v29  ;;  %1162 = vmatpush.bf16.msra.mxu0 %v5441_v51 }
  0xd4   :  { %1201 = vmatpush.bf16.msra.mxu1 %v5452_v55 }
  0xd8   :  { %v353_v57 = vpop.f32.mrf.mxu2 }
  0xd9   :  { %v5750_v4 = vadd.f32 %v353_v57, %v203_v35  ;;  %v392_v9 = vpop.f32.mrf.mxu3  ;;  %v206_v8 = vpop.f32.mrf.mxu0 }
  0xda   :  { %v5752_v45 = vadd.f32 %v392_v9, %v242_v42  ;;  %v245_v56 = vpop.f32.mrf.mxu1 }
  0xdc   :  { %4300 = vmatmul.msk.bf16.gmra.mxu0 %vm146_vm1, %v5480_v61 }
  0xdd   :  { %4306 = vmatmul.msk.bf16.gmra.mxu1 %vm146_vm1, %v5480_v61  ;;  %4312 = vmatmul.msk.bf16.gmra.mxu2 %vm146_vm1, %v5589_v15 }
  0xde   :  { %4318 = vmatmul.msk.bf16.gmra.mxu3 %vm146_vm1, %v5589_v15 }
  0xe0   :  { %v356_v10 = vpop.f32.mrf.mxu2 }
  0xe1   :  { %v5762_v28 = vadd.f32 %v356_v10, %v206_v8  ;;  %v395_v35 = vpop.f32.mrf.mxu3  ;;  %v208_v57 = vpop.f32.mrf.mxu0 }
  0xe2   :  { %v5764_v9 = vadd.f32 %v395_v35, %v245_v56  ;;  %v247_v42 = vpop.f32.mrf.mxu1 }
  0xe8   :  { %v358_v29 = vpop.f32.mrf.mxu2 }
  0xe9   :  { %v5766_v27 = vadd.f32 %v358_v29, %v208_v57  ;;  %v397_v13 = vpop.f32.mrf.mxu3  ;;  %v486_v55 = vpop.f32.mrf.mxu0 }
  0xea   :  { %v5768_v61 = vadd.f32 %v397_v13, %v247_v42  ;;  %v555_v51 = vadd.f32 %v486_v55, %v5644_v36  ;;  %v525_v43 = vpop.f32.mrf.mxu1 }
  0xeb   :  { %v556_v15 = vadd.f32 %v525_v43, %v5646_v39 }
  0xec   :  { %4301 = vmatmul.msk.bf16.gmra.mxu0 %vm146_vm1, %v5498_v63 }
  0xed   :  { %4307 = vmatmul.msk.bf16.gmra.mxu1 %vm146_vm1, %v5498_v63  ;;  %4313 = vmatmul.msk.bf16.gmra.mxu2 %vm146_vm1, %v5627_v30 }
  0xee   :  { %4319 = vmatmul.msk.bf16.gmra.mxu3 %vm146_vm1, %v5627_v30 }
  0xf0   :  { %v665_v8 = vpop.f32.mrf.mxu2 }
  0xf1   :  { %v5780_v13 = vadd.f32 %v665_v8, %v555_v51  ;;  %v704_v29 = vpop.f32.mrf.mxu3  ;;  %v488_v55 = vpop.f32.mrf.mxu0 }
  0xf2   :  { %v5782_v36 = vadd.f32 %v704_v29, %v556_v15  ;;  %v557_v43 = vadd.f32 %v488_v55, %v5653_v49  ;;  %v527_v39 = vpop.f32.mrf.mxu1 }
  0xf3   :  { %v558_v56 = vadd.f32 %v527_v39, %v5660_v54 }
  0xf8   :  { %v667_v10 = vpop.f32.mrf.mxu2 }
  0xf9   :  { %v5786_v35 = vadd.f32 %v667_v10, %v557_v43  ;;  %v706_v57 = vpop.f32.mrf.mxu3  ;;  %v491_v42 = vpop.f32.mrf.mxu0 }
  0xfa   :  { %v5788_v63 = vadd.f32 %v706_v57, %v558_v56  ;;  %v559_v30 = vadd.f32 %v491_v42, %v5670_v2  ;;  %v530_v51 = vpop.f32.mrf.mxu1 }
  0xfb   :  { %v560_v8 = vadd.f32 %v530_v51, %v5672_v5 }
  0xfc   :  { %4302 = vmatmul.msk.bf16.gmra.mxu0 %vm146_vm1, %v5516_v1 }
  0xfd   :  { %4308 = vmatmul.msk.bf16.gmra.mxu1 %vm146_vm1, %v5516_v1  ;;  %4314 = vmatmul.msk.bf16.gmra.mxu2 %vm146_vm1, %v5651_v48 }
  0xfe   :  { %4320 = vmatmul.msk.bf16.gmra.mxu3 %vm146_vm1, %v5651_v48 }
 0x100   :  { %v670_v15 = vpop.f32.mrf.mxu2 }
 0x101   :  { %v5800_v49 = vadd.f32 %v670_v15, %v559_v30  ;;  %v709_v54 = vpop.f32.mrf.mxu3  ;;  %v493_v2 = vpop.f32.mrf.mxu0 }
 0x102   :  { %v5802_v29 = vadd.f32 %v709_v54, %v560_v8  ;;  %v561_v5 = vadd.f32 %v493_v2, %v5679_v23  ;;  %v532_v55 = vpop.f32.mrf.mxu1 }
 0x103   :  { %v562_v43 = vadd.f32 %v532_v55, %v5686_v34 }
 0x108   :  { %v672_v39 = vpop.f32.mrf.mxu2 }
 0x109   :  { %v5806_v56 = vadd.f32 %v672_v39, %v561_v5  ;;  %v711_v10 = vpop.f32.mrf.mxu3  ;;  %v496_v57 = vpop.f32.mrf.mxu0 }
 0x10a   :  { %v5808_v42 = vadd.f32 %v711_v10, %v562_v43  ;;  %v563_v51 = vadd.f32 %v496_v57, %v5696_v38  ;;  %v535_v30 = vpop.f32.mrf.mxu1  ;;  %v5829_v43 = vld [vmem:[%s8329_s0 + $0x30] sm:$0xff] }
 0x10b   :  { %v564_v15 = vadd.f32 %v535_v30, %v5698_v50 }
 0x10c   :  { %4303 = vmatmul.msk.bf16.gmra.mxu0 %vm146_vm1, %v5554_v11 }
 0x10d   :  { %4309 = vmatmul.msk.bf16.gmra.mxu1 %vm146_vm1, %v5554_v11  ;;  %4315 = vmatmul.msk.bf16.gmra.mxu2 %vm146_vm1, %v5677_v20 }
 0x10e   :  { %4321 = vmatmul.msk.bf16.gmra.mxu3 %vm146_vm1, %v5677_v20 }
 0x110   :  { %v675_v23 = vpop.f32.mrf.mxu2 }
 0x111   :  { %v5820_v34 = vadd.f32 %v675_v23, %v563_v51  ;;  %v714_v8 = vpop.f32.mrf.mxu3  ;;  %v498_v38 = vpop.f32.mrf.mxu0 }
 0x112   :  { %v5822_v54 = vadd.f32 %v714_v8, %v564_v15  ;;  %v565_v50 = vadd.f32 %v498_v38, %v5705_v3  ;;  %v537_v2 = vpop.f32.mrf.mxu1 }
 0x113   :  { %v566_v5 = vadd.f32 %v537_v2, %v5712_v24 }
 0x118   :  { %v677_v55 = vpop.f32.mrf.mxu2 }
 0x119   :  { %v5831_v39 = vadd.f32 %v677_v55, %v565_v50  ;;  %v716_v10 = vpop.f32.mrf.mxu3  ;;  %v501_v57 = vpop.f32.mrf.mxu0 }
 0x11a   :  { %v5833_v51 = vadd.f32 %v716_v10, %v566_v5  ;;  %v567_v30 = vadd.f32 %v501_v57, %v5722_v37  ;;  %v540_v15 = vpop.f32.mrf.mxu1 }
 0x11b   :  { %v568_v3 = vadd.f32 %v540_v15, %v5724_v52 }
 0x11c   :  { %4304 = vmatmul.msk.bf16.gmra.mxu0 %vm146_vm1, %v5829_v43 }
 0x11d   :  { %4310 = vmatmul.msk.bf16.gmra.mxu1 %vm146_vm1, %v5829_v43  ;;  %4316 = vmatmul.msk.bf16.gmra.mxu2 %vm146_vm1, %v5703_v58 }
 0x11e   :  { %4322 = vmatmul.msk.bf16.gmra.mxu3 %vm146_vm1, %v5703_v58 }
 0x120   :  { %v680_v24 = vpop.f32.mrf.mxu2 }
 0x121   :  { %v5845_v23 = vadd.f32 %v680_v24, %v567_v30  ;;  %v719_v8 = vpop.f32.mrf.mxu3  ;;  %v503_v37 = vpop.f32.mrf.mxu0 }
 0x122   :  { %v5847_v38 = vadd.f32 %v719_v8, %v568_v3  ;;  %v569_v52 = vadd.f32 %v503_v37, %v5726_v59  ;;  %v542_v50 = vpop.f32.mrf.mxu1 }
 0x123   :  { %v570_v2 = vadd.f32 %v542_v50, %v5728_v44 }
 0x128   :  { %v682_v5 = vpop.f32.mrf.mxu2 }
 0x129   :  { %v5851_v55 = vadd.f32 %v682_v5, %v569_v52  ;;  %v721_v10 = vpop.f32.mrf.mxu3  ;;  %v506_v57 = vpop.f32.mrf.mxu0 }
 0x12a   :  { %v5853_v15 = vadd.f32 %v721_v10, %v570_v2  ;;  %v571_v58 = vadd.f32 %v506_v57, %v5742_v6  ;;  %v545_v30 = vpop.f32.mrf.mxu1 }
 0x12b   :  { %v572_v24 = vadd.f32 %v545_v30, %v5744_v41 }
 0x12c   :  { %4323 = vmatmul.msk.bf16.vlgmr.msrb.gmra.mxu0 %vm146_vm1, %v5351_v25 }
 0x12d   :  { %4329 = vmatmul.msk.bf16.vlgmr.msrb.gmra.mxu1 %vm146_vm1, %v5351_v25  ;;  %4335 = vmatmul.msk.bf16.vlgmr.msrb.gmra.mxu2 %vm146_vm1, %v5572_v14 }
 0x12e   :  { %4341 = vmatmul.msk.bf16.vlgmr.msrb.gmra.mxu3 %vm146_vm1, %v5572_v14  ;;  %1515 = vmatpush.bf16.msrb.mxu2 %v5325_v17 }
 0x12f   :  { %1554 = vmatpush.bf16.msrb.mxu3 %v5338_v21  ;;  %1437 = vmatpush.bf16.msrb.mxu0 %v5312_v12 }
 0x130   :  { %v685_v44 = vpop.f32.mrf.mxu2  ;;  %1476 = vmatpush.bf16.msrb.mxu1 %v5322_v16 }
 0x131   :  { %v5869_v59 = vadd.f32 %v685_v44, %v571_v58  ;;  %v724_v6 = vpop.f32.mrf.mxu3  ;;  %v508_v41 = vpop.f32.mrf.mxu0 }
 0x132   :  { %v5871_v25 = vadd.f32 %v724_v6, %v572_v24  ;;  %v573_v3 = vadd.f32 %v508_v41, %v5750_v4  ;;  %v547_v8 = vpop.f32.mrf.mxu1  ;;  %1516 = vmatpush.bf16.msrb.mxu2 %v5354_v26 }
 0x133   :  { %v574_v37 = vadd.f32 %v547_v8, %v5752_v45  ;;  %1555 = vmatpush.bf16.msrb.mxu3 %v5368_v31  ;;  %1438 = vmatpush.bf16.msrb.mxu0 %v5327_v18 }
 0x134   :  { %1477 = vmatpush.bf16.msrb.mxu1 %v5340_v22 }
 0x138   :  { %v687_v52 = vpop.f32.mrf.mxu2 }
 0x139   :  { %v5879_v50 = vadd.f32 %v687_v52, %v573_v3  ;;  %v726_v2 = vpop.f32.mrf.mxu3  ;;  %v511_v5 = vpop.f32.mrf.mxu0 }
 0x13a   :  { %v5881_v10 = vadd.f32 %v726_v2, %v574_v37  ;;  %v575_v4 = vadd.f32 %v511_v5, %v5762_v28  ;;  %v550_v57 = vpop.f32.mrf.mxu1 }
 0x13b   :  { %v576_v58 = vadd.f32 %v550_v57, %v5764_v9 }
 0x13c   :  { %4324 = vmatmul.msk.bf16.gmra.mxu0 %vm146_vm1, %v5417_v46 }
 0x13d   :  { %4330 = vmatmul.msk.bf16.gmra.mxu1 %vm146_vm1, %v5417_v46  ;;  %4336 = vmatmul.msk.bf16.gmra.mxu2 %vm146_vm1, %v5594_v19 }
 0x13e   :  { %4342 = vmatmul.msk.bf16.gmra.mxu3 %vm146_vm1, %v5594_v19 }
 0x140   :  { %v690_v45 = vpop.f32.mrf.mxu2 }
 0x141   :  { %v5893_v30 = vadd.f32 %v690_v45, %v575_v4  ;;  %v729_v24 = vpop.f32.mrf.mxu3  ;;  %v513_v28 = vpop.f32.mrf.mxu0 }
 0x142   :  { %v5895_v44 = vadd.f32 %v729_v24, %v576_v58  ;;  %v577_v9 = vadd.f32 %v513_v28, %v5766_v27  ;;  %v552_v6 = vpop.f32.mrf.mxu1 }
 0x143   :  { %v578_v41 = vadd.f32 %v552_v6, %v5768_v61 }
 0x148   :  { %v692_v3 = vpop.f32.mrf.mxu2 }
 0x149   :  { %v5899_v8 = vadd.f32 %v692_v3, %v577_v9  ;;  %v731_v37 = vpop.f32.mrf.mxu3  ;;  %v804_v52 = vpop.f32.mrf.mxu0 }
 0x14a   :  { %v5901_v2 = vadd.f32 %v731_v37, %v578_v41  ;;  %v5904_v5 = vadd.f32 %v804_v52, %v5780_v13  ;;  %v843_v4 = vpop.f32.mrf.mxu1 }
 0x14b   :  { %v5907_v57 = vadd.f32 %v843_v4, %v5782_v36 }
 0x14c   :  { %4325 = vmatmul.msk.bf16.gmra.mxu0 %vm146_vm1, %v5474_v60 }
 0x14d   :  { %4331 = vmatmul.msk.bf16.gmra.mxu1 %vm146_vm1, %v5474_v60  ;;  %4337 = vmatmul.msk.bf16.gmra.mxu2 %vm146_vm1, %v5632_v33 }
 0x14e   :  { %4343 = vmatmul.msk.bf16.gmra.mxu3 %vm146_vm1, %v5632_v33 }
 0x150   :  { %v5917_v61 = vpop.f32.mrf.mxu2 }
 0x151   :  { %v5919_v27 = vpop.f32.mrf.mxu3  ;;  %v806_v13 = vpop.f32.mrf.mxu0 }
 0x152   :  { %v5922_v36 = vadd.f32 %v806_v13, %v5786_v35  ;;  %v845_v58 = vpop.f32.mrf.mxu1 }
 0x153   :  { %v5925_v45 = vadd.f32 %v845_v58, %v5788_v63 }
 0x158   :  { %v5927_v24 = vpop.f32.mrf.mxu2 }
 0x159   :  { %v5929_v28 = vpop.f32.mrf.mxu3  ;;  %v809_v9 = vpop.f32.mrf.mxu0 }
 0x15a   :  { %v5932_v6 = vadd.f32 %v809_v9, %v5800_v49  ;;  %v848_v41 = vpop.f32.mrf.mxu1 }
 0x15b   :  { %v5935_v3 = vadd.f32 %v848_v41, %v5802_v29 }
 0x15c   :  { %4326 = vmatmul.msk.bf16.gmra.mxu0 %vm146_vm1, %v5493_v62 }
 0x15d   :  { %4332 = vmatmul.msk.bf16.gmra.mxu1 %vm146_vm1, %v5493_v62  ;;  %4338 = vmatmul.msk.bf16.gmra.mxu2 %vm146_vm1, %v5658_v53 }
 0x15e   :  { %4344 = vmatmul.msk.bf16.gmra.mxu3 %vm146_vm1, %v5658_v53 }
 0x160   :  { %v5945_v63 = vpop.f32.mrf.mxu2 }
 0x161   :  { %v5947_v35 = vpop.f32.mrf.mxu3  ;;  %v811_v49 = vpop.f32.mrf.mxu0 }
 0x162   :  { %v5950_v29 = vadd.f32 %v811_v49, %v5806_v56  ;;  %v850_v37 = vpop.f32.mrf.mxu1 }
 0x163   :  { %v5953_v52 = vadd.f32 %v850_v37, %v5808_v42 }
 0x168   :  { %v5955_v4 = vpop.f32.mrf.mxu2 }
 0x169   :  { %v5957_v13 = vpop.f32.mrf.mxu3  ;;  %v814_v58 = vpop.f32.mrf.mxu0 }
 0x16a   :  { %v5960_v9 = vadd.f32 %v814_v58, %v5820_v34  ;;  %v853_v41 = vpop.f32.mrf.mxu1 }
 0x16b   :  { %v5963_v31 = vadd.f32 %v853_v41, %v5822_v54 }
 0x16c   :  { %8435 = vst [vmem:[#allocation24_spill] sm:$0xff] %v5960_v9  ;;  %4327 = vmatmul.msk.bf16.gmra.mxu0 %vm146_vm1, %v5511_v0  ;;  %v8441_v9 = vld [vmem:[#allocation18_spill] sm:$0xff] }
 0x16d   :  { %8436 = vst [vmem:[#allocation25_spill] sm:$0xff] %v5963_v31  ;;  %4333 = vmatmul.msk.bf16.gmra.mxu1 %vm146_vm1, %v5511_v0  ;;  %4339 = vmatmul.msk.bf16.gmra.mxu2 %vm146_vm1, %v5684_v32 }
 0x16e   :  { %4345 = vmatmul.msk.bf16.gmra.mxu3 %vm146_vm1, %v5684_v32 }
 0x170   :  { %v5973_v56 = vpop.f32.mrf.mxu2 }
 0x171   :  { %v5975_v42 = vpop.f32.mrf.mxu3  ;;  %v816_v34 = vpop.f32.mrf.mxu0 }
 0x172   :  { %v5978_v54 = vadd.f32 %v816_v34, %v5831_v39  ;;  %v855_v49 = vpop.f32.mrf.mxu1 }
 0x173   :  { %v5981_v37 = vadd.f32 %v855_v49, %v5833_v51 }
 0x174   :  { %8437 = vst [vmem:[#allocation26_spill] sm:$0xff] %v5978_v54 }
 0x175   :  { %8438 = vst [vmem:[#allocation27_spill] sm:$0xff] %v5981_v37 }
 0x178   :  { %v5983_v58 = vpop.f32.mrf.mxu2 }
 0x179   :  { %v5985_v41 = vpop.f32.mrf.mxu3  ;;  %v819_v26 = vpop.f32.mrf.mxu0 }
 0x17a   :  { %v5988_v21 = vadd.f32 %v819_v26, %v5845_v23  ;;  %v858_v17 = vpop.f32.mrf.mxu1 }
 0x17b   :  { %v5991_v31 = vadd.f32 %v858_v17, %v5847_v38 }
 0x17c   :  { %8439 = vst [vmem:[#allocation28_spill] sm:$0xff] %v5988_v21  ;;  %4328 = vmatmul.msk.bf16.gmra.mxu0 %vm146_vm1, %v8441_v9 }
 0x17d   :  { %8440 = vst [vmem:[#allocation29_spill] sm:$0xff] %v5991_v31  ;;  %4334 = vmatmul.msk.bf16.gmra.mxu1 %vm146_vm1, %v8441_v9  ;;  %4340 = vmatmul.msk.bf16.gmra.mxu2 %vm146_vm1, %v5710_v7 }
 0x17e   :  { %4346 = vmatmul.msk.bf16.gmra.mxu3 %vm146_vm1, %v5710_v7 }
 0x180   :  { %v6001_v39 = vpop.f32.mrf.mxu2 }
 0x181   :  { %v6003_v26 = vpop.f32.mrf.mxu3  ;;  %v821_v51 = vpop.f32.mrf.mxu0 }
 0x182   :  { %v6006_v17 = vadd.f32 %v821_v51, %v5851_v55  ;;  %v860_v23 = vpop.f32.mrf.mxu1  ;;  %v8447_v55 = vld [vmem:[#allocation8_spill] sm:$0xff] }
 0x183   :  { %v6009_v38 = vadd.f32 %v860_v23, %v5853_v15 }
 0x184   :  { %8442 = vst [vmem:[#allocation18_spill] sm:$0xff] %v6006_v17 }
 0x185   :  { %8443 = vst [vmem:[#allocation30_spill] sm:$0xff] %v6009_v38 }
 0x188   :  { %v6011_v34 = vpop.f32.mrf.mxu2 }
 0x189   :  { %v6013_v49 = vpop.f32.mrf.mxu3  ;;  %v824_v31 = vpop.f32.mrf.mxu0 }
 0x18a   :  { %v6016_v21 = vadd.f32 %v824_v31, %v5869_v59  ;;  %v863_v7 = vpop.f32.mrf.mxu1  ;;  %v8446_v31 = vld [vmem:[#allocation7_spill] sm:$0xff]  ;;  %v8448_v59 = vld [vmem:[#allocation9_spill] sm:$0xff] }
 0x18b   :  { %v6019_v37 = vadd.f32 %v863_v7, %v5871_v25  ;;  %v8450_v7 = vld [vmem:[#allocation10_spill] sm:$0xff] }
 0x18c   :  { %8444 = vst [vmem:[#allocation31_spill] sm:$0xff] %v6016_v21  ;;  %4347 = vmatmul.msk.bf16.vlgmr.msra.gmra.mxu0 %vm146_vm1, %v5422_v47 }
 0x18d   :  { %8445 = vst [vmem:[#allocation32_spill] sm:$0xff] %v6019_v37  ;;  %4353 = vmatmul.msk.bf16.vlgmr.msra.gmra.mxu1 %vm146_vm1, %v5422_v47  ;;  %4363 = vmatmul.msk.bf16.vlgmr.msra.gmra.mxu2 %vm146_vm1, %v5417_v46  ;;  %v8454_v37 = vld [vmem:[#allocation13_spill] sm:$0xff] }
 0x18e   :  { %4369 = vmatmul.msk.bf16.vlgmr.msra.gmra.mxu3 %vm146_vm1, %v5417_v46  ;;  %1695 = vmatpush.bf16.msra.mxu2 %v5392_v40  ;;  %v8452_v40 = vld [vmem:[#allocation11_spill] sm:$0xff] }
 0x18f   :  { %1734 = vmatpush.bf16.msra.mxu3 %v8446_v31  ;;  %1593 = vmatpush.bf16.msra.mxu0 %v8447_v55  ;;  %v8453_v31 = vld [vmem:[#allocation12_spill] sm:$0xff] }
 0x190   :  { %v6032_v15 = vpop.f32.mrf.mxu2  ;;  %1632 = vmatpush.bf16.msra.mxu1 %v8448_v59 }
 0x191   :  { %v6035_v25 = vpop.f32.mrf.mxu3  ;;  %v826_v51 = vpop.f32.mrf.mxu0 }
 0x192   :  { %v6038_v47 = vadd.f32 %v826_v51, %v5879_v50  ;;  %v865_v23 = vpop.f32.mrf.mxu1  ;;  %1696 = vmatpush.bf16.msra.mxu2 %v8450_v7 }
 0x193   :  { %v6042_v46 = vadd.f32 %v865_v23, %v5881_v10  ;;  %1735 = vmatpush.bf16.msra.mxu3 %v8452_v40  ;;  %1594 = vmatpush.bf16.msra.mxu0 %v8453_v31  ;;  %v8457_v10 = vld [vmem:[#allocation14_spill] sm:$0xff] }
 0x194   :  { %8449 = vst [vmem:[#allocation33_spill] sm:$0xff] %v6038_v47  ;;  %1633 = vmatpush.bf16.msra.mxu1 %v8454_v37  ;;  %v8460_v47 = vld [vmem:[#allocation15_spill] sm:$0xff] }
 0x195   :  { %8451 = vst [vmem:[#allocation34_spill] sm:$0xff] %v6042_v46 }
 0x198   :  { %v6047_v21 = vpop.f32.mrf.mxu2 }
 0x199   :  { %v6049_v59 = vpop.f32.mrf.mxu3  ;;  %v829_v55 = vpop.f32.mrf.mxu0 }
 0x19a   :  { %v6052_v50 = vadd.f32 %v829_v55, %v5893_v30  ;;  %v868_v51 = vpop.f32.mrf.mxu1 }
 0x19b   :  { %v6055_v7 = vadd.f32 %v868_v51, %v5895_v44 }
 0x19c   :  { %8455 = vst [vmem:[#allocation35_spill] sm:$0xff] %v6052_v50  ;;  %4348 = vmatmul.msk.bf16.gmra.mxu0 %vm146_vm1, %v8457_v10 }
 0x19d   :  { %8456 = vst [vmem:[#allocation36_spill] sm:$0xff] %v6055_v7  ;;  %4354 = vmatmul.msk.bf16.gmra.mxu1 %vm146_vm1, %v8457_v10  ;;  %4364 = vmatmul.msk.bf16.gmra.mxu2 %vm146_vm1, %v5474_v60 }
 0x19e   :  { %4370 = vmatmul.msk.bf16.gmra.mxu3 %vm146_vm1, %v5474_v60 }
 0x1a0   :  { %v6065_v23 = vpop.f32.mrf.mxu2 }
 0x1a1   :  { %v6067_v30 = vpop.f32.mrf.mxu3  ;;  %v831_v55 = vpop.f32.mrf.mxu0 }
 0x1a2   :  { %v6070_v44 = vadd.f32 %v831_v55, %v5899_v8  ;;  %v870_v51 = vpop.f32.mrf.mxu1 }
 0x1a3   :  { %v6073_v40 = vadd.f32 %v870_v51, %v5901_v2 }
 0x1a4   :  { %8458 = vst [vmem:[#allocation14_spill] sm:$0xff] %v6070_v44 }
 0x1a5   :  { %8459 = vst [vmem:[#allocation37_spill] sm:$0xff] %v6073_v40 }
 0x1a8   :  { %v6075_v7 = vpop.f32.mrf.mxu2 }
 0x1a9   :  { %v6077_v10 = vpop.f32.mrf.mxu3  ;;  %v984_v50 = vpop.f32.mrf.mxu0 }
 0x1aa   :  { %v1023_v46 = vpop.f32.mrf.mxu1  ;;  %v985_v60 = vadd.f32 %v984_v50, %v5917_v61 }
 0x1ab   :  { %v1024_v8 = vadd.f32 %v1023_v46, %v5919_v27 }
 0x1ac   :  { %4349 = vmatmul.msk.bf16.gmra.mxu0 %vm146_vm1, %v8460_v47 }
 0x1ad   :  { %4355 = vmatmul.msk.bf16.gmra.mxu1 %vm146_vm1, %v8460_v47  ;;  %4365 = vmatmul.msk.bf16.gmra.mxu2 %vm146_vm1, %v5493_v62 }
 0x1ae   :  { %4371 = vmatmul.msk.bf16.gmra.mxu3 %vm146_vm1, %v5493_v62 }
 0x1b0   :  { %v1062_v2 = vpop.f32.mrf.mxu2 }
 0x1b1   :  { %v6089_v55 = vadd.f32 %v1062_v2, %v985_v60  ;;  %v1101_v51 = vpop.f32.mrf.mxu3  ;;  %v986_v40 = vpop.f32.mrf.mxu0 }
 0x1b2   :  { %v6091_v44 = vadd.f32 %v1101_v51, %v1024_v8  ;;  %v1025_v37 = vpop.f32.mrf.mxu1  ;;  %v987_v47 = vadd.f32 %v986_v40, %v5927_v24 }
 0x1b3   :  { %v1026_v31 = vadd.f32 %v1025_v37, %v5929_v28 }
 0x1b8   :  { %v1064_v38 = vpop.f32.mrf.mxu2 }
 0x1b9   :  { %v6095_v17 = vadd.f32 %v1064_v38, %v987_v47  ;;  %v1103_v62 = vpop.f32.mrf.mxu3  ;;  %v989_v54 = vpop.f32.mrf.mxu0 }
 0x1ba   :  { %v6097_v61 = vadd.f32 %v1103_v62, %v1026_v31  ;;  %v1028_v27 = vpop.f32.mrf.mxu1  ;;  %v990_v40 = vadd.f32 %v989_v54, %v5945_v63 }
 0x1bb   :  { %v1029_v24 = vadd.f32 %v1028_v27, %v5947_v35 }
 0x1bc   :  { %4350 = vmatmul.msk.bf16.gmra.mxu0 %vm146_vm1, %v5516_v1 }
 0x1bd   :  { %4356 = vmatmul.msk.bf16.gmra.mxu1 %vm146_vm1, %v5516_v1  ;;  %4366 = vmatmul.msk.bf16.gmra.mxu2 %vm146_vm1, %v5511_v0 }
 0x1be   :  { %4372 = vmatmul.msk.bf16.gmra.mxu3 %vm146_vm1, %v5511_v0 }
 0x1c0   :  { %v1067_v28 = vpop.f32.mrf.mxu2 }
 0x1c1   :  { %v6109_v37 = vadd.f32 %v1067_v28, %v990_v40  ;;  %v1106_v38 = vpop.f32.mrf.mxu3  ;;  %v991_v31 = vpop.f32.mrf.mxu0 }
 0x1c2   :  { %v6111_v46 = vadd.f32 %v1106_v38, %v1029_v24  ;;  %v1030_v50 = vpop.f32.mrf.mxu1  ;;  %v992_v1 = vadd.f32 %v991_v31, %v5955_v4 }
 0x1c3   :  { %v1031_v60 = vadd.f32 %v1030_v50, %v5957_v13 }
 0x1c8   :  { %v1069_v8 = vpop.f32.mrf.mxu2 }
 0x1c9   :  { %v6115_v2 = vadd.f32 %v1069_v8, %v992_v1  ;;  %v1108_v0 = vpop.f32.mrf.mxu3  ;;  %v994_v51 = vpop.f32.mrf.mxu0 }
 0x1ca   :  { %v6117_v63 = vadd.f32 %v1108_v0, %v1031_v60  ;;  %v1033_v35 = vpop.f32.mrf.mxu1  ;;  %v995_v4 = vadd.f32 %v994_v51, %v5973_v56  ;;  %v6140_v56 = vld [vmem:[%s8329_s0 + $0x68] sm:$0xff] }
 0x1cb   :  { %v1034_v13 = vadd.f32 %v1033_v35, %v5975_v42 }
 0x1cc   :  { %4351 = vmatmul.msk.bf16.gmra.mxu0 %vm146_vm1, %v5554_v11 }
 0x1cd   :  { %4357 = vmatmul.msk.bf16.gmra.mxu1 %vm146_vm1, %v5554_v11  ;;  %4367 = vmatmul.msk.bf16.gmra.mxu2 %vm146_vm1, %v8441_v9 }
 0x1ce   :  { %4373 = vmatmul.msk.bf16.gmra.mxu3 %vm146_vm1, %v8441_v9 }
 0x1d0   :  { %v1072_v54 = vpop.f32.mrf.mxu2 }
 0x1d1   :  { %v6129_v47 = vadd.f32 %v1072_v54, %v995_v4  ;;  %v1111_v62 = vpop.f32.mrf.mxu3  ;;  %v996_v27 = vpop.f32.mrf.mxu0 }
 0x1d2   :  { %v6131_v40 = vadd.f32 %v1111_v62, %v1034_v13  ;;  %v1035_v24 = vpop.f32.mrf.mxu1  ;;  %v997_v11 = vadd.f32 %v996_v27, %v5983_v58 }
 0x1d3   :  { %v1036_v28 = vadd.f32 %v1035_v24, %v5985_v41 }
 0x1d8   :  { %v1074_v38 = vpop.f32.mrf.mxu2 }
 0x1d9   :  { %v6135_v31 = vadd.f32 %v1074_v38, %v997_v11  ;;  %v1113_v9 = vpop.f32.mrf.mxu3  ;;  %v999_v50 = vpop.f32.mrf.mxu0  ;;  %v8461_v11 = vld [vmem:[#allocation19_spill] sm:$0xff] }
 0x1da   :  { %v6142_v42 = vadd.f32 %v1113_v9, %v1036_v28  ;;  %v1038_v1 = vpop.f32.mrf.mxu1  ;;  %v1000_v58 = vadd.f32 %v999_v50, %v6001_v39  ;;  %v8463_v9 = vld [vmem:[#allocation17_spill] sm:$0xff] }
 0x1db   :  { %v1039_v41 = vadd.f32 %v1038_v1, %v6003_v26 }
 0x1dc   :  { %4352 = vmatmul.msk.bf16.gmra.mxu0 %vm146_vm1, %v5829_v43 }
 0x1dd   :  { %4358 = vmatmul.msk.bf16.gmra.mxu1 %vm146_vm1, %v5829_v43  ;;  %4368 = vmatmul.msk.bf16.gmra.mxu2 %vm146_vm1, %v6140_v56 }
 0x1de   :  { %4374 = vmatmul.msk.bf16.gmra.mxu3 %vm146_vm1, %v6140_v56 }
 0x1e0   :  { %v1077_v60 = vpop.f32.mrf.mxu2 }
 0x1e1   :  { %v6154_v8 = vadd.f32 %v1077_v60, %v1000_v58  ;;  %v1116_v0 = vpop.f32.mrf.mxu3  ;;  %v1001_v51 = vpop.f32.mrf.mxu0 }
 0x1e2   :  { %v6156_v35 = vadd.f32 %v1116_v0, %v1039_v41  ;;  %v1040_v4 = vpop.f32.mrf.mxu1  ;;  %v1002_v43 = vadd.f32 %v1001_v51, %v6011_v34 }
 0x1e3   :  { %v1041_v13 = vadd.f32 %v1040_v4, %v6013_v49  ;;  %v8462_v49 = vld [vmem:[#allocation16_spill] sm:$0xff] }
 0x1e8   :  { %v1079_v54 = vpop.f32.mrf.mxu2 }
 0x1e9   :  { %v6160_v62 = vadd.f32 %v1079_v54, %v1002_v43  ;;  %v1118_v27 = vpop.f32.mrf.mxu3  ;;  %v1004_v24 = vpop.f32.mrf.mxu0 }
 0x1ea   :  { %v6162_v39 = vadd.f32 %v1118_v27, %v1041_v13  ;;  %v1043_v26 = vpop.f32.mrf.mxu1  ;;  %v1005_v34 = vadd.f32 %v1004_v24, %v6032_v15 }
 0x1eb   :  { %v1044_v28 = vadd.f32 %v1043_v26, %v6035_v25 }
 0x1ec   :  { %4375 = vmatmul.msk.bf16.vlgmr.msrb.gmra.mxu0 %vm146_vm1, %v5572_v14 }
 0x1ed   :  { %4381 = vmatmul.msk.bf16.vlgmr.msrb.gmra.mxu1 %vm146_vm1, %v5572_v14  ;;  %4387 = vmatmul.msk.bf16.vlgmr.msrb.gmra.mxu2 %vm146_vm1, %v8461_v11 }
 0x1ee   :  { %4393 = vmatmul.msk.bf16.vlgmr.msrb.gmra.mxu3 %vm146_vm1, %v8461_v11  ;;  %1907 = vmatpush.bf16.msrb.mxu2 %v5312_v12  ;;  %v8464_v12 = vld [vmem:[#allocation21_spill] sm:$0xff] }
 0x1ef   :  { %1946 = vmatpush.bf16.msrb.mxu3 %v5322_v16  ;;  %1805 = vmatpush.bf16.msrb.mxu0 %v8462_v49  ;;  %v8465_v16 = vld [vmem:[#allocation22_spill] sm:$0xff] }
 0x1f0   :  { %v1082_v38 = vpop.f32.mrf.mxu2  ;;  %1844 = vmatpush.bf16.msrb.mxu1 %v8463_v9 }
 0x1f1   :  { %v6178_v14 = vadd.f32 %v1082_v38, %v1005_v34  ;;  %v1121_v50 = vpop.f32.mrf.mxu3  ;;  %v1006_v1 = vpop.f32.mrf.mxu0 }
 0x1f2   :  { %v6180_v58 = vadd.f32 %v1121_v50, %v1044_v28  ;;  %v1045_v41 = vpop.f32.mrf.mxu1  ;;  %1908 = vmatpush.bf16.msrb.mxu2 %v5327_v18  ;;  %v1007_v15 = vadd.f32 %v1006_v1, %v6047_v21  ;;  %v8466_v18 = vld [vmem:[#allocation20_spill] sm:$0xff] }
 0x1f3   :  { %1947 = vmatpush.bf16.msrb.mxu3 %v5340_v22  ;;  %1806 = vmatpush.bf16.msrb.mxu0 %v8464_v12  ;;  %v1046_v25 = vadd.f32 %v1045_v41, %v6049_v59 }
 0x1f4   :  { %1845 = vmatpush.bf16.msrb.mxu1 %v8465_v16 }
 0x1f8   :  { %v1084_v60 = vpop.f32.mrf.mxu2 }
 0x1f9   :  { %v6188_v0 = vadd.f32 %v1084_v60, %v1007_v15  ;;  %v1123_v51 = vpop.f32.mrf.mxu3  ;;  %v1009_v4 = vpop.f32.mrf.mxu0 }
 0x1fa   :  { %v6190_v43 = vadd.f32 %v1123_v51, %v1046_v25  ;;  %v1048_v13 = vpop.f32.mrf.mxu1  ;;  %v1010_v21 = vadd.f32 %v1009_v4, %v6065_v23 }
 0x1fb   :  { %v1049_v22 = vadd.f32 %v1048_v13, %v6067_v30 }
 0x1fc   :  { %4376 = vmatmul.msk.bf16.gmra.mxu0 %vm146_vm1, %v5594_v19 }
 0x1fd   :  { %4382 = vmatmul.msk.bf16.gmra.mxu1 %vm146_vm1, %v5594_v19  ;;  %4388 = vmatmul.msk.bf16.gmra.mxu2 %vm146_vm1, %v8466_v18 }
 0x1fe   :  { %4394 = vmatmul.msk.bf16.gmra.mxu3 %vm146_vm1, %v8466_v18 }
 0x200   :  { %v1087_v59 = vpop.f32.mrf.mxu2 }
 0x201   :  { %v6202_v54 = vadd.f32 %v1087_v59, %v1010_v21  ;;  %v1126_v27 = vpop.f32.mrf.mxu3  ;;  %v1011_v24 = vpop.f32.mrf.mxu0 }
 0x202   :  { %v6204_v26 = vadd.f32 %v1126_v27, %v1049_v22  ;;  %v1050_v11 = vpop.f32.mrf.mxu1  ;;  %v1012_v19 = vadd.f32 %v1011_v24, %v6075_v7  ;;  %v8467_v7 = vld [vmem:[#allocation23_spill] sm:$0xff] }
 0x203   :  { %v1051_v34 = vadd.f32 %v1050_v11, %v6077_v10  ;;  %v6229_v11 = vld [vmem:[%s8330_s2] ss:$0 sm:$0xff] }
 0x208   :  { %v1089_v28 = vpop.f32.mrf.mxu2 }
 0x209   :  { %v6208_v38 = vadd.f32 %v1089_v28, %v1012_v19  ;;  %v1128_v50 = vpop.f32.mrf.mxu3  ;;  %v1164_v1 = vpop.f32.mrf.mxu0 }
 0x20a   :  { %v6210_v23 = vadd.f32 %v1128_v50, %v1051_v34  ;;  %v1233_v30 = vadd.f32 %v1164_v1, %v6089_v55  ;;  %v1203_v41 = vpop.f32.mrf.mxu1 }
 0x20b   :  { %v1234_v15 = vadd.f32 %v1203_v41, %v6091_v44 }
 0x20c   :  { %4377 = vmatmul.msk.bf16.gmra.mxu0 %vm146_vm1, %v5632_v33 }
 0x20d   :  { %4383 = vmatmul.msk.bf16.gmra.mxu1 %vm146_vm1, %v5632_v33  ;;  %4389 = vmatmul.msk.bf16.gmra.mxu2 %vm146_vm1, %v8467_v7 }
 0x20e   :  { %4395 = vmatmul.msk.bf16.gmra.mxu3 %vm146_vm1, %v8467_v7 }
 0x210   :  { %v1274_v10 = vpop.f32.mrf.mxu2 }
 0x211   :  { %v1343_v25 = vadd.f32 %v1274_v10, %v1233_v30  ;;  %v1313_v60 = vpop.f32.mrf.mxu3  ;;  %v1166_v51 = vpop.f32.mrf.mxu0 }
 0x212   :  { %v1344_v55 = vadd.f32 %v1313_v60, %v1234_v15  ;;  %v1235_v4 = vadd.f32 %v1166_v51, %v6095_v17  ;;  %v1205_v44 = vpop.f32.mrf.mxu1 }
 0x213   :  { %v1367_v13 = vmax.f32 %v5904_v5, %v1343_v25  ;;  %v1236_v18 = vadd.f32 %v1205_v44, %v6097_v61 }
 0x214   :  { %v1368_v33 = vmax.f32 %v5907_v57, %v1344_v55 }
 0x216   :  { %v1391_v21 = vmax.f32 %v1367_v13, %v1368_v33 }
 0x218   :  { %v1276_v22 = vpop.f32.mrf.mxu2  ;;  %v1407_v28 = vadd.f32 %v6229_v11, %v1391_v21 }
 0x219   :  { %v1345_v59 = vadd.f32 %v1276_v22, %v1235_v4  ;;  %v1315_v27 = vpop.f32.mrf.mxu3  ;;  %v1169_v24 = vpop.f32.mrf.mxu0 }
 0x21a   :  { %v1346_v19 = vadd.f32 %v1315_v27, %v1236_v18  ;;  %v1237_v17 = vadd.f32 %v1169_v24, %v6109_v37  ;;  %v1208_v34 = vpop.f32.mrf.mxu1  ;;  %v1419_v30 = vmax.f32 %v1407_v28, 0.0  ;;  %v8470_v28 = vld [vmem:[#allocation25_spill] sm:$0xff] }
 0x21b   :  { %v1369_v5 = vmax.f32 %v5922_v36, %v1345_v59  ;;  %v1238_v61 = vadd.f32 %v1208_v34, %v6111_v46  ;;  %v8468_v34 = vld [vmem:[#allocation24_spill] sm:$0xff] }
 0x21c   :  { %v1370_v57 = vmax.f32 %v5925_v45, %v1346_v19  ;;  %4378 = vmatmul.msk.bf16.gmra.mxu0 %vm146_vm1, %v5658_v53 }
 0x21d   :  { %4384 = vmatmul.msk.bf16.gmra.mxu1 %vm146_vm1, %v5658_v53  ;;  %4390 = vmatmul.msk.bf16.gmra.mxu2 %vm146_vm1, %v5651_v48 }
 0x21e   :  { %v1392_v50 = vmax.f32 %v1369_v5, %v1370_v57  ;;  %4396 = vmatmul.msk.bf16.gmra.mxu3 %vm146_vm1, %v5651_v48 }
 0x220   :  { %v1408_v36 = vadd.f32 %v6229_v11, %v1392_v50  ;;  %v1279_v37 = vpop.f32.mrf.mxu2 }
 0x221   :  { %v1347_v46 = vadd.f32 %v1279_v37, %v1237_v17  ;;  %v1318_v45 = vpop.f32.mrf.mxu3  ;;  %v1171_v1 = vpop.f32.mrf.mxu0 }
 0x222   :  { %v1420_v41 = vmax.f32 %v1408_v36, 0.0  ;;  %v1348_v15 = vadd.f32 %v1318_v45, %v1238_v61  ;;  %v1239_v53 = vadd.f32 %v1171_v1, %v6115_v2  ;;  %v1210_v7 = vpop.f32.mrf.mxu1 }
 0x223   :  { %v1371_v10 = vmax.f32 %v5932_v6, %v1347_v46  ;;  %v1240_v25 = vadd.f32 %v1210_v7, %v6117_v63  ;;  %v8472_v7 = vld [vmem:[#allocation27_spill] sm:$0xff] }
 0x224   :  { %v6248_v60 = vpack.c.bf16 %v1420_v41, %v1419_v30  ;;  %v1372_v48 = vmax.f32 %v5935_v3, %v1348_v15  ;;  %v8471_v15 = vld [vmem:[#allocation26_spill] sm:$0xff] }
 0x226   :  { %v1393_v51 = vmax.f32 %v1371_v10, %v1372_v48 }
 0x228   :  { %v1281_v55 = vpop.f32.mrf.mxu2  ;;  %v1409_v3 = vadd.f32 %v6229_v11, %v1393_v51 }
 0x229   :  { %v1349_v4 = vadd.f32 %v1281_v55, %v1239_v53  ;;  %v1320_v44 = vpop.f32.mrf.mxu3  ;;  %v1174_v13 = vpop.f32.mrf.mxu0 }
 0x22a   :  { %v1350_v18 = vadd.f32 %v1320_v44, %v1240_v25  ;;  %v1241_v33 = vadd.f32 %v1174_v13, %v6129_v47  ;;  %v1213_v21 = vpop.f32.mrf.mxu1  ;;  %v1421_v27 = vmax.f32 %v1409_v3, 0.0 }
 0x22b   :  { %v1373_v2 = vmax.f32 %v5950_v29, %v1349_v4  ;;  %v1242_v22 = vadd.f32 %v1213_v21, %v6131_v40 }
 0x22c   :  { %v1374_v6 = vmax.f32 %v5953_v52, %v1350_v18  ;;  %4379 = vmatmul.msk.bf16.gmra.mxu0 %vm146_vm1, %v5684_v32 }
 0x22d   :  { %4385 = vmatmul.msk.bf16.gmra.mxu1 %vm146_vm1, %v5684_v32  ;;  %4391 = vmatmul.msk.bf16.gmra.mxu2 %vm146_vm1, %v5677_v20 }
 0x22e   :  { %v1394_v63 = vmax.f32 %v1373_v2, %v1374_v6  ;;  %4397 = vmatmul.msk.bf16.gmra.mxu3 %vm146_vm1, %v5677_v20 }
 0x230   :  { %v1410_v29 = vadd.f32 %v6229_v11, %v1394_v63  ;;  %v1284_v47 = vpop.f32.mrf.mxu2 }
 0x231   :  { %v1351_v40 = vadd.f32 %v1284_v47, %v1241_v33  ;;  %v1323_v52 = vpop.f32.mrf.mxu3  ;;  %v1176_v59 = vpop.f32.mrf.mxu0 }
 0x232   :  { %v1422_v24 = vmax.f32 %v1410_v29, 0.0  ;;  %v1352_v19 = vadd.f32 %v1323_v52, %v1242_v22  ;;  %v1243_v32 = vadd.f32 %v1176_v59, %v6135_v31  ;;  %v1215_v17 = vpop.f32.mrf.mxu1  ;;  %v8473_v22 = vld [vmem:[#allocation28_spill] sm:$0xff]  ;;  %v8475_v29 = vld [vmem:[#allocation29_spill] sm:$0xff] }
 0x233   :  { %v1375_v5 = vmax.f32 %v8468_v34, %v1351_v40  ;;  %v1244_v61 = vadd.f32 %v1215_v17, %v6142_v42  ;;  %v6278_v42 = vld [vmem:[%s8329_s0 + $0xd0] sm:$0xff]  ;;  %v8476_v34 = vld [vmem:[#allocation18_spill] sm:$0xff] }
 0x234   :  { %v6268_v57 = vpack.c.bf16 %v1422_v24, %v1421_v27  ;;  %v1376_v20 = vmax.f32 %v8470_v28, %v1352_v19 }
 0x236   :  { %8469 = vst [vmem:[#allocation15_spill] sm:$0xff] %v6268_v57  ;;  %v1395_v50 = vmax.f32 %v1375_v5, %v1376_v20 }
 0x238   :  { %v1286_v36 = vpop.f32.mrf.mxu2 }
 0x239   :  { %v1353_v37 = vadd.f32 %v1286_v36, %v1243_v32  ;;  %v1325_v46 = vpop.f32.mrf.mxu3  ;;  %v1179_v45 = vpop.f32.mrf.mxu0  ;;  %v8479_v36 = vld [vmem:[#allocation9_spill] sm:$0xff] }
 0x23a   :  { %v1354_v1 = vadd.f32 %v1325_v46, %v1244_v61  ;;  %v1245_v30 = vadd.f32 %v1179_v45, %v6154_v8  ;;  %v1218_v41 = vpop.f32.mrf.mxu1  ;;  %v6287_v8 = vld [vmem:[%s8329_s0 + $0x98] sm:$0xff]  ;;  %v8477_v61 = vld [vmem:[#allocation30_spill] sm:$0xff] }
 0x23b   :  { %v1377_v31 = vmax.f32 %v8471_v15, %v1353_v37  ;;  %v1246_v53 = vadd.f32 %v1218_v41, %v6156_v35  ;;  %v1411_v35 = vadd.f32 %v6229_v11, %v1395_v50  ;;  %v8478_v50 = vld [vmem:[#allocation8_spill] sm:$0xff]  ;;  %v8480_v37 = vld [vmem:[#allocation2_spill] sm:$0xff] }
 0x23c   :  { %v1378_v10 = vmax.f32 %v8472_v7, %v1354_v1  ;;  %4380 = vmatmul.msk.bf16.gmra.mxu0 %vm146_vm1, %v6278_v42  ;;  %v8481_v1 = vld [vmem:[#allocation3_spill] sm:$0xff] }
 0x23d   :  { %4386 = vmatmul.msk.bf16.gmra.mxu1 %vm146_vm1, %v6278_v42  ;;  %4392 = vmatmul.msk.bf16.gmra.mxu2 %vm146_vm1, %v6287_v8  ;;  %v1423_v13 = vmax.f32 %v1411_v35, 0.0 }
 0x23e   :  { %v1396_v25 = vmax.f32 %v1377_v31, %v1378_v10  ;;  %4398 = vmatmul.msk.bf16.gmra.mxu3 %vm146_vm1, %v6287_v8 }
 0x240   :  { %v1412_v48 = vadd.f32 %v6229_v11, %v1396_v25  ;;  %v1289_v51 = vpop.f32.mrf.mxu2  ;;  %v8482_v25 = vld [vmem:[#allocation12_spill] sm:$0xff] }
 0x241   :  { %v1355_v55 = vadd.f32 %v1289_v51, %v1245_v30  ;;  %v1328_v4 = vpop.f32.mrf.mxu3  ;;  %v1181_v44 = vpop.f32.mrf.mxu0 }
 0x242   :  { %v1424_v18 = vmax.f32 %v1412_v48, 0.0  ;;  %v1356_v33 = vadd.f32 %v1328_v4, %v1246_v53  ;;  %v1247_v21 = vadd.f32 %v1181_v44, %v6160_v62  ;;  %v1220_v2 = vpop.f32.mrf.mxu1  ;;  %v8483_v48 = vld [vmem:[#allocation31_spill] sm:$0xff]  ;;  %v8484_v4 = vld [vmem:[#allocation13_spill] sm:$0xff]  ;;  %v8485_v44 = vld [vmem:[#allocation4_spill] sm:$0xff] }
 0x243   :  { %v1379_v6 = vmax.f32 %v8473_v22, %v1355_v55  ;;  %v1248_v3 = vadd.f32 %v1220_v2, %v6162_v39  ;;  %v6308_v39 = vld [vmem:[%s8329_s0 + $0x8] sm:$0xff] }
 0x244   :  { %v6298_v63 = vpack.c.bf16 %v1424_v18, %v1423_v13  ;;  %v1380_v47 = vmax.f32 %v8475_v29, %v1356_v33  ;;  %v8486_v18 = vld [vmem:[#allocation32_spill] sm:$0xff] }
 0x246   :  { %8474 = vst [vmem:[#allocation19_spill] sm:$0xff] %v6298_v63  ;;  %v1397_v40 = vmax.f32 %v1379_v6, %v1380_v47 }
 0x248   :  { %v1291_v52 = vpop.f32.mrf.mxu2 }
 0x249   :  { %v1357_v59 = vadd.f32 %v1291_v52, %v1247_v21  ;;  %v1330_v27 = vpop.f32.mrf.mxu3  ;;  %v1184_v24 = vpop.f32.mrf.mxu0  ;;  %v8487_v21 = vld [vmem:[#allocation5_spill] sm:$0xff] }
 0x24a   :  { %v1358_v19 = vadd.f32 %v1330_v27, %v1248_v3  ;;  %v1249_v32 = vadd.f32 %v1184_v24, %v6178_v14  ;;  %v1223_v17 = vpop.f32.mrf.mxu1  ;;  %v6317_v14 = vld [vmem:[%s8329_s0 + $0x40] sm:$0xff] }
 0x24b   :  { %v1381_v62 = vmax.f32 %v8476_v34, %v1357_v59  ;;  %v1250_v5 = vadd.f32 %v1223_v17, %v6180_v58  ;;  %v1413_v58 = vadd.f32 %v6229_v11, %v1397_v40  ;;  %v8489_v27 = vld [vmem:[#allocation34_spill] sm:$0xff] }
 0x24c   :  { %v1382_v28 = vmax.f32 %v8477_v61, %v1358_v19  ;;  %4399 = vmatmul.msk.bf16.vlgmr.msra.gmra.mxu0 %vm146_vm1, %v6308_v39  ;;  %v6346_v19 = vld [vmem:[%s8329_s0 + $0x10] sm:$0xff] }
 0x24d   :  { %4405 = vmatmul.msk.bf16.vlgmr.msra.gmra.mxu1 %vm146_vm1, %v6308_v39  ;;  %4411 = vmatmul.msk.bf16.vlgmr.msra.gmra.mxu2 %vm146_vm1, %v6317_v14  ;;  %v1425_v31 = vmax.f32 %v1413_v58, 0.0 }
 0x24e   :  { %v1398_v20 = vmax.f32 %v1381_v62, %v1382_v28  ;;  %4417 = vmatmul.msk.bf16.vlgmr.msra.gmra.mxu3 %vm146_vm1, %v6317_v14  ;;  %2063 = vmatpush.bf16.msra.mxu2 %v8478_v50 }
 0x24f   :  { %2102 = vmatpush.bf16.msra.mxu3 %v8479_v36  ;;  %1985 = vmatpush.bf16.msra.mxu0 %v8480_v37  ;;  %v8490_v37 = vld [vmem:[#allocation35_spill] sm:$0xff] }
 0x250   :  { %v1414_v46 = vadd.f32 %v6229_v11, %v1398_v20  ;;  %v1294_v45 = vpop.f32.mrf.mxu2  ;;  %2024 = vmatpush.bf16.msra.mxu1 %v8481_v1 }
 0x251   :  { %v1359_v30 = vadd.f32 %v1294_v45, %v1249_v32  ;;  %v1333_v41 = vpop.f32.mrf.mxu3  ;;  %v1186_v15 = vpop.f32.mrf.mxu0 }
 0x252   :  { %v1426_v53 = vmax.f32 %v1414_v46, 0.0  ;;  %v1360_v7 = vadd.f32 %v1333_v41, %v1250_v5  ;;  %v1251_v10 = vadd.f32 %v1186_v15, %v6188_v0  ;;  %v1225_v35 = vpop.f32.mrf.mxu1  ;;  %2064 = vmatpush.bf16.msra.mxu2 %v8482_v25 }
 0x253   :  { %v1383_v51 = vmax.f32 %v8483_v48, %v1359_v30  ;;  %v1252_v55 = vadd.f32 %v1225_v35, %v6190_v43  ;;  %2103 = vmatpush.bf16.msra.mxu3 %v8484_v4  ;;  %1986 = vmatpush.bf16.msra.mxu0 %v8485_v44  ;;  %v8488_v43 = vld [vmem:[#allocation33_spill] sm:$0xff]  ;;  %v8492_v30 = vld [vmem:[#allocation36_spill] sm:$0xff]  ;;  %v8493_v48 = vld [vmem:[#allocation14_spill] sm:$0xff] }
 0x254   :  { %v6335_v13 = vpack.c.bf16 %v1426_v53, %v1425_v31  ;;  %v1384_v33 = vmax.f32 %v8486_v18, %v1360_v7  ;;  %2025 = vmatpush.bf16.msra.mxu1 %v8487_v21  ;;  %v6374_v4 = vld [vmem:[%s8329_s0 + $0x18] sm:$0xff] }
 0x256   :  { %v1399_v2 = vmax.f32 %v1383_v51, %v1384_v33 }
 0x258   :  { %v1296_v22 = vpop.f32.mrf.mxu2 }
 0x259   :  { %v1361_v0 = vadd.f32 %v1296_v22, %v1251_v10  ;;  %v1335_v6 = vpop.f32.mrf.mxu3  ;;  %v1189_v3 = vpop.f32.mrf.mxu0 }
 0x25a   :  { %v1362_v29 = vadd.f32 %v1335_v6, %v1252_v55  ;;  %v1253_v47 = vadd.f32 %v1189_v3, %v6202_v54  ;;  %v1228_v40 = vpop.f32.mrf.mxu1  ;;  %v6355_v54 = vld [vmem:[%s8329_s0 + $0x48] sm:$0xff]  ;;  %v8494_v55 = vld [vmem:[#allocation37_spill] sm:$0xff] }
 0x25b   :  { %v1385_v52 = vmax.f32 %v8488_v43, %v1361_v0  ;;  %v1254_v59 = vadd.f32 %v1228_v40, %v6204_v26  ;;  %v1415_v26 = vadd.f32 %v6229_v11, %v1399_v2 }
 0x25c   :  { %v1386_v24 = vmax.f32 %v8489_v27, %v1362_v29  ;;  %4400 = vmatmul.msk.bf16.gmra.mxu0 %vm146_vm1, %v6346_v19 }
 0x25d   :  { %4406 = vmatmul.msk.bf16.gmra.mxu1 %vm146_vm1, %v6346_v19  ;;  %4412 = vmatmul.msk.bf16.gmra.mxu2 %vm146_vm1, %v6355_v54  ;;  %v1427_v28 = vmax.f32 %v1415_v26, 0.0  ;;  %v6404_v26 = vld [vmem:[%s8329_s0 + $0x20] sm:$0xff] }
 0x25e   :  { %v1400_v32 = vmax.f32 %v1385_v52, %v1386_v24  ;;  %4418 = vmatmul.msk.bf16.gmra.mxu3 %vm146_vm1, %v6355_v54 }
 0x260   :  { %v1416_v17 = vadd.f32 %v6229_v11, %v1400_v32  ;;  %v1299_v34 = vpop.f32.mrf.mxu2  ;;  %v6413_v32 = vld [vmem:[%s8329_s0 + $0x58] sm:$0xff] }
 0x261   :  { %v1363_v62 = vadd.f32 %v1299_v34, %v1253_v47  ;;  %v1338_v5 = vpop.f32.mrf.mxu3  ;;  %v1191_v61 = vpop.f32.mrf.mxu0 }
 0x262   :  { %v1428_v58 = vmax.f32 %v1416_v17, 0.0  ;;  %v1364_v20 = vadd.f32 %v1338_v5, %v1254_v59  ;;  %v1255_v50 = vadd.f32 %v1191_v61, %v6208_v38  ;;  %v1230_v36 = vpop.f32.mrf.mxu1 }
 0x263   :  { %v1387_v46 = vmax.f32 %v8490_v37, %v1363_v62  ;;  %v1256_v45 = vadd.f32 %v1230_v36, %v6210_v23  ;;  %v6383_v23 = vld [vmem:[%s8329_s0 + $0x50] sm:$0xff] }
 0x264   :  { %v6366_v1 = vpack.c.bf16 %v1428_v58, %v1427_v28  ;;  %v1388_v41 = vmax.f32 %v8492_v30, %v1364_v20  ;;  %v6439_v30 = vld [vmem:[%s8329_s0 + $0x60] sm:$0xff] }
 0x266   :  { %8491 = vst [vmem:[#allocation16_spill] sm:$0xff] %v6366_v1  ;;  %v1401_v15 = vmax.f32 %v1387_v46, %v1388_v41  ;;  %v5111_v1 = vld [vmem:[%s8331_s3 + $0xf4] sm:$0xf0] }
 0x268   :  { %v1301_v31 = vpop.f32.mrf.mxu2  ;;  %v1417_v44 = vadd.f32 %v6229_v11, %v1401_v15 }
 0x269   :  { %v1365_v53 = vadd.f32 %v1301_v31, %v1255_v50  ;;  %v1340_v7 = vpop.f32.mrf.mxu3  ;;  %v1440_v10 = vpop.f32.mrf.mxu0 }
 0x26a   :  { %v1366_v35 = vadd.f32 %v1340_v7, %v1256_v45  ;;  %v1479_v25 = vpop.f32.mrf.mxu1  ;;  %v1429_v6 = vmax.f32 %v1417_v44, 0.0  ;;  %v6430_v45 = vld [vmem:[%s8329_s0 + $0x28] sm:$0xff]  ;;  %v6456_v44 = vld [vmem:[%s8329_s0 + $0x30] sm:$0xff] }
 0x26b   :  { %v1389_v51 = vmax.f32 %v8493_v48, %v1365_v53 }
 0x26c   :  { %v1390_v38 = vmax.f32 %v8494_v55, %v1366_v35  ;;  %4401 = vmatmul.msk.bf16.gmra.mxu0 %vm146_vm1, %v6374_v4 }
 0x26d   :  { %4407 = vmatmul.msk.bf16.gmra.mxu1 %vm146_vm1, %v6374_v4  ;;  %4413 = vmatmul.msk.bf16.gmra.mxu2 %vm146_vm1, %v6383_v23 }
 0x26e   :  { %v1402_v18 = vmax.f32 %v1389_v51, %v1390_v38  ;;  %4419 = vmatmul.msk.bf16.gmra.mxu3 %vm146_vm1, %v6383_v23 }
 0x270   :  { %v1418_v33 = vadd.f32 %v6229_v11, %v1402_v18  ;;  %v1518_v21 = vpop.f32.mrf.mxu2 }
 0x271   :  { %v6391_v2 = vadd.f32 %v1518_v21, %v1440_v10  ;;  %v1557_v22 = vpop.f32.mrf.mxu3  ;;  %v1442_v0 = vpop.f32.mrf.mxu0 }
 0x272   :  { %v1430_v3 = vmax.f32 %v1418_v33, 0.0  ;;  %v6393_v29 = vadd.f32 %v1557_v22, %v1479_v25  ;;  %v1481_v47 = vpop.f32.mrf.mxu1 }
 0x274   :  { %v6395_v40 = vpack.c.bf16 %v1430_v3, %v1429_v6 }
 0x276   :  { %8495 = vst [vmem:[#allocation17_spill] sm:$0xff] %v6395_v40 }
 0x278   :  { %v1520_v43 = vpop.f32.mrf.mxu2 }
 0x279   :  { %v6397_v52 = vadd.f32 %v1520_v43, %v1442_v0  ;;  %v1559_v59 = vpop.f32.mrf.mxu3  ;;  %v1445_v27 = vpop.f32.mrf.mxu0 }
 0x27a   :  { %v6399_v24 = vadd.f32 %v1559_v59, %v1481_v47  ;;  %v1484_v11 = vpop.f32.mrf.mxu1 }
 0x27c   :  { %4402 = vmatmul.msk.bf16.gmra.mxu0 %vm146_vm1, %v6404_v26 }
 0x27d   :  { %4408 = vmatmul.msk.bf16.gmra.mxu1 %vm146_vm1, %v6404_v26  ;;  %4414 = vmatmul.msk.bf16.gmra.mxu2 %vm146_vm1, %v6413_v32 }
 0x27e   :  { %4420 = vmatmul.msk.bf16.gmra.mxu3 %vm146_vm1, %v6413_v32 }
 0x280   :  { %v1523_v17 = vpop.f32.mrf.mxu2 }
 0x281   :  { %v6419_v34 = vadd.f32 %v1523_v17, %v1445_v27  ;;  %v1562_v62 = vpop.f32.mrf.mxu3  ;;  %v1447_v5 = vpop.f32.mrf.mxu0  ;;  %v8496_v17 = vld [vmem:[#allocation6_spill] sm:$0xff] }
 0x282   :  { %v6421_v61 = vadd.f32 %v1562_v62, %v1484_v11  ;;  %v1486_v28 = vpop.f32.mrf.mxu1 }
 0x288   :  { %v1525_v58 = vpop.f32.mrf.mxu2 }
 0x289   :  { %v6423_v20 = vadd.f32 %v1525_v58, %v1447_v5  ;;  %v1564_v50 = vpop.f32.mrf.mxu3  ;;  %v1450_v36 = vpop.f32.mrf.mxu0  ;;  %v8497_v5 = vld [vmem:[#allocation7_spill] sm:$0xff] }
 0x28a   :  { %v6425_v37 = vadd.f32 %v1564_v50, %v1486_v28  ;;  %v1489_v46 = vpop.f32.mrf.mxu1 }
 0x28c   :  { %4403 = vmatmul.msk.bf16.gmra.mxu0 %vm146_vm1, %v6430_v45 }
 0x28d   :  { %4409 = vmatmul.msk.bf16.gmra.mxu1 %vm146_vm1, %v6430_v45  ;;  %4415 = vmatmul.msk.bf16.gmra.mxu2 %vm146_vm1, %v6439_v30 }
 0x28e   :  { %4421 = vmatmul.msk.bf16.gmra.mxu3 %vm146_vm1, %v6439_v30 }
 0x290   :  { %v1528_v41 = vpop.f32.mrf.mxu2 }
 0x291   :  { %v6445_v15 = vadd.f32 %v1528_v41, %v1450_v36  ;;  %v1567_v31 = vpop.f32.mrf.mxu3  ;;  %v1452_v53 = vpop.f32.mrf.mxu0 }
 0x292   :  { %v6447_v7 = vadd.f32 %v1567_v31, %v1489_v46  ;;  %v1491_v10 = vpop.f32.mrf.mxu1 }
 0x298   :  { %v1530_v35 = vpop.f32.mrf.mxu2 }
 0x299   :  { %v6449_v25 = vadd.f32 %v1530_v35, %v1452_v53  ;;  %v1569_v48 = vpop.f32.mrf.mxu3  ;;  %v1455_v51 = vpop.f32.mrf.mxu0 }
 0x29a   :  { %v6451_v55 = vadd.f32 %v1569_v48, %v1491_v10  ;;  %v1494_v38 = vpop.f32.mrf.mxu1  ;;  %v6506_v48 = vld [vmem:[%s8329_s0 + $0x80] sm:$0xff] }
 0x29c   :  { %4404 = vmatmul.msk.bf16.gmra.mxu0 %vm146_vm1, %v6456_v44 }
 0x29d   :  { %4410 = vmatmul.msk.bf16.gmra.mxu1 %vm146_vm1, %v6456_v44  ;;  %4416 = vmatmul.msk.bf16.gmra.mxu2 %vm146_vm1, %v6140_v56 }
 0x29e   :  { %4422 = vmatmul.msk.bf16.gmra.mxu3 %vm146_vm1, %v6140_v56  ;;  %v6477_v56 = vld [vmem:[%s8329_s0 + $0x78] sm:$0xff] }
 0x2a0   :  { %v1533_v18 = vpop.f32.mrf.mxu2 }
 0x2a1   :  { %v6466_v33 = vadd.f32 %v1533_v18, %v1455_v51  ;;  %v1572_v21 = vpop.f32.mrf.mxu3  ;;  %v1457_v22 = vpop.f32.mrf.mxu0 }
 0x2a2   :  { %v6468_v0 = vadd.f32 %v1572_v21, %v1494_v38  ;;  %v1496_v6 = vpop.f32.mrf.mxu1 }
 0x2a8   :  { %v1535_v3 = vpop.f32.mrf.mxu2 }
 0x2a9   :  { %v6470_v47 = vadd.f32 %v1535_v3, %v1457_v22  ;;  %v1574_v43 = vpop.f32.mrf.mxu3  ;;  %v1460_v59 = vpop.f32.mrf.mxu0 }
 0x2aa   :  { %v6472_v27 = vadd.f32 %v1574_v43, %v1496_v6  ;;  %v1499_v11 = vpop.f32.mrf.mxu1 }
 0x2ac   :  { %4427 = vmatmul.msk.bf16.vlgmr.msrb.gmra.mxu0 %vm146_vm1, %v6477_v56 }
 0x2ad   :  { %4433 = vmatmul.msk.bf16.vlgmr.msrb.gmra.mxu1 %vm146_vm1, %v6477_v56  ;;  %4439 = vmatmul.msk.bf16.vlgmr.msrb.gmra.mxu2 %vm146_vm1, %v6308_v39 }
 0x2ae   :  { %4445 = vmatmul.msk.bf16.vlgmr.msrb.gmra.mxu3 %vm146_vm1, %v6308_v39  ;;  %2275 = vmatpush.bf16.msrb.mxu2 %v8462_v49  ;;  %v8498_v39 = vld [vmem:[#allocation10_spill] sm:$0xff]  ;;  %v8499_v49 = vld [vmem:[#allocation11_spill] sm:$0xff] }
 0x2af   :  { %2314 = vmatpush.bf16.msrb.mxu3 %v8463_v9  ;;  %2165 = vmatpush.bf16.msrb.mxu0 %v8496_v17 }
 0x2b0   :  { %v1538_v62 = vpop.f32.mrf.mxu2  ;;  %2204 = vmatpush.bf16.msrb.mxu1 %v8497_v5 }
 0x2b1   :  { %v6491_v28 = vadd.f32 %v1538_v62, %v1460_v59  ;;  %v1577_v58 = vpop.f32.mrf.mxu3  ;;  %v1462_v50 = vpop.f32.mrf.mxu0  ;;  %v6529_v62 = vld [vmem:[%s8329_s0 + $0x88] sm:$0xff] }
 0x2b2   :  { %v6493_v36 = vadd.f32 %v1577_v58, %v1499_v11  ;;  %v1501_v46 = vpop.f32.mrf.mxu1  ;;  %2276 = vmatpush.bf16.msrb.mxu2 %v8464_v12 }
 0x2b3   :  { %2315 = vmatpush.bf16.msrb.mxu3 %v8465_v16  ;;  %2166 = vmatpush.bf16.msrb.mxu0 %v8498_v39 }
 0x2b4   :  { %2205 = vmatpush.bf16.msrb.mxu1 %v8499_v49 }
 0x2b8   :  { %v1540_v9 = vpop.f32.mrf.mxu2 }
 0x2b9   :  { %v6499_v41 = vadd.f32 %v1540_v9, %v1462_v50  ;;  %v1579_v31 = vpop.f32.mrf.mxu3  ;;  %v1465_v53 = vpop.f32.mrf.mxu0 }
 0x2ba   :  { %v6501_v10 = vadd.f32 %v1579_v31, %v1501_v46  ;;  %v1504_v35 = vpop.f32.mrf.mxu1 }
 0x2bc   :  { %4428 = vmatmul.msk.bf16.gmra.mxu0 %vm146_vm1, %v6506_v48 }
 0x2bd   :  { %4434 = vmatmul.msk.bf16.gmra.mxu1 %vm146_vm1, %v6506_v48  ;;  %4440 = vmatmul.msk.bf16.gmra.mxu2 %vm146_vm1, %v6346_v19 }
 0x2be   :  { %4446 = vmatmul.msk.bf16.gmra.mxu3 %vm146_vm1, %v6346_v19 }
 0x2c0   :  { %v1543_v12 = vpop.f32.mrf.mxu2 }
 0x2c1   :  { %v6516_v16 = vadd.f32 %v1543_v12, %v1465_v53  ;;  %v1582_v51 = vpop.f32.mrf.mxu3  ;;  %v1467_v38 = vpop.f32.mrf.mxu0 }
 0x2c2   :  { %v6518_v18 = vadd.f32 %v1582_v51, %v1504_v35  ;;  %v1506_v21 = vpop.f32.mrf.mxu1 }
 0x2c8   :  { %v1545_v22 = vpop.f32.mrf.mxu2 }
 0x2c9   :  { %v6520_v6 = vadd.f32 %v1545_v22, %v1467_v38  ;;  %v1584_v3 = vpop.f32.mrf.mxu3  ;;  %v1596_v43 = vpop.f32.mrf.mxu0 }
 0x2ca   :  { %v6522_v59 = vadd.f32 %v1584_v3, %v1506_v21  ;;  %v1665_v11 = vadd.f32 %v1596_v43, %v6391_v2  ;;  %v1635_v17 = vpop.f32.mrf.mxu1  ;;  %v6554_v21 = vld [vmem:[%s8329_s0 + $0x90] sm:$0xff] }
 0x2cb   :  { %v1666_v19 = vadd.f32 %v1635_v17, %v6393_v29 }
 0x2cc   :  { %4429 = vmatmul.msk.bf16.gmra.mxu0 %vm146_vm1, %v6529_v62 }
 0x2cd   :  { %4435 = vmatmul.msk.bf16.gmra.mxu1 %vm146_vm1, %v6529_v62  ;;  %4441 = vmatmul.msk.bf16.gmra.mxu2 %vm146_vm1, %v6374_v4 }
 0x2ce   :  { %4447 = vmatmul.msk.bf16.gmra.mxu3 %vm146_vm1, %v6374_v4 }
 0x2d0   :  { %v1698_v2 = vpop.f32.mrf.mxu2 }
 0x2d1   :  { %v6539_v5 = vadd.f32 %v1698_v2, %v1665_v11  ;;  %v1737_v29 = vpop.f32.mrf.mxu3  ;;  %v1598_v58 = vpop.f32.mrf.mxu0 }
 0x2d2   :  { %v6541_v50 = vadd.f32 %v1737_v29, %v1666_v19  ;;  %v1667_v46 = vadd.f32 %v1598_v58, %v6397_v52  ;;  %v1637_v39 = vpop.f32.mrf.mxu1 }
 0x2d3   :  { %v1668_v49 = vadd.f32 %v1637_v39, %v6399_v24 }
 0x2d8   :  { %v1700_v9 = vpop.f32.mrf.mxu2 }
 0x2d9   :  { %v6545_v31 = vadd.f32 %v1700_v9, %v1667_v46  ;;  %v1739_v53 = vpop.f32.mrf.mxu3  ;;  %v1601_v35 = vpop.f32.mrf.mxu0 }
 0x2da   :  { %v6547_v12 = vadd.f32 %v1739_v53, %v1668_v49  ;;  %v1669_v4 = vadd.f32 %v1601_v35, %v6419_v34  ;;  %v1640_v51 = vpop.f32.mrf.mxu1 }
 0x2db   :  { %v1670_v38 = vadd.f32 %v1640_v51, %v6421_v61 }
 0x2dc   :  { %4430 = vmatmul.msk.bf16.gmra.mxu0 %vm146_vm1, %v6554_v21 }
 0x2dd   :  { %4436 = vmatmul.msk.bf16.gmra.mxu1 %vm146_vm1, %v6554_v21  ;;  %4442 = vmatmul.msk.bf16.gmra.mxu2 %vm146_vm1, %v6404_v26 }
 0x2de   :  { %4448 = vmatmul.msk.bf16.gmra.mxu3 %vm146_vm1, %v6404_v26 }
 0x2e0   :  { %v1703_v52 = vpop.f32.mrf.mxu2 }
 0x2e1   :  { %v6564_v24 = vadd.f32 %v1703_v52, %v1669_v4  ;;  %v1742_v34 = vpop.f32.mrf.mxu3  ;;  %v1603_v61 = vpop.f32.mrf.mxu0 }
 0x2e2   :  { %v6566_v22 = vadd.f32 %v1742_v34, %v1670_v38  ;;  %v1671_v3 = vadd.f32 %v1603_v61, %v6423_v20  ;;  %v1642_v43 = vpop.f32.mrf.mxu1 }
 0x2e3   :  { %v1672_v11 = vadd.f32 %v1642_v43, %v6425_v37 }
 0x2e8   :  { %v1705_v17 = vpop.f32.mrf.mxu2 }
 0x2e9   :  { %v6570_v19 = vadd.f32 %v1705_v17, %v1671_v3  ;;  %v1744_v2 = vpop.f32.mrf.mxu3  ;;  %v1606_v29 = vpop.f32.mrf.mxu0 }
 0x2ea   :  { %v6572_v58 = vadd.f32 %v1744_v2, %v1672_v11  ;;  %v1673_v26 = vadd.f32 %v1606_v29, %v6445_v15  ;;  %v1645_v46 = vpop.f32.mrf.mxu1 }
 0x2eb   :  { %v1674_v39 = vadd.f32 %v1645_v46, %v6447_v7 }
 0x2ec   :  { %4431 = vmatmul.msk.bf16.gmra.mxu0 %vm146_vm1, %v6287_v8 }
 0x2ed   :  { %4437 = vmatmul.msk.bf16.gmra.mxu1 %vm146_vm1, %v6287_v8  ;;  %4443 = vmatmul.msk.bf16.gmra.mxu2 %vm146_vm1, %v6430_v45  ;;  %v6593_v8 = vld [vmem:[%s8329_s0 + $0xa0] sm:$0xff] }
 0x2ee   :  { %4449 = vmatmul.msk.bf16.gmra.mxu3 %vm146_vm1, %v6430_v45 }
 0x2f0   :  { %v1708_v20 = vpop.f32.mrf.mxu2 }
 0x2f1   :  { %v6584_v37 = vadd.f32 %v1708_v20, %v1673_v26  ;;  %v1747_v49 = vpop.f32.mrf.mxu3  ;;  %v1608_v15 = vpop.f32.mrf.mxu0 }
 0x2f2   :  { %v6586_v9 = vadd.f32 %v1747_v49, %v1674_v39  ;;  %v1675_v7 = vadd.f32 %v1608_v15, %v6449_v25  ;;  %v1647_v53 = vpop.f32.mrf.mxu1 }
 0x2f3   :  { %v1676_v35 = vadd.f32 %v1647_v53, %v6451_v55 }
 0x2f8   :  { %v1710_v4 = vpop.f32.mrf.mxu2 }
 0x2f9   :  { %v6595_v51 = vadd.f32 %v1710_v4, %v1675_v7  ;;  %v1749_v45 = vpop.f32.mrf.mxu3  ;;  %v1611_v38 = vpop.f32.mrf.mxu0  ;;  %v5225_v7 = vld [vmem:[%s8329_s0 + $0xa8] sm:$0xff] }
 0x2fa   :  { %v6597_v52 = vadd.f32 %v1749_v45, %v1676_v35  ;;  %v1677_v34 = vadd.f32 %v1611_v38, %v6466_v33  ;;  %v1650_v61 = vpop.f32.mrf.mxu1 }
 0x2fb   :  { %v1678_v25 = vadd.f32 %v1650_v61, %v6468_v0 }
 0x2fc   :  { %4432 = vmatmul.msk.bf16.gmra.mxu0 %vm146_vm1, %v6593_v8 }
 0x2fd   :  { %4438 = vmatmul.msk.bf16.gmra.mxu1 %vm146_vm1, %v6593_v8  ;;  %4444 = vmatmul.msk.bf16.gmra.mxu2 %vm146_vm1, %v6456_v44 }
 0x2fe   :  { %4450 = vmatmul.msk.bf16.gmra.mxu3 %vm146_vm1, %v6456_v44 }
 0x300   :  { %v1713_v55 = vpop.f32.mrf.mxu2 }
 0x301   :  { %v6609_v3 = vadd.f32 %v1713_v55, %v1677_v34  ;;  %v1752_v43 = vpop.f32.mrf.mxu3  ;;  %v1613_v33 = vpop.f32.mrf.mxu0 }
 0x302   :  { %v6611_v11 = vadd.f32 %v1752_v43, %v1678_v25  ;;  %v1679_v0 = vadd.f32 %v1613_v33, %v6470_v47  ;;  %v1652_v17 = vpop.f32.mrf.mxu1 }
 0x303   :  { %v1680_v2 = vadd.f32 %v1652_v17, %v6472_v27 }
 0x308   :  { %v1715_v29 = vpop.f32.mrf.mxu2 }
 0x309   :  { %v6615_v26 = vadd.f32 %v1715_v29, %v1679_v0  ;;  %v1754_v46 = vpop.f32.mrf.mxu3  ;;  %v1616_v39 = vpop.f32.mrf.mxu0  ;;  %v6645_v0 = vld [vmem:[%s8329_s0 + $0xb0] sm:$0xff] }
 0x30a   :  { %v6617_v20 = vadd.f32 %v1754_v46, %v1680_v2  ;;  %v1681_v44 = vadd.f32 %v1616_v39, %v6491_v28  ;;  %v1655_v49 = vpop.f32.mrf.mxu1 }
 0x30b   :  { %v1682_v15 = vadd.f32 %v1655_v49, %v6493_v36 }
 0x30c   :  { %4451 = vmatmul.msk.bf16.vlgmr.msra.gmra.mxu0 %vm146_vm1, %v5225_v7 }
 0x30d   :  { %4457 = vmatmul.msk.bf16.vlgmr.msra.gmra.mxu1 %vm146_vm1, %v5225_v7  ;;  %4463 = vmatmul.msk.bf16.vlgmr.msra.gmra.mxu2 %vm146_vm1, %v6317_v14 }
 0x30e   :  { %4469 = vmatmul.msk.bf16.vlgmr.msra.gmra.mxu3 %vm146_vm1, %v6317_v14 }
 0x310   :  { %v1718_v47 = vpop.f32.mrf.mxu2 }
 0x311   :  { %v6630_v27 = vadd.f32 %v1718_v47, %v1681_v44  ;;  %v1757_v28 = vpop.f32.mrf.mxu3  ;;  %v1618_v53 = vpop.f32.mrf.mxu0 }
 0x312   :  { %v6632_v36 = vadd.f32 %v1757_v28, %v1682_v15  ;;  %v1683_v35 = vadd.f32 %v1618_v53, %v6499_v41  ;;  %v1657_v4 = vpop.f32.mrf.mxu1 }
 0x313   :  { %v1684_v45 = vadd.f32 %v1657_v4, %v6501_v10 }
 0x318   :  { %v1720_v38 = vpop.f32.mrf.mxu2 }
 0x319   :  { %v6636_v34 = vadd.f32 %v1720_v38, %v1683_v35  ;;  %v1759_v61 = vpop.f32.mrf.mxu3  ;;  %v1621_v25 = vpop.f32.mrf.mxu0 }
 0x31a   :  { %v6638_v55 = vadd.f32 %v1759_v61, %v1684_v45  ;;  %v1685_v14 = vadd.f32 %v1621_v25, %v6516_v16  ;;  %v1660_v43 = vpop.f32.mrf.mxu1 }
 0x31b   :  { %v1686_v33 = vadd.f32 %v1660_v43, %v6518_v18 }
 0x31c   :  { %4452 = vmatmul.msk.bf16.gmra.mxu0 %vm146_vm1, %v6645_v0 }
 0x31d   :  { %4458 = vmatmul.msk.bf16.gmra.mxu1 %vm146_vm1, %v6645_v0  ;;  %4464 = vmatmul.msk.bf16.gmra.mxu2 %vm146_vm1, %v6355_v54 }
 0x31e   :  { %4470 = vmatmul.msk.bf16.gmra.mxu3 %vm146_vm1, %v6355_v54 }
 0x320   :  { %v1723_v41 = vpop.f32.mrf.mxu2 }
 0x321   :  { %v6655_v10 = vadd.f32 %v1723_v41, %v1685_v14  ;;  %v1762_v16 = vpop.f32.mrf.mxu3  ;;  %v1623_v18 = vpop.f32.mrf.mxu0 }
 0x322   :  { %v6657_v17 = vadd.f32 %v1762_v16, %v1686_v33  ;;  %v1687_v2 = vadd.f32 %v1623_v18, %v6520_v6  ;;  %v1662_v29 = vpop.f32.mrf.mxu1  ;;  %v6674_v6 = vld [vmem:[%s8329_s0 + $0xb8] sm:$0xff] }
 0x323   :  { %v1688_v46 = vadd.f32 %v1662_v29, %v6522_v59 }
 0x328   :  { %v1725_v39 = vpop.f32.mrf.mxu2 }
 0x329   :  { %v6661_v44 = vadd.f32 %v1725_v39, %v1687_v2  ;;  %v1764_v49 = vpop.f32.mrf.mxu3  ;;  %v1808_v15 = vpop.f32.mrf.mxu0 }
 0x32a   :  { %v6663_v7 = vadd.f32 %v1764_v49, %v1688_v46  ;;  %v6666_v54 = vadd.f32 %v1808_v15, %v6539_v5  ;;  %v1847_v47 = vpop.f32.mrf.mxu1 }
 0x32b   :  { %v6669_v28 = vadd.f32 %v1847_v47, %v6541_v50 }
 0x32c   :  { %4453 = vmatmul.msk.bf16.gmra.mxu0 %vm146_vm1, %v6674_v6 }
 0x32d   :  { %4459 = vmatmul.msk.bf16.gmra.mxu1 %vm146_vm1, %v6674_v6  ;;  %4465 = vmatmul.msk.bf16.gmra.mxu2 %vm146_vm1, %v6383_v23 }
 0x32e   :  { %4471 = vmatmul.msk.bf16.gmra.mxu3 %vm146_vm1, %v6383_v23 }
 0x330   :  { %v6684_v59 = vpop.f32.mrf.mxu2 }
 0x331   :  { %v6686_v5 = vpop.f32.mrf.mxu3  ;;  %v1810_v50 = vpop.f32.mrf.mxu0 }
 0x332   :  { %v6689_v53 = vadd.f32 %v1810_v50, %v6545_v31  ;;  %v1849_v35 = vpop.f32.mrf.mxu1  ;;  %v6707_v31 = vld [vmem:[%s8329_s0 + $0xc0] sm:$0xff] }
 0x333   :  { %v6692_v4 = vadd.f32 %v1849_v35, %v6547_v12 }
 0x338   :  { %v6694_v45 = vpop.f32.mrf.mxu2 }
 0x339   :  { %v6696_v38 = vpop.f32.mrf.mxu3  ;;  %v1813_v61 = vpop.f32.mrf.mxu0 }
 0x33a   :  { %v6699_v25 = vadd.f32 %v1813_v61, %v6564_v24  ;;  %v1852_v23 = vpop.f32.mrf.mxu1 }
 0x33b   :  { %v6702_v14 = vadd.f32 %v1852_v23, %v6566_v22 }
 0x33c   :  { %4454 = vmatmul.msk.bf16.gmra.mxu0 %vm146_vm1, %v6707_v31 }
 0x33d   :  { %4460 = vmatmul.msk.bf16.gmra.mxu1 %vm146_vm1, %v6707_v31  ;;  %4466 = vmatmul.msk.bf16.gmra.mxu2 %vm146_vm1, %v6413_v32 }
 0x33e   :  { %4472 = vmatmul.msk.bf16.gmra.mxu3 %vm146_vm1, %v6413_v32 }
 0x340   :  { %v6717_v12 = vpop.f32.mrf.mxu2 }
 0x341   :  { %v6719_v24 = vpop.f32.mrf.mxu3  ;;  %v1815_v22 = vpop.f32.mrf.mxu0 }
 0x342   :  { %v6722_v43 = vadd.f32 %v1815_v22, %v6570_v19  ;;  %v1854_v33 = vpop.f32.mrf.mxu1  ;;  %v6740_v19 = vld [vmem:[%s8329_s0 + $0xc8] sm:$0xff] }
 0x343   :  { %v6725_v41 = vadd.f32 %v1854_v33, %v6572_v58 }
 0x348   :  { %v6727_v16 = vpop.f32.mrf.mxu2 }
 0x349   :  { %v6729_v18 = vpop.f32.mrf.mxu3  ;;  %v1818_v2 = vpop.f32.mrf.mxu0 }
 0x34a   :  { %v6732_v29 = vadd.f32 %v1818_v2, %v6584_v37  ;;  %v1857_v32 = vpop.f32.mrf.mxu1 }
 0x34b   :  { %v6735_v46 = vadd.f32 %v1857_v32, %v6586_v9 }
 0x34c   :  { %4455 = vmatmul.msk.bf16.gmra.mxu0 %vm146_vm1, %v6740_v19 }
 0x34d   :  { %8500 = vst [vmem:[#allocation21_spill] sm:$0xff] %v6735_v46  ;;  %4461 = vmatmul.msk.bf16.gmra.mxu1 %vm146_vm1, %v6740_v19  ;;  %4467 = vmatmul.msk.bf16.gmra.mxu2 %vm146_vm1, %v6439_v30 }
 0x34e   :  { %4473 = vmatmul.msk.bf16.gmra.mxu3 %vm146_vm1, %v6439_v30 }
 0x350   :  { %v6750_v58 = vpop.f32.mrf.mxu2 }
 0x351   :  { %v6752_v37 = vpop.f32.mrf.mxu3  ;;  %v1820_v9 = vpop.f32.mrf.mxu0 }
 0x352   :  { %v6755_v39 = vadd.f32 %v1820_v9, %v6595_v51  ;;  %v1859_v49 = vpop.f32.mrf.mxu1  ;;  %v5230_v51 = vld [vmem:[%s8329_s0 + $0x68] sm:$0xff] }
 0x353   :  { %v6758_v15 = vadd.f32 %v1859_v49, %v6597_v52 }
 0x354   :  { %8501 = vst [vmem:[#allocation22_spill] sm:$0xff] %v6755_v39 }
 0x355   :  { %8502 = vst [vmem:[#allocation20_spill] sm:$0xff] %v6758_v15 }
 0x358   :  { %v6760_v47 = vpop.f32.mrf.mxu2 }
 0x359   :  { %v6762_v50 = vpop.f32.mrf.mxu3  ;;  %v1823_v35 = vpop.f32.mrf.mxu0 }
 0x35a   :  { %v6765_v61 = vadd.f32 %v1823_v35, %v6609_v3  ;;  %v1862_v30 = vpop.f32.mrf.mxu1 }
 0x35b   :  { %v6768_v23 = vadd.f32 %v1862_v30, %v6611_v11 }
 0x35c   :  { %8503 = vst [vmem:[#allocation23_spill] sm:$0xff] %v6765_v61  ;;  %4456 = vmatmul.msk.bf16.gmra.mxu0 %vm146_vm1, %v6278_v42 }
 0x35d   :  { %8504 = vst [vmem:[#allocation24_spill] sm:$0xff] %v6768_v23  ;;  %4462 = vmatmul.msk.bf16.gmra.mxu1 %vm146_vm1, %v6278_v42  ;;  %4468 = vmatmul.msk.bf16.gmra.mxu2 %vm146_vm1, %v5230_v51  ;;  %v5231_v23 = vld [vmem:[%s8329_s0 + $0x98] sm:$0xff] }
 0x35e   :  { %4474 = vmatmul.msk.bf16.gmra.mxu3 %vm146_vm1, %v5230_v51 }
 0x360   :  { %v6779_v52 = vpop.f32.mrf.mxu2 }
 0x361   :  { %v6781_v3 = vpop.f32.mrf.mxu3  ;;  %v1825_v11 = vpop.f32.mrf.mxu0 }
 0x362   :  { %v6784_v22 = vadd.f32 %v1825_v11, %v6615_v26  ;;  %v1864_v33 = vpop.f32.mrf.mxu1 }
 0x363   :  { %v6787_v2 = vadd.f32 %v1864_v33, %v6617_v20 }
 0x364   :  { %8505 = vst [vmem:[#allocation25_spill] sm:$0xff] %v6784_v22 }
 0x365   :  { %8506 = vst [vmem:[#allocation26_spill] sm:$0xff] %v6787_v2  ;;  %v5104_v2 = vld [vmem:[%s8331_s3 + $0xc4] sm:$0xf] }
 0x368   :  { %v6789_v42 = vpop.f32.mrf.mxu2 }
 0x369   :  { %8507 = vst [vmem:[#allocation27_spill] sm:$0xff] %v6789_v42  ;;  %v6791_v32 = vpop.f32.mrf.mxu3  ;;  %v1828_v9 = vpop.f32.mrf.mxu0 }
 0x36a   :  { %8508 = vst [vmem:[#allocation28_spill] sm:$0xff] %v6791_v32  ;;  %v6794_v49 = vadd.f32 %v1828_v9, %v6630_v27  ;;  %v1867_v35 = vpop.f32.mrf.mxu1 }
 0x36b   :  { %v6797_v30 = vadd.f32 %v1867_v35, %v6632_v36 }
 0x36c   :  { %8509 = vst [vmem:[#allocation29_spill] sm:$0xff] %v6794_v49  ;;  %4475 = vmatmul.msk.bf16.vlgmr.msrb.gmra.mxu0 %vm146_vm1, %v6477_v56 }
 0x36d   :  { %8510 = vst [vmem:[#allocation18_spill] sm:$0xff] %v6797_v30  ;;  %4481 = vmatmul.msk.bf16.vlgmr.msrb.gmra.mxu1 %vm146_vm1, %v6477_v56  ;;  %4491 = vmatmul.msk.bf16.vlgmr.msrb.gmra.mxu2 %vm146_vm1, %v6645_v0 }
 0x36e   :  { %4497 = vmatmul.msk.bf16.vlgmr.msrb.gmra.mxu3 %vm146_vm1, %v6645_v0 }
 0x370   :  { %v6807_v26 = vpop.f32.mrf.mxu2 }
 0x371   :  { %v6809_v20 = vpop.f32.mrf.mxu3  ;;  %v1830_v27 = vpop.f32.mrf.mxu0 }
 0x372   :  { %v6812_v36 = vadd.f32 %v1830_v27, %v6636_v34  ;;  %v1869_v51 = vpop.f32.mrf.mxu1 }
 0x373   :  { %v6815_v11 = vadd.f32 %v1869_v51, %v6638_v55  ;;  %v4641_v51 = vld [vmem:[%s8331_s3 + $0x70] sm:$0xf] }
 0x374   :  { %8511 = vst [vmem:[#allocation30_spill] sm:$0xff] %v6812_v36 }
 0x375   :  { %8512 = vst [vmem:[#allocation8_spill] sm:$0xff] %v6815_v11 }
 0x378   :  { %v6817_v33 = vpop.f32.mrf.mxu2 }
 0x379   :  { %8513 = vst [vmem:[#allocation9_spill] sm:$0xff] %v6817_v33  ;;  %v6819_v56 = vpop.f32.mrf.mxu3  ;;  %v1833_v9 = vpop.f32.mrf.mxu0 }
 0x37a   :  { %8514 = vst [vmem:[#allocation2_spill] sm:$0xff] %v6819_v56  ;;  %v6822_v35 = vadd.f32 %v1833_v9, %v6655_v10  ;;  %v1872_v0 = vpop.f32.mrf.mxu1 }
 0x37b   :  { %v6825_v40 = vadd.f32 %v1872_v0, %v6657_v17 }
 0x37c   :  { %8515 = vst [vmem:[#allocation3_spill] sm:$0xff] %v6822_v35  ;;  %4476 = vmatmul.msk.bf16.gmra.mxu0 %vm146_vm1, %v6506_v48 }
 0x37d   :  { %8516 = vst [vmem:[#allocation12_spill] sm:$0xff] %v6825_v40  ;;  %4482 = vmatmul.msk.bf16.gmra.mxu1 %vm146_vm1, %v6506_v48  ;;  %4492 = vmatmul.msk.bf16.gmra.mxu2 %vm146_vm1, %v6674_v6  ;;  %v5095_v48 = vld [vmem:[%s8331_s3 + $0x74] sm:$0xf0] }
 0x37e   :  { %4498 = vmatmul.msk.bf16.gmra.mxu3 %vm146_vm1, %v6674_v6  ;;  %v5094_v6 = vld [vmem:[%s8331_s3 + $0x74] sm:$0xf]  ;;  %v6854_v0 = vor.u32 %v5095_v48, %v4641_v51 }
 0x380   :  { %v6835_v34 = vpop.f32.mrf.mxu2  ;;  %8519 = vst [vmem:[#allocation4_spill] sm:$0xff] %v6854_v0  ;;  %2690 = vmatpush.bf16.msra.mxu2 %v6854_v0 }
 0x381   :  { %v6837_v55 = vpop.f32.mrf.mxu3  ;;  %v1835_v10 = vpop.f32.mrf.mxu0 }
 0x382   :  { %v6840_v17 = vadd.f32 %v1835_v10, %v6661_v44  ;;  %v1874_v27 = vpop.f32.mrf.mxu1  ;;  %v4643_v44 = vld [vmem:[%s8331_s3 + $0x78] sm:$0xf0]  ;;  %v4577_v10 = vld [vmem:[%s8331_s3 + $0xf0] sm:$0xf] }
 0x383   :  { %v6852_v9 = vadd.f32 %v1874_v27, %v6663_v7  ;;  %v6867_v40 = vor.u32 %v5111_v1, %v4577_v10  ;;  %v5110_v7 = vld [vmem:[%s8331_s3 + $0xf4] sm:$0xf]  ;;  %v4579_v27 = vld [vmem:[%s8331_s3 + $0xf8] sm:$0xf0]  ;;  %v4633_v10 = vld [vmem:[%s8331_s3 + $0x60] sm:$0xf] }
 0x384   :  { %8517 = vst [vmem:[#allocation31_spill] sm:$0xff] %v6840_v17  ;;  %v6865_v17 = vor.u32 %v5094_v6, %v4643_v44  ;;  %v6876_v51 = vor.u32 %v5110_v7, %v4579_v27  ;;  %v5093_v7 = vld [vmem:[%s8331_s3 + $0x64] sm:$0xf0]  ;;  %v5092_v27 = vld [vmem:[%s8331_s3 + $0x64] sm:$0xf] }
 0x385   :  { %8518 = vst [vmem:[#allocation13_spill] sm:$0xff] %v6852_v9  ;;  %2552 = vmatpush.bf16.msra.mxu0 %v6867_v40 }
 0x386   :  { %8520 = vst [vmem:[#allocation32_spill] sm:$0xff] %v6865_v17  ;;  %2719 = vmatpush.bf16.msra.mxu3 %v6865_v17  ;;  %2581 = vmatpush.bf16.msra.mxu1 %v6876_v51  ;;  %v6903_v17 = vor.u32 %v5093_v7, %v4633_v10  ;;  %v5091_v10 = vld [vmem:[%s8331_s3 + $0x54] sm:$0xf0] }
 0x388   :  { %v6881_v1 = vpop.f32.mrf.mxu2  ;;  %8523 = vst [vmem:[#allocation34_spill] sm:$0xff] %v6903_v17  ;;  %2691 = vmatpush.bf16.msra.mxu2 %v6903_v17  ;;  %v4609_v17 = vld [vmem:[%s8331_s3 + $0x30] sm:$0xf] }
 0x389   :  { %8521 = vst [vmem:[#allocation5_spill] sm:$0xff] %v6881_v1  ;;  %v6883_v48 = vpop.f32.mrf.mxu3  ;;  %v1988_v6 = vpop.f32.mrf.mxu0 }
 0x38a   :  { %8522 = vst [vmem:[#allocation33_spill] sm:$0xff] %v6883_v48  ;;  %v2027_v44 = vpop.f32.mrf.mxu1 }
 0x38b   :  { %v2028_v0 = vadd.f32 %v2027_v44, %v6686_v5  ;;  %v4569_v5 = vld [vmem:[%s8331_s3 + $0xe0] sm:$0xf] }
 0x38c   :  { %4477 = vmatmul.msk.bf16.gmra.mxu0 %vm146_vm1, %v6529_v62 }
 0x38d   :  { %4483 = vmatmul.msk.bf16.gmra.mxu1 %vm146_vm1, %v6529_v62  ;;  %4493 = vmatmul.msk.bf16.gmra.mxu2 %vm146_vm1, %v6707_v31  ;;  %v1989_v62 = vadd.f32 %v1988_v6, %v6684_v59  ;;  %v5108_v6 = vld [vmem:[%s8331_s3 + $0xe4] sm:$0xf] }
 0x38e   :  { %4499 = vmatmul.msk.bf16.gmra.mxu3 %vm146_vm1, %v6707_v31  ;;  %v4635_v31 = vld [vmem:[%s8331_s3 + $0x68] sm:$0xf0] }
 0x38f   :  { %v6909_v48 = vor.u32 %v5092_v27, %v4635_v31  ;;  %v4627_v31 = vld [vmem:[%s8331_s3 + $0x58] sm:$0xf0] }
 0x390   :  { %v2066_v9 = vpop.f32.mrf.mxu2 }
 0x391   :  { %8524 = vst [vmem:[#allocation35_spill] sm:$0xff] %v6909_v48  ;;  %v6911_v35 = vadd.f32 %v2066_v9, %v1989_v62  ;;  %v2105_v1 = vpop.f32.mrf.mxu3  ;;  %v6913_v11 = vpop.f32.mrf.mxu0  ;;  %2720 = vmatpush.bf16.msra.mxu3 %v6909_v48  ;;  %v5109_v9 = vld [vmem:[%s8331_s3 + $0xe4] sm:$0xf0]  ;;  %v5090_v62 = vld [vmem:[%s8331_s3 + $0x54] sm:$0xf] }
 0x392   :  { %v6916_v36 = vadd.f32 %v2105_v1, %v2028_v0  ;;  %v6918_v59 = vpop.f32.mrf.mxu1  ;;  %v6930_v44 = vor.u32 %v5109_v9, %v4569_v5  ;;  %v4571_v0 = vld [vmem:[%s8331_s3 + $0xe8] sm:$0xf0]  ;;  %v4625_v1 = vld [vmem:[%s8331_s3 + $0x50] sm:$0xf]  ;;  %v6952_v5 = vor.u32 %v5090_v62, %v4627_v31 }
 0x393   :  { %v6941_v7 = vor.u32 %v5108_v6, %v4571_v0  ;;  %v6943_v27 = vor.u32 %v5091_v10, %v4625_v1  ;;  %v4617_v6 = vld [vmem:[%s8331_s3 + $0x40] sm:$0xf]  ;;  %v5089_v0 = vld [vmem:[%s8331_s3 + $0x44] sm:$0xf0]  ;;  %v5088_v1 = vld [vmem:[%s8331_s3 + $0x44] sm:$0xf] }
 0x394   :  { %2553 = vmatpush.bf16.msra.mxu0 %v6930_v44  ;;  %8526 = vst [vmem:[#allocation14_spill] sm:$0xff] %v6952_v5  ;;  %v6970_v31 = vor.u32 %v5089_v0, %v4617_v6  ;;  %v5087_v6 = vld [vmem:[%s8331_s3 + $0x34] sm:$0xf0]  ;;  %v5086_v0 = vld [vmem:[%s8331_s3 + $0x34] sm:$0xf] }
 0x395   :  { %8525 = vst [vmem:[#allocation36_spill] sm:$0xff] %v6943_v27  ;;  %2582 = vmatpush.bf16.msra.mxu1 %v6941_v7  ;;  %2692 = vmatpush.bf16.msra.mxu2 %v6943_v27 }
 0x396   :  { %2721 = vmatpush.bf16.msra.mxu3 %v6952_v5  ;;  %8527 = vst [vmem:[#allocation37_spill] sm:$0xff] %v6970_v31  ;;  %v4619_v5 = vld [vmem:[%s8331_s3 + $0x48] sm:$0xf0] }
 0x397   :  { %v6975_v48 = vor.u32 %v5088_v1, %v4619_v5  ;;  %v6991_v5 = vor.u32 %v5087_v6, %v4609_v17  ;;  %v4611_v1 = vld [vmem:[%s8331_s3 + $0x38] sm:$0xf0]  ;;  %v5107_v17 = vld [vmem:[%s8331_s3 + $0xd4] sm:$0xf0]  ;;  %v5106_v6 = vld [vmem:[%s8331_s3 + $0xd4] sm:$0xf] }
 0x398   :  { %v6957_v9 = vpop.f32.mrf.mxu2 }
 0x399   :  { %v6968_v10 = vpop.f32.mrf.mxu3  ;;  %v1993_v62 = vpop.f32.mrf.mxu0  ;;  %8528 = vst [vmem:[#allocation6_spill] sm:$0xff] %v6975_v48  ;;  %2693 = vmatpush.bf16.msra.mxu2 %v6970_v31 }
 0x39a   :  { %v2032_v27 = vpop.f32.mrf.mxu1  ;;  %2722 = vmatpush.bf16.msra.mxu3 %v6975_v48  ;;  %8529 = vst [vmem:[#allocation7_spill] sm:$0xff] %v6991_v5  ;;  %v7010_v48 = vor.u32 %v5086_v0, %v4611_v1  ;;  %v1994_v31 = vadd.f32 %v1993_v62, %v6717_v12  ;;  %v4601_v0 = vld [vmem:[%s8331_s3 + $0x20] sm:$0xf]  ;;  %v5085_v12 = vld [vmem:[%s8331_s3 + $0x24] sm:$0xf0] }
 0x39b   :  { %v2033_v56 = vadd.f32 %v2032_v27, %v6719_v24  ;;  %v5084_v62 = vld [vmem:[%s8331_s3 + $0x24] sm:$0xf] }
 0x39c   :  { %4478 = vmatmul.msk.bf16.gmra.mxu0 %vm146_vm1, %v6554_v21  ;;  %8530 = vst [vmem:[#allocation10_spill] sm:$0xff] %v7010_v48 }
 0x39d   :  { %4484 = vmatmul.msk.bf16.gmra.mxu1 %vm146_vm1, %v6554_v21  ;;  %4494 = vmatmul.msk.bf16.gmra.mxu2 %vm146_vm1, %v6740_v19  ;;  %v4561_v21 = vld [vmem:[%s8331_s3 + $0xd0] sm:$0xf] }
 0x39e   :  { %4500 = vmatmul.msk.bf16.gmra.mxu3 %vm146_vm1, %v6740_v19  ;;  %v7013_v30 = vor.u32 %v5107_v17, %v4561_v21  ;;  %v4563_v19 = vld [vmem:[%s8331_s3 + $0xd8] sm:$0xf0]  ;;  %2694 = vmatpush.bf16.msra.mxu2 %v6991_v5  ;;  %v7037_v21 = vor.u32 %v5085_v12, %v4601_v0  ;;  %v4603_v17 = vld [vmem:[%s8331_s3 + $0x28] sm:$0xf0]  ;;  %v5105_v5 = vld [vmem:[%s8331_s3 + $0xc4] sm:$0xf0] }
 0x39f   :  { %v7020_v33 = vor.u32 %v5106_v6, %v4563_v19  ;;  %2723 = vmatpush.bf16.msra.mxu3 %v7010_v48  ;;  %v7047_v48 = vor.u32 %v5084_v62, %v4603_v17  ;;  %v4595_v12 = vld [vmem:[%s8331_s3 + $0x18] sm:$0xf0]  ;;  %v4585_v17 = vld [vmem:[%s8331_s3] sm:$0xf] }
 0x3a0   :  { %v2071_v49 = vpop.f32.mrf.mxu2  ;;  %2554 = vmatpush.bf16.msra.mxu0 %v7013_v30  ;;  %8531 = vst [vmem:[#allocation11_spill] sm:$0xff] %v7037_v21 }
 0x3a1   :  { %v7032_v1 = vadd.f32 %v2071_v49, %v1994_v31  ;;  %v2110_v24 = vpop.f32.mrf.mxu3  ;;  %v7034_v27 = vpop.f32.mrf.mxu0  ;;  %2583 = vmatpush.bf16.msra.mxu1 %v7020_v33  ;;  %8532 = vst [vmem:[#allocation38_spill] sm:$0xff] %v7047_v48  ;;  %v4593_v49 = vld [vmem:[%s8331_s3 + $0x10] sm:$0xf]  ;;  %v5083_v31 = vld [vmem:[%s8331_s3 + $0x14] sm:$0xf0] }
 0x3a2   :  { %v7042_v6 = vadd.f32 %v2110_v24, %v2033_v56  ;;  %v7044_v19 = vpop.f32.mrf.mxu1  ;;  %2695 = vmatpush.bf16.msra.mxu2 %v7037_v21  ;;  %v5082_v56 = vld [vmem:[%s8331_s3 + $0x14] sm:$0xf]  ;;  %v7060_v0 = vor.u32 %v5083_v31, %v4593_v49  ;;  %v5081_v49 = vld [vmem:[%s8331_s3 + $0x4] sm:$0xf0]  ;;  %v5080_v31 = vld [vmem:[%s8331_s3 + $0x4] sm:$0xf] }
 0x3a3   :  { %2724 = vmatpush.bf16.msra.mxu3 %v7047_v48  ;;  %v7065_v62 = vor.u32 %v5082_v56, %v4595_v12  ;;  %v4553_v21 = vld [vmem:[%s8331_s3 + $0xc0] sm:$0xf] }
 0x3a4   :  { %8533 = vst [vmem:[#allocation39_spill] sm:$0xff] %v7060_v0 }
 0x3a5   :  { %8534 = vst [vmem:[#allocation40_spill] sm:$0xff] %v7065_v62 }
 0x3a6   :  { %2696 = vmatpush.bf16.msra.mxu2 %v7060_v0  ;;  %v7082_v0 = vor.u32 %v5081_v49, %v4585_v17  ;;  %v7098_v17 = vor.u32 %v5105_v5, %v4553_v21  ;;  %v4555_v49 = vld [vmem:[%s8331_s3 + $0xc8] sm:$0xf0]  ;;  %v5232_v5 = vld [vmem:[%s8329_s0 + $0xd0] sm:$0xff] }
 0x3a7   :  { %2725 = vmatpush.bf16.msra.mxu3 %v7065_v62  ;;  %v4587_v62 = vld [vmem:[%s8331_s3 + $0x8] sm:$0xf0]  ;;  %v7108_v32 = vor.u32 %v5104_v2, %v4555_v49 }
 0x3a8   :  { %v7068_v24 = vpop.f32.mrf.mxu2  ;;  %8535 = vst [vmem:[#allocation41_spill] sm:$0xff] %v7082_v0  ;;  %v7096_v22 = vor.u32 %v5080_v31, %v4587_v62  ;;  %2555 = vmatpush.bf16.msra.mxu0 %v7098_v17 }
 0x3a9   :  { %v7080_v56 = vpop.f32.mrf.mxu3  ;;  %v1998_v12 = vpop.f32.mrf.mxu0  ;;  %2584 = vmatpush.bf16.msra.mxu1 %v7108_v32 }
 0x3aa   :  { %v2037_v48 = vpop.f32.mrf.mxu1  ;;  %8536 = vst [vmem:[#allocation42_spill] sm:$0xff] %v7096_v22  ;;  %2697 = vmatpush.bf16.msra.mxu2 %v7082_v0  ;;  %v1999_v21 = vadd.f32 %v1998_v12, %v6750_v58  ;;  %v5103_v58 = vld [vmem:[%s8331_s3 + $0xb4] sm:$0xf0]  ;;  %v4547_v12 = vld [vmem:[%s8331_s3 + $0xb8] sm:$0xf0] }
 0x3ab   :  { %2726 = vmatpush.bf16.msra.mxu3 %v7096_v22  ;;  %v2038_v2 = vadd.f32 %v2037_v48, %v6752_v37  ;;  %v5102_v37 = vld [vmem:[%s8331_s3 + $0xb4] sm:$0xf] }
 0x3ac   :  { %4479 = vmatmul.msk.bf16.gmra.mxu0 %vm146_vm1, %v5231_v23 }
 0x3ad   :  { %4485 = vmatmul.msk.bf16.gmra.mxu1 %vm146_vm1, %v5231_v23  ;;  %4495 = vmatmul.msk.bf16.gmra.mxu2 %vm146_vm1, %v5232_v5 }
 0x3ae   :  { %4501 = vmatmul.msk.bf16.gmra.mxu3 %vm146_vm1, %v5232_v5  ;;  %v4545_v5 = vld [vmem:[%s8331_s3 + $0xb0] sm:$0xf] }
 0x3af   :  { %v7138_v48 = vor.u32 %v5103_v58, %v4545_v5  ;;  %v5059_v5 = vld [vmem:[%s8329_s0 + $0xd8] sm:$0xff] }
 0x3b0   :  { %v2076_v62 = vpop.f32.mrf.mxu2 }
 0x3b1   :  { %v7121_v31 = vadd.f32 %v2076_v62, %v1999_v21  ;;  %v2115_v23 = vpop.f32.mrf.mxu3  ;;  %v7123_v49 = vpop.f32.mrf.mxu0  ;;  %v7143_v21 = vor.u32 %v5102_v37, %v4547_v12  ;;  %2556 = vmatpush.bf16.msra.mxu0 %v7138_v48 }
 0x3b2   :  { %v7125_v22 = vadd.f32 %v2115_v23, %v2038_v2  ;;  %v7127_v0 = vpop.f32.mrf.mxu1 }
 0x3b3   :  { %2585 = vmatpush.bf16.msra.mxu1 %v7143_v21 }
 0x3b8   :  { %v7147_v2 = vpop.f32.mrf.mxu2 }
 0x3b9   :  { %8537 = vst [vmem:[#allocation43_spill] sm:$0xff] %v7147_v2  ;;  %v7149_v62 = vpop.f32.mrf.mxu3  ;;  %v2003_v23 = vpop.f32.mrf.mxu0 }
 0x3ba   :  { %8538 = vst [vmem:[#allocation44_spill] sm:$0xff] %v7149_v62  ;;  %v2042_v58 = vpop.f32.mrf.mxu1  ;;  %v2004_v37 = vadd.f32 %v2003_v23, %v6779_v52  ;;  %v5101_v52 = vld [vmem:[%s8331_s3 + $0xa4] sm:$0xf0] }
 0x3bb   :  { %v2043_v12 = vadd.f32 %v2042_v58, %v6781_v3 }
 0x3bc   :  { %4480 = vmatmul.msk.bf16.gmra.mxu0 %vm146_vm1, %v6593_v8 }
 0x3bd   :  { %4486 = vmatmul.msk.bf16.gmra.mxu1 %vm146_vm1, %v6593_v8  ;;  %4496 = vmatmul.msk.bf16.gmra.mxu2 %vm146_vm1, %v5059_v5  ;;  %v4537_v8 = vld [vmem:[%s8331_s3 + $0xa0] sm:$0xf] }
 0x3be   :  { %4502 = vmatmul.msk.bf16.gmra.mxu3 %vm146_vm1, %v5059_v5  ;;  %v7179_v3 = vor.u32 %v5101_v52, %v4537_v8  ;;  %v4529_v8 = vld [vmem:[%s8331_s3 + $0x90] sm:$0xf]  ;;  %v5099_v52 = vld [vmem:[%s8331_s3 + $0x94] sm:$0xf0] }
 0x3c0   :  { %v2081_v61 = vpop.f32.mrf.mxu2  ;;  %2557 = vmatpush.bf16.msra.mxu0 %v7179_v3 }
 0x3c1   :  { %v7162_v42 = vadd.f32 %v2081_v61, %v2004_v37  ;;  %v2120_v15 = vpop.f32.mrf.mxu3  ;;  %v7164_v39 = vpop.f32.mrf.mxu0  ;;  %v5100_v61 = vld [vmem:[%s8331_s3 + $0xa4] sm:$0xf] }
 0x3c2   :  { %8540 = vst [vmem:[#allocation46_spill] sm:$0xff] %v7164_v39  ;;  %v7166_v62 = vadd.f32 %v2120_v15, %v2043_v12  ;;  %v7168_v2 = vpop.f32.mrf.mxu1  ;;  %v4539_v15 = vld [vmem:[%s8331_s3 + $0xa8] sm:$0xf0] }
 0x3c3   :  { %8539 = vst [vmem:[#allocation45_spill] sm:$0xff] %v7162_v42  ;;  %v7184_v23 = vor.u32 %v5100_v61, %v4539_v15  ;;  %v5098_v61 = vld [vmem:[%s8331_s3 + $0x94] sm:$0xf]  ;;  %v7201_v15 = vor.u32 %v5099_v52, %v4529_v8 }
 0x3c4   :  { %8541 = vst [vmem:[#allocation47_spill] sm:$0xff] %v7166_v62 }
 0x3c5   :  { %8542 = vst [vmem:[#allocation48_spill] sm:$0xff] %v7168_v2  ;;  %2586 = vmatpush.bf16.msra.mxu1 %v7184_v23  ;;  %2558 = vmatpush.bf16.msra.mxu0 %v7201_v15 }
 0x3c8   :  { %v7188_v5 = vpop.f32.mrf.mxu2 }
 0x3c9   :  { %8543 = vst [vmem:[#allocation49_spill] sm:$0xff] %v7188_v5  ;;  %v7190_v58 = vpop.f32.mrf.mxu3  ;;  %v2008_v37 = vpop.f32.mrf.mxu0 }
 0x3ca   :  { %8544 = vst [vmem:[#allocation50_spill] sm:$0xff] %v7190_v58  ;;  %v2047_v12 = vpop.f32.mrf.mxu1  ;;  %v4531_v58 = vld [vmem:[%s8331_s3 + $0x98] sm:$0xf0]  ;;  %v2009_v2 = vadd.f32 %v2008_v37, %v6807_v26  ;;  %v5143_v26 = vld [vmem:[%s8331_s3 + $0x1f4] sm:$0xf0] }
 0x3cb   :  { %v7207_v5 = vor.u32 %v5098_v61, %v4531_v58  ;;  %v2048_v39 = vadd.f32 %v2047_v12, %v6809_v20  ;;  %v5142_v20 = vld [vmem:[%s8331_s3 + $0x1f4] sm:$0xf]  ;;  %v4793_v12 = vld [vmem:[%s8331_s3 + $0x1e0] sm:$0xf]  ;;  %v5141_v61 = vld [vmem:[%s8331_s3 + $0x1e4] sm:$0xf0] }
 0x3cd   :  { %2698 = vmatmul.bf16.vlgmr.msra.gmra.mxu2 %v6248_v60  ;;  %2587 = vmatpush.bf16.msra.mxu1 %v7207_v5 }
 0x3ce   :  { %2727 = vmatmul.bf16.vlgmr.msra.gmra.mxu3 %v6248_v60  ;;  %v4801_v60 = vld [vmem:[%s8331_s3 + $0x1f0] sm:$0xf] }
 0x3d0   :  { %v2086_v8 = vpop.f32.mrf.mxu2 }
 0x3d1   :  { %v7214_v52 = vadd.f32 %v2086_v8, %v2009_v2  ;;  %v2125_v62 = vpop.f32.mrf.mxu3  ;;  %v7216_v42 = vpop.f32.mrf.mxu0  ;;  %v7231_v2 = vor.u32 %v5143_v26, %v4801_v60  ;;  %v5140_v8 = vld [vmem:[%s8331_s3 + $0x1e4] sm:$0xf] }
 0x3d2   :  { %8546 = vst [vmem:[#allocation52_spill] sm:$0xff] %v7216_v42  ;;  %v7218_v46 = vadd.f32 %v2125_v62, %v2048_v39  ;;  %v7220_v58 = vpop.f32.mrf.mxu1  ;;  %v4803_v39 = vld [vmem:[%s8331_s3 + $0x1f8] sm:$0xf0]  ;;  %v4753_v42 = vld [vmem:[%s8331_s3 + $0x190] sm:$0xf] }
 0x3d3   :  { %8545 = vst [vmem:[#allocation51_spill] sm:$0xff] %v7214_v52  ;;  %v7236_v62 = vor.u32 %v5142_v20, %v4803_v39  ;;  %3018 = vmatpush.bf16.msrb.mxu2 %v7231_v2  ;;  %v7253_v20 = vor.u32 %v5141_v61, %v4793_v12  ;;  %v4795_v39 = vld [vmem:[%s8331_s3 + $0x1e8] sm:$0xf0]  ;;  %v5139_v12 = vld [vmem:[%s8331_s3 + $0x1d4] sm:$0xf0] }
 0x3d4   :  { %8547 = vst [vmem:[#allocation53_spill] sm:$0xff] %v7218_v46  ;;  %v5138_v61 = vld [vmem:[%s8331_s3 + $0x1d4] sm:$0xf]  ;;  %v5131_v46 = vld [vmem:[%s8331_s3 + $0x194] sm:$0xf0] }
 0x3d5   :  { %8548 = vst [vmem:[#allocation54_spill] sm:$0xff] %v7220_v58  ;;  %3047 = vmatpush.bf16.msrb.mxu3 %v7236_v62 }
 0x3d6   :  { %8549 = vst [vmem:[#allocation55_spill] sm:$0xff] %v7231_v2  ;;  %v7258_v2 = vor.u32 %v5140_v8, %v4795_v39  ;;  %v4787_v39 = vld [vmem:[%s8331_s3 + $0x1d8] sm:$0xf0] }
 0x3d7   :  { %8550 = vst [vmem:[#allocation56_spill] sm:$0xff] %v7236_v62  ;;  %3019 = vmatpush.bf16.msrb.mxu2 %v7253_v20 }
 0x3d8   :  { %v7239_v37 = vpop.f32.mrf.mxu2  ;;  %8553 = vst [vmem:[#allocation59_spill] sm:$0xff] %v7253_v20 }
 0x3d9   :  { %8551 = vst [vmem:[#allocation57_spill] sm:$0xff] %v7239_v37  ;;  %v7251_v60 = vpop.f32.mrf.mxu3  ;;  %v2013_v26 = vpop.f32.mrf.mxu0  ;;  %3048 = vmatpush.bf16.msrb.mxu3 %v7258_v2  ;;  %v4785_v37 = vld [vmem:[%s8331_s3 + $0x1d0] sm:$0xf] }
 0x3da   :  { %8552 = vst [vmem:[#allocation58_spill] sm:$0xff] %v7251_v60  ;;  %v2052_v62 = vpop.f32.mrf.mxu1  ;;  %v7272_v8 = vor.u32 %v5139_v12, %v4785_v37  ;;  %v2014_v20 = vadd.f32 %v2013_v26, %v6835_v34  ;;  %v4521_v37 = vld [vmem:[%s8331_s3 + $0x80] sm:$0xf]  ;;  %v5097_v12 = vld [vmem:[%s8331_s3 + $0x84] sm:$0xf0] }
 0x3db   :  { %8554 = vst [vmem:[#allocation60_spill] sm:$0xff] %v7258_v2  ;;  %v7278_v2 = vor.u32 %v5138_v61, %v4787_v39  ;;  %v2053_v60 = vadd.f32 %v2052_v62, %v6837_v55  ;;  %v5096_v61 = vld [vmem:[%s8331_s3 + $0x84] sm:$0xf]  ;;  %v7297_v55 = vor.u32 %v5097_v12, %v4521_v37  ;;  %v4523_v62 = vld [vmem:[%s8331_s3 + $0x88] sm:$0xf0] }
 0x3dc   :  { %8555 = vst [vmem:[#allocation61_spill] sm:$0xff] %v7272_v8  ;;  %3020 = vmatpush.bf16.msrb.mxu2 %v7272_v8  ;;  %v4777_v8 = vld [vmem:[%s8331_s3 + $0x1c0] sm:$0xf]  ;;  %v5136_v12 = vld [vmem:[%s8331_s3 + $0x1c4] sm:$0xf] }
 0x3dd   :  { %2703 = vmatmul.bf16.gmra.mxu2 %v6268_v57  ;;  %8556 = vst [vmem:[#allocation62_spill] sm:$0xff] %v7278_v2  ;;  %3049 = vmatpush.bf16.msrb.mxu3 %v7278_v2 }
 0x3de   :  { %2732 = vmatmul.bf16.gmra.mxu3 %v6268_v57  ;;  %v5137_v57 = vld [vmem:[%s8331_s3 + $0x1c4] sm:$0xf0]  ;;  %2559 = vmatpush.bf16.msra.mxu0 %v7297_v55 }
 0x3df   :  { %v7314_v37 = vor.u32 %v5137_v57, %v4777_v8  ;;  %v4769_v57 = vld [vmem:[%s8331_s3 + $0x1b0] sm:$0xf]  ;;  %v5134_v8 = vld [vmem:[%s8331_s3 + $0x1b4] sm:$0xf] }
 0x3e0   :  { %v2091_v58 = vpop.f32.mrf.mxu2 }
 0x3e1   :  { %v7293_v34 = vadd.f32 %v2091_v58, %v2014_v20  ;;  %v2130_v26 = vpop.f32.mrf.mxu3  ;;  %v7295_v39 = vpop.f32.mrf.mxu0  ;;  %v7312_v20 = vor.u32 %v5096_v61, %v4523_v62  ;;  %8561 = vst [vmem:[#allocation67_spill] sm:$0xff] %v7314_v37  ;;  %3021 = vmatpush.bf16.msrb.mxu2 %v7314_v37 }
 0x3e2   :  { %8558 = vst [vmem:[#allocation64_spill] sm:$0xff] %v7295_v39  ;;  %v7308_v2 = vadd.f32 %v2130_v26, %v2053_v60  ;;  %v7310_v58 = vpop.f32.mrf.mxu1  ;;  %v4779_v39 = vld [vmem:[%s8331_s3 + $0x1c8] sm:$0xf0]  ;;  %v5135_v60 = vld [vmem:[%s8331_s3 + $0x1b4] sm:$0xf0] }
 0x3e3   :  { %8557 = vst [vmem:[#allocation63_spill] sm:$0xff] %v7293_v34  ;;  %v7323_v34 = vor.u32 %v5136_v12, %v4779_v39  ;;  %2588 = vmatpush.bf16.msra.mxu1 %v7312_v20  ;;  %v7337_v61 = vor.u32 %v5135_v60, %v4769_v57  ;;  %v4771_v26 = vld [vmem:[%s8331_s3 + $0x1b8] sm:$0xf0]  ;;  %v4761_v12 = vld [vmem:[%s8331_s3 + $0x1a0] sm:$0xf] }
 0x3e4   :  { %8559 = vst [vmem:[#allocation65_spill] sm:$0xff] %v7308_v2  ;;  %v7342_v39 = vor.u32 %v5134_v8, %v4771_v26  ;;  %v5132_v57 = vld [vmem:[%s8331_s3 + $0x1a4] sm:$0xf] }
 0x3e5   :  { %8560 = vst [vmem:[#allocation66_spill] sm:$0xff] %v7310_v58  ;;  %3050 = vmatpush.bf16.msrb.mxu3 %v7323_v34  ;;  %3022 = vmatpush.bf16.msrb.mxu2 %v7337_v61  ;;  %v5127_v58 = vld [vmem:[%s8331_s3 + $0x174] sm:$0xf0] }
 0x3e6   :  { %8562 = vst [vmem:[#allocation68_spill] sm:$0xff] %v7323_v34  ;;  %v5133_v34 = vld [vmem:[%s8331_s3 + $0x1a4] sm:$0xf0] }
 0x3e7   :  { %8563 = vst [vmem:[#allocation69_spill] sm:$0xff] %v7337_v61  ;;  %v7359_v26 = vor.u32 %v5133_v34, %v4761_v12  ;;  %v4763_v61 = vld [vmem:[%s8331_s3 + $0x1a8] sm:$0xf0]  ;;  %v4723_v34 = vld [vmem:[%s8331_s3 + $0x178] sm:$0xf0] }
 0x3e8   :  { %8564 = vst [vmem:[#allocation70_spill] sm:$0xff] %v7342_v39  ;;  %v7344_v62 = vpop.f32.mrf.mxu2  ;;  %v7378_v12 = vor.u32 %v5132_v57, %v4763_v61  ;;  %v7394_v61 = vor.u32 %v5131_v46, %v4753_v42  ;;  %v4745_v46 = vld [vmem:[%s8331_s3 + $0x180] sm:$0xf]  ;;  %v5129_v42 = vld [vmem:[%s8331_s3 + $0x184] sm:$0xf0] }
 0x3e9   :  { %8565 = vst [vmem:[#allocation71_spill] sm:$0xff] %v7344_v62  ;;  %v7356_v60 = vpop.f32.mrf.mxu3  ;;  %v2168_v8 = vpop.f32.mrf.mxu0  ;;  %3051 = vmatpush.bf16.msrb.mxu3 %v7342_v39  ;;  %v4721_v62 = vld [vmem:[%s8331_s3 + $0x170] sm:$0xf]  ;;  %3023 = vmatpush.bf16.msrb.mxu2 %v7359_v26 }
 0x3ea   :  { %8566 = vst [vmem:[#allocation72_spill] sm:$0xff] %v7356_v60  ;;  %v2207_v37 = vpop.f32.mrf.mxu1  ;;  %v5126_v60 = vld [vmem:[%s8331_s3 + $0x174] sm:$0xf]  ;;  %v7373_v39 = vor.u32 %v5127_v58, %v4721_v62  ;;  %v4755_v62 = vld [vmem:[%s8331_s3 + $0x198] sm:$0xf0]  ;;  %v2237_v57 = vadd.f32 %v2168_v8, %v6911_v35 }
 0x3eb   :  { %8567 = vst [vmem:[#allocation73_spill] sm:$0xff] %v7359_v26  ;;  %v7380_v2 = vor.u32 %v5126_v60, %v4723_v34  ;;  %v5130_v58 = vld [vmem:[%s8331_s3 + $0x194] sm:$0xf]  ;;  %v2238_v34 = vadd.f32 %v2207_v37, %v6916_v36  ;;  %v5128_v35 = vld [vmem:[%s8331_s3 + $0x184] sm:$0xf] }
 0x3ec   :  { %8568 = vst [vmem:[#allocation74_spill] sm:$0xff] %v7378_v12  ;;  %2846 = vmatpush.bf16.msrb.mxu0 %v7373_v39  ;;  %v7403_v60 = vor.u32 %v5130_v58, %v4755_v62  ;;  %v4747_v36 = vld [vmem:[%s8331_s3 + $0x188] sm:$0xf0] }
 0x3ed   :  { %8569 = vst [vmem:[#allocation75_spill] sm:$0xff] %v7380_v2  ;;  %2708 = vmatmul.bf16.gmra.mxu2 %v6298_v63  ;;  %2875 = vmatpush.bf16.msrb.mxu1 %v7380_v2  ;;  %v7425_v2 = vor.u32 %v5128_v35, %v4747_v36 }
 0x3ee   :  { %8570 = vst [vmem:[#allocation76_spill] sm:$0xff] %v7394_v61  ;;  %2737 = vmatmul.bf16.gmra.mxu3 %v6298_v63  ;;  %3024 = vmatpush.bf16.msrb.mxu2 %v7394_v61  ;;  %v1991_v63 = vadd.f32 %v6913_v11, %v6694_v45 }
 0x3ef   :  { %3052 = vmatpush.bf16.msrb.mxu3 %v7378_v12  ;;  %v7416_v12 = vor.u32 %v5129_v42, %v4745_v46  ;;  %v4713_v46 = vld [vmem:[%s8331_s3 + $0x160] sm:$0xf] }
 0x3f0   :  { %v2278_v26 = vpop.f32.mrf.mxu2  ;;  %v2137_v45 = vadd.f32 %v6957_v9, %v1991_v63 }
 0x3f1   :  { %v2347_v8 = vadd.f32 %v2278_v26, %v2237_v57  ;;  %v2317_v58 = vpop.f32.mrf.mxu3  ;;  %v2170_v62 = vpop.f32.mrf.mxu0  ;;  %v2030_v26 = vadd.f32 %v6918_v59, %v6696_v38 }
 0x3f2   :  { %v2348_v37 = vadd.f32 %v2317_v58, %v2238_v34  ;;  %v2209_v61 = vpop.f32.mrf.mxu1  ;;  %v5125_v34 = vld [vmem:[%s8331_s3 + $0x164] sm:$0xf0]  ;;  %3025 = vmatpush.bf16.msrb.mxu2 %v7416_v12  ;;  %v2239_v35 = vadd.f32 %v2170_v62, %v2137_v45 }
 0x3f3   :  { %v2371_v52 = vmax.f32 %v6666_v54, %v2347_v8  ;;  %3053 = vmatpush.bf16.msrb.mxu3 %v7403_v60  ;;  %v5124_v54 = vld [vmem:[%s8331_s3 + $0x164] sm:$0xf]  ;;  %v7441_v11 = vor.u32 %v5125_v34, %v4713_v46  ;;  %v2138_v38 = vadd.f32 %v6968_v10, %v2030_v26 }
 0x3f4   :  { %v2372_v57 = vmax.f32 %v6669_v28, %v2348_v37  ;;  %v4715_v28 = vld [vmem:[%s8331_s3 + $0x168] sm:$0xf0] }
 0x3f5   :  { %v7448_v42 = vor.u32 %v5124_v54, %v4715_v28  ;;  %2847 = vmatpush.bf16.msrb.mxu0 %v7441_v11  ;;  %v2240_v8 = vadd.f32 %v2209_v61, %v2138_v38  ;;  %v5123_v61 = vld [vmem:[%s8331_s3 + $0x154] sm:$0xf0] }
 0x3f6   :  { %3264 = vmatpush.bf16.msra.mxu2 %v6867_v40  ;;  %v2395_v59 = vmax.f32 %v2371_v52, %v2372_v57  ;;  %v4705_v52 = vld [vmem:[%s8331_s3 + $0x150] sm:$0xf] }
 0x3f7   :  { %3054 = vmatpush.bf16.msrb.mxu3 %v7425_v2  ;;  %2876 = vmatpush.bf16.msrb.mxu1 %v7448_v42  ;;  %v7462_v37 = vor.u32 %v5123_v61, %v4705_v52 }
 0x3f8   :  { %v2280_v63 = vpop.f32.mrf.mxu2 }
 0x3f9   :  { %v2349_v9 = vadd.f32 %v2280_v63, %v2239_v35  ;;  %v2319_v58 = vpop.f32.mrf.mxu3  ;;  %v2173_v36 = vpop.f32.mrf.mxu0  ;;  %2848 = vmatpush.bf16.msrb.mxu0 %v7462_v37 }
 0x3fa   :  { %3265 = vmatpush.bf16.msra.mxu2 %v6930_v44  ;;  %v2350_v40 = vadd.f32 %v2319_v58, %v2240_v8  ;;  %v2212_v10 = vpop.f32.mrf.mxu1  ;;  %v4707_v44 = vld [vmem:[%s8331_s3 + $0x158] sm:$0xf0]  ;;  %v1996_v58 = vadd.f32 %v7034_v27, %v6727_v16 }
 0x3fb   :  { %3293 = vmatpush.bf16.msra.mxu3 %v6876_v51  ;;  %v2373_v62 = vmax.f32 %v6689_v53, %v2349_v9  ;;  %v5122_v51 = vld [vmem:[%s8331_s3 + $0x154] sm:$0xf]  ;;  %v7479_v53 = vld [vmem:[%s8330_s2] ss:$0 sm:$0xff]  ;;  %v2242_v54 = vadd.f32 %v2212_v10, %v7042_v6 }
 0x3fc   :  { %v2374_v26 = vmax.f32 %v6692_v4, %v2350_v40  ;;  %v7471_v57 = vor.u32 %v5122_v51, %v4707_v44  ;;  %v2407_v46 = vadd.f32 %v7479_v53, %v2395_v59  ;;  %v2241_v4 = vadd.f32 %v2173_v36, %v7032_v1  ;;  %v4697_v36 = vld [vmem:[%s8331_s3 + $0x140] sm:$0xf]  ;;  %v5121_v40 = vld [vmem:[%s8331_s3 + $0x144] sm:$0xf0]  ;;  %v4689_v44 = vld [vmem:[%s8331_s3 + $0x130] sm:$0xf] }
 0x3fd   :  { %2713 = vmatmul.bf16.gmra.mxu2 %v6335_v13  ;;  %v2141_v16 = vadd.f32 %v7068_v24, %v1996_v58  ;;  %v2001_v58 = vadd.f32 %v7123_v49, %v6760_v47  ;;  %v8572_v47 = vld [vmem:[#allocation43_spill] sm:$0xff] }
 0x3fe   :  { %v2396_v34 = vmax.f32 %v2373_v62, %v2374_v26  ;;  %2742 = vmatmul.bf16.gmra.mxu3 %v6335_v13  ;;  %2877 = vmatpush.bf16.msrb.mxu1 %v7471_v57  ;;  %v2419_v59 = vmax.f32 %v2407_v46, 0.0  ;;  %v5119_v26 = vld [vmem:[%s8331_s3 + $0x134] sm:$0xf0]  ;;  %v4683_v49 = vld [vmem:[%s8331_s3 + $0x128] sm:$0xf0] }
 0x3ff   :  { %3294 = vmatpush.bf16.msra.mxu3 %v6941_v7  ;;  %3266 = vmatpush.bf16.msra.mxu2 %v7013_v30  ;;  %v2035_v30 = vadd.f32 %v7044_v19, %v6729_v18  ;;  %v7509_v18 = vor.u32 %v5121_v40, %v4697_v36  ;;  %v7530_v46 = vor.u32 %v5119_v26, %v4689_v44  ;;  %v4675_v26 = vld [vmem:[%s8331_s3 + $0x118] sm:$0xf0] }
 0x400   :  { %v2408_v7 = vadd.f32 %v7479_v53, %v2396_v34  ;;  %v2283_v45 = vpop.f32.mrf.mxu2  ;;  %v4691_v34 = vld [vmem:[%s8331_s3 + $0x138] sm:$0xf0] }
 0x401   :  { %v2351_v28 = vadd.f32 %v2283_v45, %v2241_v4  ;;  %v2322_v38 = vpop.f32.mrf.mxu3  ;;  %v2175_v35 = vpop.f32.mrf.mxu0  ;;  %v2142_v27 = vadd.f32 %v7080_v56, %v2035_v30  ;;  %2849 = vmatpush.bf16.msrb.mxu0 %v7509_v18  ;;  %v4681_v30 = vld [vmem:[%s8331_s3 + $0x120] sm:$0xf] }
 0x402   :  { %v2420_v8 = vmax.f32 %v2408_v7, 0.0  ;;  %v2352_v63 = vadd.f32 %v2322_v38, %v2242_v54  ;;  %v2214_v9 = vpop.f32.mrf.mxu1  ;;  %v2243_v10 = vadd.f32 %v2175_v35, %v2141_v16 }
 0x403   :  { %3295 = vmatpush.bf16.msra.mxu3 %v7020_v33  ;;  %v2375_v1 = vmax.f32 %v6699_v25, %v2351_v28  ;;  %3267 = vmatpush.bf16.msra.mxu2 %v7098_v17  ;;  %v5120_v25 = vld [vmem:[%s8331_s3 + $0x144] sm:$0xf] }
 0x404   :  { %v7495_v6 = vpack.c.bf16 %v2420_v8, %v2419_v59  ;;  %v2376_v33 = vmax.f32 %v6702_v14, %v2352_v63  ;;  %v4699_v14 = vld [vmem:[%s8331_s3 + $0x148] sm:$0xf0] }
 0x405   :  { %v7517_v17 = vor.u32 %v5120_v25, %v4699_v14  ;;  %2850 = vmatpush.bf16.msrb.mxu0 %v7530_v46 }
 0x406   :  { %v2397_v19 = vmax.f32 %v2375_v1, %v2376_v33  ;;  %2560 = vmatmul.bf16.vlgmr.msra.gmra.mxu0 %v7495_v6  ;;  %2589 = vmatmul.bf16.vlgmr.msra.gmra.mxu1 %v7495_v6  ;;  %v5117_v33 = vld [vmem:[%s8331_s3 + $0x124] sm:$0xf0] }
 0x407   :  { %3296 = vmatpush.bf16.msra.mxu3 %v7108_v32  ;;  %3268 = vmatpush.bf16.msra.mxu2 %v7138_v48  ;;  %v2244_v32 = vadd.f32 %v2214_v9, %v2142_v27 }
 0x408   :  { %v2285_v24 = vpop.f32.mrf.mxu2  ;;  %2878 = vmatpush.bf16.msrb.mxu1 %v7517_v17 }
 0x409   :  { %v2353_v52 = vadd.f32 %v2285_v24, %v2243_v10  ;;  %v2324_v56 = vpop.f32.mrf.mxu3  ;;  %v2178_v61 = vpop.f32.mrf.mxu0 }
 0x40a   :  { %v2354_v62 = vadd.f32 %v2324_v56, %v2244_v32  ;;  %v2217_v51 = vpop.f32.mrf.mxu1  ;;  %v2245_v45 = vadd.f32 %v2178_v61, %v7121_v31  ;;  %v8574_v32 = vld [vmem:[#allocation75_spill] sm:$0xff]  ;;  %v4673_v56 = vld [vmem:[%s8331_s3 + $0x110] sm:$0xf]  ;;  %v5115_v61 = vld [vmem:[%s8331_s3 + $0x114] sm:$0xf0] }
 0x40b   :  { %3297 = vmatpush.bf16.msra.mxu3 %v7143_v21  ;;  %v2377_v48 = vmax.f32 %v6722_v43, %v2353_v52  ;;  %v5118_v21 = vld [vmem:[%s8331_s3 + $0x134] sm:$0xf]  ;;  %3269 = vmatpush.bf16.msra.mxu2 %v7179_v3  ;;  %v2409_v43 = vadd.f32 %v7479_v53, %v2397_v19  ;;  %v2246_v3 = vadd.f32 %v2217_v51, %v7125_v22 }
 0x40c   :  { %v2378_v4 = vmax.f32 %v6725_v41, %v2354_v62  ;;  %v7540_v7 = vor.u32 %v5118_v21, %v4691_v34  ;;  %v2040_v22 = vadd.f32 %v7127_v0, %v6762_v50  ;;  %v2145_v50 = vadd.f32 %v8572_v47, %v2001_v58  ;;  %v8575_v62 = vld [vmem:[#allocation22_spill] sm:$0xff] }
 0x40d   :  { %v2421_v59 = vmax.f32 %v2409_v43, 0.0  ;;  %v7571_v0 = vor.u32 %v5117_v33, %v4681_v30  ;;  %v7594_v44 = vor.u32 %v5115_v61, %v4673_v56  ;;  %v8580_v30 = vld [vmem:[#allocation46_spill] sm:$0xff] }
 0x40e   :  { %v2398_v54 = vmax.f32 %v2377_v48, %v2378_v4  ;;  %2879 = vmatpush.bf16.msrb.mxu1 %v7540_v7  ;;  %v8576_v48 = vld [vmem:[#allocation20_spill] sm:$0xff] }
 0x40f   :  { %3298 = vmatpush.bf16.msra.mxu3 %v7184_v23  ;;  %3270 = vmatpush.bf16.msra.mxu2 %v7201_v15 }
 0x410   :  { %v2410_v28 = vadd.f32 %v7479_v53, %v2398_v54  ;;  %v2288_v41 = vpop.f32.mrf.mxu2  ;;  %2851 = vmatpush.bf16.msrb.mxu0 %v7571_v0  ;;  %v8577_v54 = vld [vmem:[#allocation45_spill] sm:$0xff] }
 0x411   :  { %v2355_v38 = vadd.f32 %v2288_v41, %v2245_v45  ;;  %v2327_v23 = vpop.f32.mrf.mxu3  ;;  %v2180_v35 = vpop.f32.mrf.mxu0 }
 0x412   :  { %v2422_v8 = vmax.f32 %v2410_v28, 0.0  ;;  %v2356_v63 = vadd.f32 %v2327_v23, %v2246_v3  ;;  %v2219_v9 = vpop.f32.mrf.mxu1  ;;  %v2247_v16 = vadd.f32 %v2180_v35, %v2145_v50  ;;  %v8578_v3 = vld [vmem:[#allocation47_spill] sm:$0xff] }
 0x413   :  { %3299 = vmatpush.bf16.msra.mxu3 %v7207_v5  ;;  %v2379_v31 = vmax.f32 %v6732_v29, %v2355_v38  ;;  %3271 = vmatpush.bf16.msra.mxu2 %v7297_v55  ;;  %v8571_v5 = vld [vmem:[#allocation21_spill] sm:$0xff]  ;;  %v5116_v29 = vld [vmem:[%s8331_s3 + $0x124] sm:$0xf]  ;;  %v8573_v55 = vld [vmem:[#allocation44_spill] sm:$0xff] }
 0x414   :  { %v7557_v15 = vpack.c.bf16 %v2422_v8, %v2421_v59  ;;  %v2380_v1 = vmax.f32 %v8571_v5, %v2356_v63  ;;  %v2146_v36 = vadd.f32 %v8573_v55, %v2040_v22  ;;  %v7579_v25 = vor.u32 %v5116_v29, %v4683_v49  ;;  %2852 = vmatpush.bf16.msrb.mxu0 %v7594_v44  ;;  %v5113_v8 = vld [vmem:[%s8331_s3 + $0x104] sm:$0xf0]  ;;  %v4667_v5 = vld [vmem:[%s8331_s3 + $0x108] sm:$0xf0]  ;;  %v8583_v49 = vld [vmem:[#allocation48_spill] sm:$0xff] }
 0x415   :  { %v8581_v29 = vld [vmem:[#allocation23_spill] sm:$0xff] }
 0x416   :  { %v2399_v40 = vmax.f32 %v2379_v31, %v2380_v1  ;;  %2565 = vmatmul.bf16.gmra.mxu0 %v7557_v15  ;;  %2594 = vmatmul.bf16.gmra.mxu1 %v7557_v15  ;;  %v8579_v1 = vld [vmem:[#allocation27_spill] sm:$0xff] }
 0x417   :  { %3300 = vmatpush.bf16.msra.mxu3 %v7312_v20  ;;  %3026 = vmatmul.bf16.vlgmr.msrb.gmra.mxu2 %v7557_v15  ;;  %v2248_v20 = vadd.f32 %v2219_v9, %v2146_v36  ;;  %v2006_v33 = vadd.f32 %v8580_v30, %v8579_v1 }
 0x418   :  { %3055 = vmatmul.bf16.vlgmr.msrb.gmra.mxu3 %v7557_v15  ;;  %v2290_v14 = vpop.f32.mrf.mxu2  ;;  %2880 = vmatpush.bf16.msrb.mxu1 %v7579_v25  ;;  %v2411_v4 = vadd.f32 %v7479_v53, %v2399_v40  ;;  %v8584_v40 = vld [vmem:[#allocation24_spill] sm:$0xff] }
 0x419   :  { %v2357_v27 = vadd.f32 %v2290_v14, %v2247_v16  ;;  %v2329_v19 = vpop.f32.mrf.mxu3  ;;  %v2183_v10 = vpop.f32.mrf.mxu0  ;;  %3380 = vmatpush.bf16.msrb.mxu2 %v7373_v39  ;;  %v5114_v39 = vld [vmem:[%s8331_s3 + $0x114] sm:$0xf] }
 0x41a   :  { %v2358_v24 = vadd.f32 %v2329_v19, %v2248_v20  ;;  %v2222_v52 = vpop.f32.mrf.mxu1  ;;  %v7603_v34 = vor.u32 %v5114_v39, %v4675_v26  ;;  %v2249_v45 = vadd.f32 %v2183_v10, %v8577_v54  ;;  %v2423_v63 = vmax.f32 %v2411_v4, 0.0  ;;  %v8585_v20 = vld [vmem:[#allocation49_spill] sm:$0xff] }
 0x41b   :  { %3409 = vmatpush.bf16.msrb.mxu3 %v8574_v32  ;;  %v2381_v51 = vmax.f32 %v8575_v62, %v2357_v27  ;;  %v2250_v41 = vadd.f32 %v2222_v52, %v8578_v3  ;;  %v2149_v14 = vadd.f32 %v8585_v20, %v2006_v33  ;;  %v4881_v32 = vld [vmem:[%s8331_s3 + $0x270] sm:$0xf]  ;;  %v4883_v62 = vld [vmem:[%s8331_s3 + $0x278] sm:$0xf0] }
 0x41c   :  { %v2382_v21 = vmax.f32 %v8576_v48, %v2358_v24  ;;  %2881 = vmatpush.bf16.msrb.mxu1 %v7603_v34  ;;  %v5158_v24 = vld [vmem:[%s8331_s3 + $0x274] sm:$0xf] }
 0x41d   :  { %3381 = vmatpush.bf16.msrb.mxu2 %v7441_v11  ;;  %v4665_v11 = vld [vmem:[%s8331_s3 + $0x100] sm:$0xf]  ;;  %v7663_v48 = vor.u32 %v5158_v24, %v4883_v62  ;;  %v5155_v24 = vld [vmem:[%s8331_s3 + $0x254] sm:$0xf0] }
 0x41e   :  { %v2400_v43 = vmax.f32 %v2381_v51, %v2382_v21  ;;  %v7623_v22 = vor.u32 %v5113_v8, %v4665_v11  ;;  %v8590_v11 = vld [vmem:[#allocation53_spill] sm:$0xff] }
 0x41f   :  { %3410 = vmatpush.bf16.msrb.mxu3 %v7448_v42  ;;  %v5112_v42 = vld [vmem:[%s8331_s3 + $0x104] sm:$0xf] }
 0x420   :  { %v2412_v28 = vadd.f32 %v7479_v53, %v2400_v43  ;;  %v2293_v38 = vpop.f32.mrf.mxu2  ;;  %v7632_v50 = vor.u32 %v5112_v42, %v4667_v5  ;;  %2853 = vmatpush.bf16.msrb.mxu0 %v7623_v22  ;;  %v8587_v43 = vld [vmem:[#allocation25_spill] sm:$0xff] }
 0x421   :  { %v2359_v23 = vadd.f32 %v2293_v38, %v2249_v45  ;;  %v2332_v35 = vpop.f32.mrf.mxu3  ;;  %v2185_v59 = vpop.f32.mrf.mxu0  ;;  %3382 = vmatpush.bf16.msrb.mxu2 %v7462_v37  ;;  %v8582_v37 = vld [vmem:[#allocation28_spill] sm:$0xff]  ;;  %v8588_v45 = vld [vmem:[#allocation26_spill] sm:$0xff] }
 0x422   :  { %v2424_v9 = vmax.f32 %v2412_v28, 0.0  ;;  %v2360_v58 = vadd.f32 %v2332_v35, %v2250_v41  ;;  %v2224_v31 = vpop.f32.mrf.mxu1  ;;  %v2045_v55 = vadd.f32 %v8583_v49, %v8582_v37  ;;  %2882 = vmatpush.bf16.msrb.mxu1 %v7632_v50  ;;  %v2251_v10 = vadd.f32 %v2185_v59, %v2149_v14  ;;  %v5157_v41 = vld [vmem:[%s8331_s3 + $0x264] sm:$0xf0]  ;;  %v5156_v38 = vld [vmem:[%s8331_s3 + $0x264] sm:$0xf]  ;;  %v8593_v49 = vld [vmem:[#allocation29_spill] sm:$0xff] }
 0x423   :  { %3411 = vmatpush.bf16.msrb.mxu3 %v7471_v57  ;;  %v2383_v47 = vmax.f32 %v8581_v29, %v2359_v23  ;;  %v8586_v57 = vld [vmem:[#allocation50_spill] sm:$0xff]  ;;  %v8589_v23 = vld [vmem:[#allocation51_spill] sm:$0xff]  ;;  %v8591_v29 = vld [vmem:[#allocation9_spill] sm:$0xff] }
 0x424   :  { %v7636_v36 = vpack.c.bf16 %v2424_v9, %v2423_v63  ;;  %v2384_v16 = vmax.f32 %v8584_v40, %v2360_v58  ;;  %v2150_v27 = vadd.f32 %v8586_v57, %v2045_v55  ;;  %v8594_v40 = vld [vmem:[#allocation2_spill] sm:$0xff] }
 0x425   :  { %3383 = vmatpush.bf16.msrb.mxu2 %v7509_v18  ;;  %v5159_v18 = vld [vmem:[%s8331_s3 + $0x274] sm:$0xf0]  ;;  %v8596_v14 = vld [vmem:[#allocation18_spill] sm:$0xff] }
 0x426   :  { %v2401_v19 = vmax.f32 %v2383_v47, %v2384_v16  ;;  %2570 = vmatmul.bf16.gmra.mxu0 %v7636_v36  ;;  %2599 = vmatmul.bf16.gmra.mxu1 %v7636_v36  ;;  %v2252_v52 = vadd.f32 %v2224_v31, %v2150_v27  ;;  %v7657_v61 = vor.u32 %v5159_v18, %v4881_v32  ;;  %v8592_v47 = vld [vmem:[#allocation52_spill] sm:$0xff] }
 0x427   :  { %3031 = vmatmul.bf16.gmra.mxu2 %v7636_v36  ;;  %3412 = vmatpush.bf16.msrb.mxu3 %v7517_v17  ;;  %v2011_v37 = vadd.f32 %v8592_v47, %v8591_v29  ;;  %v4865_v18 = vld [vmem:[%s8331_s3 + $0x250] sm:$0xf]  ;;  %v8603_v47 = vld [vmem:[#allocation5_spill] sm:$0xff] }
 0x428   :  { %3060 = vmatmul.bf16.gmra.mxu3 %v7636_v36  ;;  %v2295_v56 = vpop.f32.mrf.mxu2  ;;  %3190 = vmatpush.bf16.msra.mxu0 %v7657_v61  ;;  %v2413_v17 = vadd.f32 %v7479_v53, %v2401_v19  ;;  %v8598_v19 = vld [vmem:[#allocation58_spill] sm:$0xff] }
 0x429   :  { %v2361_v51 = vadd.f32 %v2295_v56, %v2251_v10  ;;  %v2334_v39 = vpop.f32.mrf.mxu3  ;;  %v2188_v26 = vpop.f32.mrf.mxu0  ;;  %3384 = vmatpush.bf16.msrb.mxu2 %v7530_v46  ;;  %3219 = vmatpush.bf16.msra.mxu1 %v7663_v48  ;;  %v4873_v46 = vld [vmem:[%s8331_s3 + $0x260] sm:$0xf]  ;;  %v4867_v56 = vld [vmem:[%s8331_s3 + $0x258] sm:$0xf0] }
 0x42a   :  { %v2362_v21 = vadd.f32 %v2334_v39, %v2252_v52  ;;  %v2227_v4 = vpop.f32.mrf.mxu1  ;;  %v2253_v35 = vadd.f32 %v2188_v26, %v8589_v23  ;;  %v2425_v5 = vmax.f32 %v2413_v17, 0.0  ;;  %v7721_v52 = vor.u32 %v5155_v24, %v4865_v18  ;;  %v8599_v17 = vld [vmem:[#allocation63_spill] sm:$0xff]  ;;  %v8610_v24 = vld [vmem:[#allocation72_spill] sm:$0xff] }
 0x42b   :  { %v2385_v54 = vmax.f32 %v8587_v43, %v2361_v51  ;;  %3413 = vmatpush.bf16.msrb.mxu3 %v7540_v7  ;;  %v7683_v7 = vor.u32 %v5157_v41, %v4873_v46  ;;  %v2254_v8 = vadd.f32 %v2227_v4, %v8590_v11  ;;  %v4857_v43 = vld [vmem:[%s8331_s3 + $0x240] sm:$0xf]  ;;  %v4859_v41 = vld [vmem:[%s8331_s3 + $0x248] sm:$0xf0]  ;;  %v8602_v11 = vld [vmem:[#allocation8_spill] sm:$0xff] }
 0x42c   :  { %v2386_v28 = vmax.f32 %v8588_v45, %v2362_v21  ;;  %v5152_v45 = vld [vmem:[%s8331_s3 + $0x244] sm:$0xf] }
 0x42d   :  { %3385 = vmatpush.bf16.msrb.mxu2 %v7571_v0  ;;  %v4875_v0 = vld [vmem:[%s8331_s3 + $0x268] sm:$0xf0]  ;;  %3191 = vmatpush.bf16.msra.mxu0 %v7683_v7 }
 0x42e   :  { %v2402_v3 = vmax.f32 %v2385_v54, %v2386_v28  ;;  %v7690_v63 = vor.u32 %v5156_v38, %v4875_v0  ;;  %v5153_v54 = vld [vmem:[%s8331_s3 + $0x244] sm:$0xf0]  ;;  %v8600_v38 = vld [vmem:[#allocation30_spill] sm:$0xff] }
 0x42f   :  { %3414 = vmatpush.bf16.msrb.mxu3 %v7579_v25  ;;  %v8595_v25 = vld [vmem:[#allocation54_spill] sm:$0xff]  ;;  %v7741_v46 = vor.u32 %v5153_v54, %v4857_v43  ;;  %v4851_v43 = vld [vmem:[%s8331_s3 + $0x238] sm:$0xf0] }
 0x430   :  { %v2414_v59 = vadd.f32 %v7479_v53, %v2402_v3  ;;  %v2298_v42 = vpop.f32.mrf.mxu2  ;;  %3220 = vmatpush.bf16.msra.mxu1 %v7690_v63  ;;  %v2050_v16 = vadd.f32 %v8595_v25, %v8594_v40  ;;  %v8606_v25 = vld [vmem:[#allocation33_spill] sm:$0xff] }
 0x431   :  { %v2363_v9 = vadd.f32 %v2298_v42, %v2253_v35  ;;  %v2337_v58 = vpop.f32.mrf.mxu3  ;;  %v2190_v31 = vpop.f32.mrf.mxu0  ;;  %3386 = vmatpush.bf16.msrb.mxu2 %v7594_v44  ;;  %v8597_v44 = vld [vmem:[#allocation57_spill] sm:$0xff]  ;;  %3192 = vmatpush.bf16.msra.mxu0 %v7721_v52 }
 0x432   :  { %v2426_v1 = vmax.f32 %v2414_v59, 0.0  ;;  %v2364_v30 = vadd.f32 %v2337_v58, %v2254_v8  ;;  %v2229_v33 = vpop.f32.mrf.mxu1  ;;  %v2153_v27 = vadd.f32 %v8597_v44, %v2011_v37  ;;  %v2154_v10 = vadd.f32 %v8598_v19, %v2050_v16  ;;  %v8601_v35 = vld [vmem:[#allocation65_spill] sm:$0xff]  ;;  %v8604_v37 = vld [vmem:[#allocation64_spill] sm:$0xff]  ;;  %v8607_v16 = vld [vmem:[#allocation66_spill] sm:$0xff] }
 0x433   :  { %v2387_v55 = vmax.f32 %v8593_v49, %v2363_v9  ;;  %3415 = vmatpush.bf16.msrb.mxu3 %v7603_v34  ;;  %v5154_v34 = vld [vmem:[%s8331_s3 + $0x254] sm:$0xf]  ;;  %v7748_v59 = vor.u32 %v5152_v45, %v4859_v41  ;;  %v2016_v49 = vadd.f32 %v8604_v37, %v8603_v47  ;;  %v5149_v41 = vld [vmem:[%s8331_s3 + $0x224] sm:$0xf0] }
 0x434   :  { %v7701_v20 = vpack.c.bf16 %v2426_v1, %v2425_v5  ;;  %v2388_v57 = vmax.f32 %v8596_v14, %v2364_v30  ;;  %v2256_v62 = vadd.f32 %v2229_v33, %v2154_v10  ;;  %v7726_v39 = vor.u32 %v5154_v34, %v4867_v56  ;;  %v8608_v44 = vld [vmem:[#allocation12_spill] sm:$0xff]  ;;  %v8609_v10 = vld [vmem:[#allocation71_spill] sm:$0xff] }
 0x435   :  { %3387 = vmatpush.bf16.msrb.mxu2 %v7623_v22  ;;  %v2255_v22 = vadd.f32 %v2190_v31, %v2153_v27  ;;  %3193 = vmatpush.bf16.msra.mxu0 %v7741_v46  ;;  %v2055_v14 = vadd.f32 %v8607_v16, %v8606_v25  ;;  %v8611_v56 = vld [vmem:[#allocation15_spill] sm:$0xff]  ;;  %v4835_v16 = vld [vmem:[%s8331_s3 + $0x218] sm:$0xf0] }
 0x436   :  { %v2403_v32 = vmax.f32 %v2387_v55, %v2388_v57  ;;  %2575 = vmatmul.bf16.gmra.mxu0 %v7701_v20  ;;  %2604 = vmatmul.bf16.gmra.mxu1 %v7701_v20  ;;  %v8605_v55 = vld [vmem:[#allocation3_spill] sm:$0xff] }
 0x437   :  { %3036 = vmatmul.bf16.gmra.mxu2 %v7701_v20  ;;  %3416 = vmatpush.bf16.msrb.mxu3 %v7632_v50  ;;  %v2158_v34 = vadd.f32 %v8610_v24, %v2055_v14  ;;  %v8615_v24 = vld [vmem:[#allocation4_spill] sm:$0xff] }
 0x438   :  { %3065 = vmatmul.bf16.gmra.mxu3 %v7701_v20  ;;  %v2300_v51 = vpop.f32.mrf.mxu2  ;;  %3221 = vmatpush.bf16.msra.mxu1 %v7726_v39  ;;  %v2415_v42 = vadd.f32 %v7479_v53, %v2403_v32  ;;  %v2157_v32 = vadd.f32 %v8609_v10, %v2016_v49  ;;  %v8614_v49 = vld [vmem:[#allocation19_spill] sm:$0xff] }
 0x439   :  { %v2365_v26 = vadd.f32 %v2300_v51, %v2255_v22  ;;  %v2339_v21 = vpop.f32.mrf.mxu3  ;;  %v2193_v4 = vpop.f32.mrf.mxu0  ;;  %v5151_v51 = vld [vmem:[%s8331_s3 + $0x234] sm:$0xf0]  ;;  %v5145_v10 = vld [vmem:[%s8331_s3 + $0x204] sm:$0xf0] }
 0x43a   :  { %v2366_v28 = vadd.f32 %v2339_v21, %v2256_v62  ;;  %v2257_v50 = vadd.f32 %v2193_v4, %v8599_v17  ;;  %v2232_v3 = vpop.f32.mrf.mxu1  ;;  %v2427_v30 = vmax.f32 %v2415_v42, 0.0  ;;  %v4849_v62 = vld [vmem:[%s8331_s3 + $0x230] sm:$0xf] }
 0x43b   :  { %v2389_v23 = vmax.f32 %v8600_v38, %v2365_v26  ;;  %v2258_v0 = vadd.f32 %v2232_v3, %v8601_v35  ;;  %v5150_v26 = vld [vmem:[%s8331_s3 + $0x234] sm:$0xf]  ;;  %v7778_v4 = vor.u32 %v5151_v51, %v4849_v62  ;;  %v4841_v3 = vld [vmem:[%s8331_s3 + $0x220] sm:$0xf]  ;;  %v5148_v38 = vld [vmem:[%s8331_s3 + $0x224] sm:$0xf] }
 0x43c   :  { %v2390_v8 = vmax.f32 %v8602_v11, %v2366_v28  ;;  %3222 = vmatpush.bf16.msra.mxu1 %v7748_v59  ;;  %v7783_v28 = vor.u32 %v5150_v26, %v4851_v43  ;;  %v4842_v35 = vor.u32 %v5149_v41, %v4841_v3  ;;  %v8612_v11 = vld [vmem:[#allocation31_spill] sm:$0xff]  ;;  %v8617_v62 = vld [vmem:[#allocation34_spill] sm:$0xff]  ;;  %v8630_v3 = vld [vmem:[#allocation41_spill] sm:$0xff] }
 0x43d   :  { %3194 = vmatpush.bf16.msra.mxu0 %v7778_v4  ;;  %v8618_v51 = vld [vmem:[#allocation35_spill] sm:$0xff]  ;;  %v8631_v41 = vld [vmem:[#allocation42_spill] sm:$0xff] }
 0x43e   :  { %v2404_v9 = vmax.f32 %v2389_v23, %v2390_v8  ;;  %v8623_v26 = vld [vmem:[#allocation7_spill] sm:$0xff] }
 0x440   :  { %v2416_v58 = vadd.f32 %v7479_v53, %v2404_v9  ;;  %v2303_v31 = vpop.f32.mrf.mxu2  ;;  %3223 = vmatpush.bf16.msra.mxu1 %v7783_v28  ;;  %v8613_v9 = vld [vmem:[#allocation13_spill] sm:$0xff] }
 0x441   :  { %v2367_v5 = vadd.f32 %v2303_v31, %v2257_v50  ;;  %v2342_v1 = vpop.f32.mrf.mxu3  ;;  %v2195_v19 = vpop.f32.mrf.mxu0  ;;  %3195 = vmatpush.bf16.msra.mxu0 %v4842_v35 }
 0x442   :  { %v2428_v33 = vmax.f32 %v2416_v58, 0.0  ;;  %v2368_v29 = vadd.f32 %v2342_v1, %v2258_v0  ;;  %v2234_v18 = vpop.f32.mrf.mxu1  ;;  %v2259_v21 = vadd.f32 %v2195_v19, %v2157_v32  ;;  %v4843_v0 = vld [vmem:[%s8331_s3 + $0x228] sm:$0xf0]  ;;  %v4825_v19 = vld [vmem:[%s8331_s3 + $0x200] sm:$0xf] }
 0x443   :  { %v2391_v40 = vmax.f32 %v8605_v55, %v2367_v5  ;;  %v2260_v54 = vadd.f32 %v2234_v18, %v2158_v34  ;;  %v4846_v42 = vor.u32 %v5148_v38, %v4843_v0  ;;  %v4833_v55 = vld [vmem:[%s8331_s3 + $0x210] sm:$0xf]  ;;  %v5144_v32 = vld [vmem:[%s8331_s3 + $0x204] sm:$0xf]  ;;  %v4826_v18 = vor.u32 %v5145_v10, %v4825_v19 }
 0x444   :  { %v7760_v57 = vpack.c.bf16 %v2428_v33, %v2427_v30  ;;  %v2392_v27 = vmax.f32 %v8608_v44, %v2368_v29  ;;  %v8616_v34 = vld [vmem:[#allocation32_spill] sm:$0xff] }
 0x445   :  { %3224 = vmatpush.bf16.msra.mxu1 %v4846_v42  ;;  %v8639_v10 = vld [vmem:[#allocation68_spill] sm:$0xff] }
 0x446   :  { %v2405_v22 = vmax.f32 %v2391_v40, %v2392_v27  ;;  %2854 = vmatmul.bf16.vlgmr.msrb.gmra.mxu0 %v8611_v56  ;;  %2883 = vmatmul.bf16.vlgmr.msrb.gmra.mxu1 %v8611_v56  ;;  %v5147_v40 = vld [vmem:[%s8331_s3 + $0x214] sm:$0xf0] }
 0x447   :  { %3041 = vmatmul.bf16.gmra.mxu2 %v7760_v57  ;;  %v4834_v25 = vor.u32 %v5147_v40, %v4833_v55  ;;  %v8636_v55 = vld [vmem:[#allocation61_spill] sm:$0xff]  ;;  %v8637_v40 = vld [vmem:[#allocation62_spill] sm:$0xff] }
 0x448   :  { %3070 = vmatmul.bf16.gmra.mxu3 %v7760_v57  ;;  %v2305_v45 = vpop.f32.mrf.mxu2  ;;  %v2417_v5 = vadd.f32 %v7479_v53, %v2405_v22 }
 0x449   :  { %v2369_v17 = vadd.f32 %v2305_v45, %v2259_v21  ;;  %v2344_v50 = vpop.f32.mrf.mxu3  ;;  %3196 = vmatpush.bf16.msra.mxu0 %v4834_v25  ;;  %v8624_v21 = vld [vmem:[#allocation10_spill] sm:$0xff] }
 0x44a   :  { %v2370_v23 = vadd.f32 %v2344_v50, %v2260_v54  ;;  %v2429_v29 = vmax.f32 %v2417_v5, 0.0  ;;  %v8625_v54 = vld [vmem:[#allocation11_spill] sm:$0xff]  ;;  %v8626_v45 = vld [vmem:[#allocation38_spill] sm:$0xff]  ;;  %v8629_v50 = vld [vmem:[#allocation40_spill] sm:$0xff] }
 0x44b   :  { %v2393_v8 = vmax.f32 %v8612_v11, %v2369_v17  ;;  %v8628_v17 = vld [vmem:[#allocation39_spill] sm:$0xff] }
 0x44c   :  { %v2394_v58 = vmax.f32 %v8613_v9, %v2370_v23 }
 0x44d   :  { %3197 = vmatpush.bf16.msra.mxu0 %v4826_v18 }
 0x44e   :  { %v2406_v31 = vmax.f32 %v2393_v8, %v2394_v58  ;;  %v8632_v58 = vld [vmem:[#allocation55_spill] sm:$0xff] }
 0x450   :  { %v7802_v1 = vpop.f32.mrf.mxu2  ;;  %v2418_v30 = vadd.f32 %v7479_v53, %v2406_v31  ;;  %v5146_v53 = vld [vmem:[%s8331_s3 + $0x214] sm:$0xf] }
 0x451   :  { %v7805_v33 = vpop.f32.mrf.mxu3  ;;  %v4838_v44 = vor.u32 %v5146_v53, %v4835_v16  ;;  %3322 = vmatpush.bf16.msrb.mxu0 %v8615_v24  ;;  %v8633_v31 = vld [vmem:[#allocation56_spill] sm:$0xff] }
 0x452   :  { %v2430_v47 = vmax.f32 %v2418_v30, 0.0 }
 0x453   :  { %3225 = vmatpush.bf16.msra.mxu1 %v4838_v44 }
 0x454   :  { %v7807_v37 = vpack.c.bf16 %v2430_v47, %v2429_v29  ;;  %v8634_v29 = vld [vmem:[#allocation59_spill] sm:$0xff]  ;;  %v8635_v47 = vld [vmem:[#allocation60_spill] sm:$0xff] }
 0x455   :  { %3323 = vmatpush.bf16.msrb.mxu0 %v8617_v62  ;;  %v8642_v62 = vld [vmem:[#allocation73_spill] sm:$0xff] }
 0x456   :  { %2859 = vmatmul.bf16.gmra.mxu0 %v8614_v49  ;;  %2888 = vmatmul.bf16.gmra.mxu1 %v8614_v49 }
 0x457   :  { %3272 = vmatmul.bf16.vlgmr.msra.gmra.mxu2 %v8611_v56 }
 0x458   :  { %3301 = vmatmul.bf16.vlgmr.msra.gmra.mxu3 %v8611_v56  ;;  %v7825_v14 = vpop.f32.mrf.mxu2  ;;  %3529 = vmatpush.bf16.msra.mxu2 %v7657_v61  ;;  %v4827_v61 = vld [vmem:[%s8331_s3 + $0x208] sm:$0xf0] }
 0x459   :  { %3558 = vmatpush.bf16.msra.mxu3 %v7663_v48  ;;  %v7829_v27 = vpop.f32.mrf.mxu3  ;;  %v4830_v48 = vor.u32 %v5144_v32, %v4827_v61  ;;  %v8640_v32 = vld [vmem:[#allocation69_spill] sm:$0xff] }
 0x45b   :  { %3226 = vmatpush.bf16.msra.mxu1 %v4830_v48 }
 0x45c   :  { %3530 = vmatpush.bf16.msra.mxu2 %v7683_v7  ;;  %v8619_v7 = vld [vmem:[#allocation36_spill] sm:$0xff] }
 0x45d   :  { %3559 = vmatpush.bf16.msra.mxu3 %v7690_v63  ;;  %3324 = vmatpush.bf16.msrb.mxu0 %v8619_v7  ;;  %v8620_v63 = vld [vmem:[#allocation14_spill] sm:$0xff]  ;;  %v8644_v7 = vld [vmem:[#allocation76_spill] sm:$0xff] }
 0x45f   :  { %3351 = vmatpush.bf16.msrb.mxu1 %v8616_v34 }
 0x460   :  { %v7847_v22 = vpop.f32.mrf.mxu2  ;;  %3531 = vmatpush.bf16.msra.mxu2 %v7721_v52 }
 0x461   :  { %3560 = vmatpush.bf16.msra.mxu3 %v7726_v39  ;;  %v7851_v56 = vpop.f32.mrf.mxu3 }
 0x463   :  { %3352 = vmatpush.bf16.msrb.mxu1 %v8618_v51  ;;  %v8643_v51 = vld [vmem:[#allocation74_spill] sm:$0xff] }
 0x464   :  { %3532 = vmatpush.bf16.msra.mxu2 %v7741_v46  ;;  %v8621_v46 = vld [vmem:[#allocation37_spill] sm:$0xff] }
 0x465   :  { %3561 = vmatpush.bf16.msra.mxu3 %v7748_v59  ;;  %3325 = vmatpush.bf16.msrb.mxu0 %v8621_v46  ;;  %v8622_v59 = vld [vmem:[#allocation6_spill] sm:$0xff] }
 0x466   :  { %2864 = vmatmul.bf16.gmra.mxu0 %v6335_v13  ;;  %2893 = vmatmul.bf16.gmra.mxu1 %v6335_v13 }
 0x467   :  { %3277 = vmatmul.bf16.gmra.mxu2 %v8614_v49  ;;  %3353 = vmatpush.bf16.msrb.mxu1 %v8620_v63 }
 0x468   :  { %3306 = vmatmul.bf16.gmra.mxu3 %v8614_v49  ;;  %3533 = vmatpush.bf16.msra.mxu2 %v7778_v4  ;;  %v7865_v52 = vpop.f32.mrf.mxu2 }
 0x469   :  { %3562 = vmatpush.bf16.msra.mxu3 %v7783_v28  ;;  %v7867_v39 = vpop.f32.mrf.mxu3  ;;  %3326 = vmatpush.bf16.msrb.mxu0 %v8623_v26  ;;  %v8627_v28 = vld [vmem:[#allocation16_spill] sm:$0xff] }
 0x46b   :  { %3354 = vmatpush.bf16.msrb.mxu1 %v8622_v59 }
 0x46c   :  { %3534 = vmatpush.bf16.msra.mxu2 %v4842_v35 }
 0x46d   :  { %3563 = vmatpush.bf16.msra.mxu3 %v4846_v42  ;;  %3327 = vmatpush.bf16.msrb.mxu0 %v8625_v54 }
 0x46f   :  { %3355 = vmatpush.bf16.msrb.mxu1 %v8624_v21 }
 0x470   :  { %3535 = vmatpush.bf16.msra.mxu2 %v4834_v25  ;;  %v7873_v43 = vpop.f32.mrf.mxu2 }
 0x471   :  { %3564 = vmatpush.bf16.msra.mxu3 %v4838_v44  ;;  %v7875_v4 = vpop.f32.mrf.mxu3  ;;  %3328 = vmatpush.bf16.msrb.mxu0 %v8628_v17 }
 0x473   :  { %3356 = vmatpush.bf16.msrb.mxu1 %v8626_v45 }
 0x474   :  { %3536 = vmatpush.bf16.msra.mxu2 %v4826_v18  ;;  %v8641_v18 = vld [vmem:[#allocation70_spill] sm:$0xff] }
 0x475   :  { %3565 = vmatpush.bf16.msra.mxu3 %v4830_v48  ;;  %3329 = vmatpush.bf16.msrb.mxu0 %v8630_v3 }
 0x476   :  { %2869 = vmatmul.bf16.gmra.mxu0 %v8627_v28  ;;  %2898 = vmatmul.bf16.gmra.mxu1 %v8627_v28 }
 0x477   :  { %3282 = vmatmul.bf16.gmra.mxu2 %v6335_v13  ;;  %3357 = vmatpush.bf16.msrb.mxu1 %v8629_v50 }
 0x478   :  { %3311 = vmatmul.bf16.gmra.mxu3 %v6335_v13  ;;  %v2711_v38 = vpop.f32.mrf.mxu2 }
 0x479   :  { %v2740_v23 = vpop.f32.mrf.mxu3 }
 0x47b   :  { %3358 = vmatpush.bf16.msrb.mxu1 %v8631_v41 }
 0x480   :  { %v2714_v42 = vpop.f32.mrf.mxu2 }
 0x481   :  { %v2743_v9 = vpop.f32.mrf.mxu3 }
 0x483   :  { %v2561_v35 = vpop.f32.mrf.mxu0  ;;  %v2590_v0 = vpop.f32.mrf.mxu1 }
 0x484   :  { %v7888_v11 = vadd.f32 %v7802_v1, %v2561_v35  ;;  %v7891_v8 = vadd.f32 %v7805_v33, %v2590_v0  ;;  %v8645_v35 = vld [vmem:[#allocation17_spill] sm:$0xff] }
 0x486   :  { %3198 = vmatmul.bf16.vlgmr.msra.gmra.mxu0 %v8614_v49  ;;  %3227 = vmatmul.bf16.vlgmr.msra.gmra.mxu1 %v8614_v49 }
 0x487   :  { %3287 = vmatmul.bf16.gmra.mxu2 %v8627_v28  ;;  %3454 = vmatpush.bf16.msra.mxu0 %v8632_v58 }
 0x488   :  { %3316 = vmatmul.bf16.gmra.mxu3 %v8627_v28  ;;  %3483 = vmatpush.bf16.msra.mxu1 %v8633_v31  ;;  %v2716_v53 = vpop.f32.mrf.mxu2 }
 0x489   :  { %v2745_v25 = vpop.f32.mrf.mxu3 }
 0x48b   :  { %v2563_v5 = vpop.f32.mrf.mxu0  ;;  %v2592_v1 = vpop.f32.mrf.mxu1  ;;  %3455 = vmatpush.bf16.msra.mxu0 %v8634_v29 }
 0x48c   :  { %v7900_v30 = vadd.f32 %v7825_v14, %v2563_v5  ;;  %v7903_v33 = vadd.f32 %v7829_v27, %v2592_v1  ;;  %3484 = vmatpush.bf16.msra.mxu1 %v8635_v47  ;;  %v8638_v27 = vld [vmem:[#allocation67_spill] sm:$0xff] }
 0x48f   :  { %3456 = vmatpush.bf16.msra.mxu0 %v8636_v55 }
 0x490   :  { %3485 = vmatpush.bf16.msra.mxu1 %v8637_v40 }
 0x493   :  { %v2566_v16 = vpop.f32.mrf.mxu0  ;;  %v2595_v44 = vpop.f32.mrf.mxu1  ;;  %3457 = vmatpush.bf16.msra.mxu0 %v8638_v27 }
 0x494   :  { %v7910_v19 = vadd.f32 %v7847_v22, %v2566_v16  ;;  %v7913_v14 = vadd.f32 %v7851_v56, %v2595_v44  ;;  %3486 = vmatpush.bf16.msra.mxu1 %v8639_v10 }
 0x496   :  { %3203 = vmatmul.bf16.gmra.mxu0 %v6335_v13  ;;  %3232 = vmatmul.bf16.gmra.mxu1 %v6335_v13 }
 0x497   :  { %3388 = vmatmul.bf16.vlgmr.msrb.gmra.mxu2 %v7557_v15  ;;  %3458 = vmatpush.bf16.msra.mxu0 %v8640_v32 }
 0x498   :  { %3417 = vmatmul.bf16.vlgmr.msrb.gmra.mxu3 %v7557_v15  ;;  %3487 = vmatpush.bf16.msra.mxu1 %v8641_v18 }
 0x49a   :  { %v3027_v61 = vpop.f32.mrf.mxu2 }
 0x49b   :  { %v3056_v48 = vpop.f32.mrf.mxu3  ;;  %v2568_v24 = vpop.f32.mrf.mxu0  ;;  %3459 = vmatpush.bf16.msra.mxu0 %v8642_v62 }
 0x49c   :  { %v2597_v34 = vpop.f32.mrf.mxu1  ;;  %v7924_v22 = vadd.f32 %v7865_v52, %v2568_v24  ;;  %3488 = vmatpush.bf16.msra.mxu1 %v8643_v51 }
 0x49d   :  { %v7927_v56 = vadd.f32 %v7867_v39, %v2597_v34 }
 0x49f   :  { %3460 = vmatpush.bf16.msra.mxu0 %v8644_v7 }
 0x4a0   :  { %3489 = vmatpush.bf16.msra.mxu1 %v7403_v60 }
 0x4a2   :  { %v3029_v63 = vpop.f32.mrf.mxu2 }
 0x4a3   :  { %v3058_v46 = vpop.f32.mrf.mxu3  ;;  %v2571_v59 = vpop.f32.mrf.mxu0  ;;  %3461 = vmatpush.bf16.msra.mxu0 %v7416_v12 }
 0x4a4   :  { %v2600_v26 = vpop.f32.mrf.mxu1  ;;  %v7934_v21 = vadd.f32 %v7873_v43, %v2571_v59  ;;  %3490 = vmatpush.bf16.msra.mxu1 %v7425_v2 }
 0x4a5   :  { %v7937_v52 = vadd.f32 %v7875_v4, %v2600_v26 }
 0x4a6   :  { %3208 = vmatmul.bf16.gmra.mxu0 %v8627_v28  ;;  %3237 = vmatmul.bf16.gmra.mxu1 %v8627_v28 }
 0x4a7   :  { %3393 = vmatmul.bf16.gmra.mxu2 %v7636_v36 }
 0x4a8   :  { %3422 = vmatmul.bf16.gmra.mxu3 %v7636_v36 }
 0x4aa   :  { %v3032_v60 = vpop.f32.mrf.mxu2 }
 0x4ab   :  { %v3061_v39 = vpop.f32.mrf.mxu3  ;;  %v2573_v54 = vpop.f32.mrf.mxu0 }
 0x4ac   :  { %v2602_v43 = vpop.f32.mrf.mxu1  ;;  %v7945_v45 = vadd.f32 %v2711_v38, %v2573_v54 }
 0x4ad   :  { %v7947_v4 = vadd.f32 %v2740_v23, %v2602_v43 }
 0x4b2   :  { %v3034_v17 = vpop.f32.mrf.mxu2 }
 0x4b3   :  { %v3063_v12 = vpop.f32.mrf.mxu3  ;;  %v2576_v50 = vpop.f32.mrf.mxu0 }
 0x4b4   :  { %v2605_v2 = vpop.f32.mrf.mxu1  ;;  %v7949_v3 = vadd.f32 %v2714_v42, %v2576_v50 }
 0x4b5   :  { %v7951_v41 = vadd.f32 %v2743_v9, %v2605_v2 }
 0x4b6   :  { %3213 = vmatmul.bf16.gmra.mxu0 %v8645_v35  ;;  %3242 = vmatmul.bf16.gmra.mxu1 %v8645_v35 }
 0x4b7   :  { %3398 = vmatmul.bf16.gmra.mxu2 %v7701_v20 }
 0x4b8   :  { %3427 = vmatmul.bf16.gmra.mxu3 %v7701_v20 }
 0x4ba   :  { %v3037_v38 = vpop.f32.mrf.mxu2 }
 0x4bb   :  { %v3066_v0 = vpop.f32.mrf.mxu3  ;;  %v2578_v23 = vpop.f32.mrf.mxu0 }
 0x4bc   :  { %v2607_v58 = vpop.f32.mrf.mxu1  ;;  %v7957_v31 = vadd.f32 %v2716_v53, %v2578_v23 }
 0x4bd   :  { %v7959_v5 = vadd.f32 %v2745_v25, %v2607_v58 }
 0x4c2   :  { %v3039_v42 = vpop.f32.mrf.mxu2 }
 0x4c3   :  { %v3068_v1 = vpop.f32.mrf.mxu3  ;;  %v2855_v9 = vpop.f32.mrf.mxu0 }
 0x4c4   :  { %v2884_v29 = vpop.f32.mrf.mxu1  ;;  %v2904_v47 = vadd.f32 %v2855_v9, %v7888_v11 }
 0x4c5   :  { %v2905_v55 = vadd.f32 %v2884_v29, %v7891_v8 }
 0x4c6   :  { %3330 = vmatmul.bf16.vlgmr.msrb.gmra.mxu0 %v7495_v6  ;;  %3359 = vmatmul.bf16.vlgmr.msrb.gmra.mxu1 %v7495_v6  ;;  %v7965_v40 = vadd.f32 %v3027_v61, %v2904_v47 }
 0x4c7   :  { %v7967_v16 = vadd.f32 %v3056_v48, %v2905_v55  ;;  %3403 = vmatmul.bf16.gmra.mxu2 %v7760_v57 }
 0x4c8   :  { %3432 = vmatmul.bf16.gmra.mxu3 %v7760_v57 }
 0x4ca   :  { %v3042_v53 = vpop.f32.mrf.mxu2 }
 0x4cb   :  { %v3071_v25 = vpop.f32.mrf.mxu3  ;;  %v2857_v44 = vpop.f32.mrf.mxu0 }
 0x4cc   :  { %v2886_v27 = vpop.f32.mrf.mxu1  ;;  %v2906_v11 = vadd.f32 %v2857_v44, %v7900_v30 }
 0x4cd   :  { %v2907_v8 = vadd.f32 %v2886_v27, %v7903_v33 }
 0x4ce   :  { %v7973_v10 = vadd.f32 %v3029_v63, %v2906_v11 }
 0x4cf   :  { %v7975_v32 = vadd.f32 %v3058_v46, %v2907_v8 }
 0x4d2   :  { %v3044_v6 = vpop.f32.mrf.mxu2 }
 0x4d3   :  { %v3073_v18 = vpop.f32.mrf.mxu3  ;;  %v2860_v61 = vpop.f32.mrf.mxu0 }
 0x4d4   :  { %v2889_v48 = vpop.f32.mrf.mxu1  ;;  %v2908_v24 = vadd.f32 %v2860_v61, %v7910_v19 }
 0x4d5   :  { %v2909_v34 = vadd.f32 %v2889_v48, %v7913_v14 }
 0x4d6   :  { %3335 = vmatmul.bf16.gmra.mxu0 %v7557_v15  ;;  %3364 = vmatmul.bf16.gmra.mxu1 %v7557_v15  ;;  %v7981_v62 = vadd.f32 %v3032_v60, %v2908_v24 }
 0x4d7   :  { %v7983_v30 = vadd.f32 %v3061_v39, %v2909_v34  ;;  %3537 = vmatmul.bf16.vlgmr.msra.gmra.mxu2 %v7636_v36 }
 0x4d8   :  { %3566 = vmatmul.bf16.vlgmr.msra.gmra.mxu3 %v7636_v36 }
 0x4da   :  { %v7987_v33 = vpop.f32.mrf.mxu2 }
 0x4db   :  { %v7989_v51 = vpop.f32.mrf.mxu3  ;;  %v2862_v7 = vpop.f32.mrf.mxu0 }
 0x4dc   :  { %v2891_v19 = vpop.f32.mrf.mxu1  ;;  %v2910_v14 = vadd.f32 %v2862_v7, %v7924_v22 }
 0x4dd   :  { %v2911_v63 = vadd.f32 %v2891_v19, %v7927_v56 }
 0x4de   :  { %v7993_v46 = vadd.f32 %v3034_v17, %v2910_v14 }
 0x4df   :  { %v7995_v15 = vadd.f32 %v3063_v12, %v2911_v63 }
 0x4e2   :  { %v7997_v59 = vpop.f32.mrf.mxu2 }
 0x4e3   :  { %v7999_v26 = vpop.f32.mrf.mxu3  ;;  %v2865_v60 = vpop.f32.mrf.mxu0 }
 0x4e4   :  { %v2894_v39 = vpop.f32.mrf.mxu1  ;;  %v2912_v54 = vadd.f32 %v2865_v60, %v7934_v21 }
 0x4e5   :  { %v2913_v43 = vadd.f32 %v2894_v39, %v7937_v52 }
 0x4e6   :  { %3340 = vmatmul.bf16.gmra.mxu0 %v7636_v36  ;;  %3369 = vmatmul.bf16.gmra.mxu1 %v7636_v36  ;;  %v3084_v22 = vadd.f32 %v3037_v38, %v2912_v54 }
 0x4e7   :  { %v3085_v56 = vadd.f32 %v3066_v0, %v2913_v43  ;;  %3542 = vmatmul.bf16.gmra.mxu2 %v7701_v20 }
 0x4e8   :  { %3571 = vmatmul.bf16.gmra.mxu3 %v7701_v20 }
 0x4ea   :  { %v8007_v17 = vpop.f32.mrf.mxu2 }
 0x4eb   :  { %v8009_v12 = vpop.f32.mrf.mxu3  ;;  %v2867_v50 = vpop.f32.mrf.mxu0 }
 0x4ec   :  { %v2896_v2 = vpop.f32.mrf.mxu1  ;;  %v2914_v21 = vadd.f32 %v2867_v50, %v7945_v45 }
 0x4ed   :  { %v2915_v52 = vadd.f32 %v2896_v2, %v7947_v4 }
 0x4ee   :  { %v3086_v23 = vadd.f32 %v3039_v42, %v2914_v21 }
 0x4ef   :  { %v3087_v58 = vadd.f32 %v3068_v1, %v2915_v52 }
 0x4f2   :  { %v8013_v38 = vpop.f32.mrf.mxu2 }
 0x4f3   :  { %v2870_v9 = vpop.f32.mrf.mxu0  ;;  %v8015_v0 = vpop.f32.mrf.mxu3 }
 0x4f4   :  { %v2899_v36 = vpop.f32.mrf.mxu1  ;;  %v2916_v29 = vadd.f32 %v2870_v9, %v7949_v3 }
 0x4f5   :  { %v2917_v47 = vadd.f32 %v2899_v36, %v7951_v41 }
 0x4f6   :  { %3345 = vmatmul.bf16.gmra.mxu0 %v7701_v20  ;;  %3374 = vmatmul.bf16.gmra.mxu1 %v7701_v20  ;;  %v3088_v55 = vadd.f32 %v3042_v53, %v2916_v29 }
 0x4f7   :  { %v3089_v45 = vadd.f32 %v3071_v25, %v2917_v47  ;;  %3547 = vmatmul.bf16.gmra.mxu2 %v7760_v57 }
 0x4f8   :  { %3576 = vmatmul.bf16.gmra.mxu3 %v7760_v57 }
 0x4fa   :  { %v8025_v27 = vpop.f32.mrf.mxu2 }
 0x4fb   :  { %v2872_v4 = vpop.f32.mrf.mxu0  ;;  %v8027_v3 = vpop.f32.mrf.mxu3 }
 0x4fc   :  { %v2901_v42 = vpop.f32.mrf.mxu1  ;;  %v2918_v1 = vadd.f32 %v2872_v4, %v7957_v31 }
 0x4fd   :  { %v2919_v44 = vadd.f32 %v2901_v42, %v7959_v5 }
 0x4fe   :  { %v3090_v41 = vadd.f32 %v3044_v6, %v2918_v1 }
 0x4ff   :  { %v3091_v11 = vadd.f32 %v3073_v18, %v2919_v44 }
 0x502   :  { %v8039_v57 = vpop.f32.mrf.mxu2 }
 0x503   :  { %v3199_v8 = vpop.f32.mrf.mxu0  ;;  %v8041_v31 = vpop.f32.mrf.mxu3 }
 0x504   :  { %v3228_v20 = vpop.f32.mrf.mxu1  ;;  %v8030_v53 = vadd.f32 %v3199_v8, %v7965_v40 }
 0x505   :  { %v8033_v25 = vadd.f32 %v3228_v20, %v7967_v16 }
 0x506   :  { %3462 = vmatmul.bf16.vlgmr.msra.gmra.mxu0 %v8614_v49  ;;  %3491 = vmatmul.bf16.vlgmr.msra.gmra.mxu1 %v8614_v49 }
 0x507   :  { %3552 = vmatmul.bf16.gmra.mxu2 %v7807_v37 }
 0x508   :  { %3581 = vmatmul.bf16.gmra.mxu3 %v7807_v37 }
 0x50a   :  { %v8047_v40 = vpop.f32.mrf.mxu2 }
 0x50b   :  { %v8043_v5 = vpop.f32.mrf.mxu0  ;;  %v8049_v16 = vpop.f32.mrf.mxu3 }
 0x50c   :  { %v8045_v6 = vpop.f32.mrf.mxu1 }
 0x512   :  { %v8061_v34 = vpop.f32.mrf.mxu2 }
 0x513   :  { %v3204_v18 = vpop.f32.mrf.mxu0  ;;  %v8063_v7 = vpop.f32.mrf.mxu3 }
 0x514   :  { %v3233_v61 = vpop.f32.mrf.mxu1  ;;  %v8052_v49 = vadd.f32 %v3204_v18, %v7981_v62 }
 0x515   :  { %v8055_v48 = vadd.f32 %v3233_v61, %v7983_v30 }
 0x516   :  { %3467 = vmatmul.bf16.gmra.mxu0 %v6335_v13  ;;  %3496 = vmatmul.bf16.gmra.mxu1 %v6335_v13 }
 0x51a   :  { %v3389_v60 = vpop.f32.mrf.mxu2 }
 0x51b   :  { %v8059_v37 = vpop.f32.mrf.mxu0  ;;  %v3418_v39 = vpop.f32.mrf.mxu3 }
 0x51c   :  { %v3235_v24 = vpop.f32.mrf.mxu1 }
 0x51d   :  { %v8066_v19 = vadd.f32 %v3235_v24, %v7995_v15 }
 0x522   :  { %v8078_v15 = vpop.f32.mrf.mxu2 }
 0x523   :  { %v3209_v14 = vpop.f32.mrf.mxu0  ;;  %v8080_v2 = vpop.f32.mrf.mxu3 }
 0x524   :  { %v3238_v62 = vpop.f32.mrf.mxu1  ;;  %v8068_v63 = vadd.f32 %v3209_v14, %v3084_v22 }
 0x525   :  { %v8070_v30 = vadd.f32 %v3238_v62, %v3085_v56 }
 0x526   :  { %3472 = vmatmul.bf16.gmra.mxu0 %v8627_v28  ;;  %3501 = vmatmul.bf16.gmra.mxu1 %v8627_v28 }
 0x52a   :  { %v3394_v28 = vpop.f32.mrf.mxu2 }
 0x52b   :  { %v3211_v13 = vpop.f32.mrf.mxu0  ;;  %v3423_v9 = vpop.f32.mrf.mxu3 }
 0x52c   :  { %v3240_v54 = vpop.f32.mrf.mxu1  ;;  %v8074_v43 = vadd.f32 %v3211_v13, %v3086_v23 }
 0x52d   :  { %v8076_v50 = vadd.f32 %v3240_v54, %v3087_v58 }
 0x532   :  { %v8092_v42 = vpop.f32.mrf.mxu2 }
 0x533   :  { %v3214_v22 = vpop.f32.mrf.mxu0 }
 0x534   :  { %v3243_v21 = vpop.f32.mrf.mxu1  ;;  %v8082_v56 = vadd.f32 %v3214_v22, %v3088_v55  ;;  %v8094_v55 = vpop.f32.mrf.mxu3 }
 0x535   :  { %v8084_v52 = vadd.f32 %v3243_v21, %v3089_v45  ;;  %v5165_v21 = vld [vmem:[%s8334_s5 + $0x28] sm:$0xff] }
 0x536   :  { %3477 = vmatmul.bf16.gmra.mxu0 %v8645_v35  ;;  %3506 = vmatmul.bf16.gmra.mxu1 %v8645_v35 }
 0x53b   :  { %v3216_v23 = vpop.f32.mrf.mxu0 }
 0x53c   :  { %v3245_v36 = vpop.f32.mrf.mxu1  ;;  %v8088_v58 = vadd.f32 %v3216_v23, %v3090_v41  ;;  %v3428_v20 = vpop.f32.mrf.mxu3 }
 0x53d   :  { %v8090_v29 = vadd.f32 %v3245_v36, %v3091_v11  ;;  %v3399_v11 = vpop.f32.mrf.mxu2 }
 0x53e   :  { %8646 = vst [vmem:[#allocation21_spill] sm:$0xff] %v8088_v58  ;;  %v5168_v58 = vld [vmem:[%s8334_s5 + $0x40] sm:$0xff] }
 0x53f   :  { %8647 = vst [vmem:[#allocation43_spill] sm:$0xff] %v8090_v29 }
 0x543   :  { %v3331_v47 = vpop.f32.mrf.mxu0 }
 0x544   :  { %v3360_v4 = vpop.f32.mrf.mxu1  ;;  %v3332_v45 = vadd.f32 %v3331_v47, %v7987_v33  ;;  %v5164_v47 = vld [vmem:[%s8334_s5 + $0x20] sm:$0xff] }
 0x545   :  { %v3361_v1 = vadd.f32 %v3360_v4, %v7989_v51  ;;  %v8112_v51 = vpop.f32.mrf.mxu2 }
 0x546   :  { %v8098_v44 = vadd.f32 %v3389_v60, %v3332_v45  ;;  %v8114_v60 = vpop.f32.mrf.mxu3 }
 0x547   :  { %v8100_v35 = vadd.f32 %v3418_v39, %v3361_v1  ;;  %v5167_v39 = vld [vmem:[%s8334_s5 + $0x38] sm:$0xff] }
 0x548   :  { %3911 = vmatpush.bf16.msrb.mxu0 %v5167_v39  ;;  %v5163_v1 = vld [vmem:[%s8334_s5 + $0x18] sm:$0xff]  ;;  %v5174_v39 = vld [vmem:[%s8334_s5 + $0x70] sm:$0xff] }
 0x54b   :  { %v8102_v8 = vpop.f32.mrf.mxu0 }
 0x54c   :  { %v8104_v41 = vpop.f32.mrf.mxu1 }
 0x54d   :  { %v3363_v29 = vadd.f32 %v8104_v41, %v7999_v26 }
 0x54e   :  { %v3433_v22 = vpop.f32.mrf.mxu3 }
 0x553   :  { %v3336_v18 = vpop.f32.mrf.mxu0 }
 0x554   :  { %v3365_v61 = vpop.f32.mrf.mxu1  ;;  %v3337_v24 = vadd.f32 %v3336_v18, %v8007_v17  ;;  %v5166_v17 = vld [vmem:[%s8334_s5 + $0x30] sm:$0xff] }
 0x555   :  { %v3366_v14 = vadd.f32 %v3365_v61, %v8009_v12  ;;  %3912 = vmatpush.bf16.msrb.mxu0 %v5166_v17  ;;  %v3404_v12 = vpop.f32.mrf.mxu2  ;;  %v5161_v17 = vld [vmem:[%s8334_s5 + $0x8] sm:$0xff] }
 0x556   :  { %v8108_v62 = vadd.f32 %v3394_v28, %v3337_v24  ;;  %v8150_v24 = vpop.f32.mrf.mxu3 }
 0x557   :  { %v8110_v33 = vadd.f32 %v3423_v9, %v3366_v14  ;;  %v5162_v14 = vld [vmem:[%s8334_s5 + $0x10] sm:$0xff] }
 0x559   :  { %3913 = vmatpush.bf16.msrb.mxu0 %v5165_v21  ;;  %v5173_v21 = vld [vmem:[%s8334_s5 + $0x68] sm:$0xff] }
 0x55b   :  { %v8119_v13 = vpop.f32.mrf.mxu0 }
 0x55c   :  { %v8121_v54 = vpop.f32.mrf.mxu1 }
 0x55d   :  { %3914 = vmatpush.bf16.msrb.mxu0 %v5164_v47  ;;  %v8148_v61 = vpop.f32.mrf.mxu2 }
 0x561   :  { %3915 = vmatpush.bf16.msrb.mxu0 %v5163_v1  ;;  %v3567_v1 = vpop.f32.mrf.mxu3 }
 0x563   :  { %v3341_v28 = vpop.f32.mrf.mxu0 }
 0x564   :  { %v3370_v9 = vpop.f32.mrf.mxu1  ;;  %v3342_v23 = vadd.f32 %v3341_v28, %v8025_v27  ;;  %v5175_v27 = vld [vmem:[%s8334_s5 + $0x78] sm:$0xff] }
 0x565   :  { %v3371_v36 = vadd.f32 %v3370_v9, %v8027_v3  ;;  %3925 = vmatpush.bf16.msrb.mxu1 %v5175_v27  ;;  %3916 = vmatpush.bf16.msrb.mxu0 %v5162_v14  ;;  %v3538_v47 = vpop.f32.mrf.mxu2  ;;  %v5160_v27 = vld [vmem:[%s8334_s5] sm:$0xff] }
 0x566   :  { %v8134_v4 = vadd.f32 %v3399_v11, %v3342_v23  ;;  %v5183_v11 = vld [vmem:[%s8334_s5 + $0xb8] sm:$0xff] }
 0x567   :  { %v8136_v45 = vadd.f32 %v3428_v20, %v3371_v36  ;;  %v5191_v20 = vld [vmem:[%s8334_s5 + $0xf8] sm:$0xff]  ;;  %3939 = vmatpush.bf16.msrb.mxu2 %v5183_v11  ;;  %v5172_v11 = vld [vmem:[%s8334_s5 + $0x60] sm:$0xff] }
 0x568   :  { %3953 = vmatpush.bf16.msrb.mxu3 %v5191_v20 }
 0x569   :  { %3926 = vmatpush.bf16.msrb.mxu1 %v5174_v39  ;;  %3917 = vmatpush.bf16.msrb.mxu0 %v5161_v17  ;;  %v5171_v39 = vld [vmem:[%s8334_s5 + $0x58] sm:$0xff]  ;;  %v5181_v17 = vld [vmem:[%s8334_s5 + $0xa8] sm:$0xff] }
 0x56b   :  { %v8144_v18 = vpop.f32.mrf.mxu0 }
 0x56c   :  { %v8146_v3 = vpop.f32.mrf.mxu1 }
 0x56d   :  { %3927 = vmatpush.bf16.msrb.mxu1 %v5173_v21  ;;  %3918 = vmatpush.bf16.msrb.mxu0 %v5160_v27  ;;  %v5189_v21 = vld [vmem:[%s8334_s5 + $0xe8] sm:$0xff] }
 0x571   :  { %3928 = vmatpush.bf16.msrb.mxu1 %v5172_v11 }
 0x573   :  { %v3346_v28 = vpop.f32.mrf.mxu0 }
 0x574   :  { %v3375_v9 = vpop.f32.mrf.mxu1  ;;  %v3347_v23 = vadd.f32 %v3346_v28, %v8047_v40  ;;  %v5182_v40 = vld [vmem:[%s8334_s5 + $0xb0] sm:$0xff] }
 0x575   :  { %v3376_v36 = vadd.f32 %v3375_v9, %v8049_v16  ;;  %v5190_v16 = vld [vmem:[%s8334_s5 + $0xf0] sm:$0xff]  ;;  %3940 = vmatpush.bf16.msrb.mxu2 %v5182_v40  ;;  %3929 = vmatpush.bf16.msrb.mxu1 %v5171_v39  ;;  %v3540_v9 = vpop.f32.mrf.mxu2  ;;  %v3334_v39 = vadd.f32 %v8102_v8, %v7997_v59  ;;  %v5188_v59 = vld [vmem:[%s8334_s5 + $0xe0] sm:$0xff] }
 0x576   :  { %v8178_v20 = vadd.f32 %v3404_v12, %v3347_v23  ;;  %3954 = vmatpush.bf16.msrb.mxu3 %v5190_v16  ;;  %v5170_v28 = vld [vmem:[%s8334_s5 + $0x50] sm:$0xff]  ;;  %v3569_v23 = vpop.f32.mrf.mxu3 }
 0x577   :  { %v8180_v14 = vadd.f32 %v3433_v22, %v3376_v36  ;;  %v5169_v36 = vld [vmem:[%s8334_s5 + $0x48] sm:$0xff] }
 0x579   :  { %3941 = vmatpush.bf16.msrb.mxu2 %v5181_v17  ;;  %3930 = vmatpush.bf16.msrb.mxu1 %v5170_v28  ;;  %v5180_v28 = vld [vmem:[%s8334_s5 + $0xa0] sm:$0xff] }
 0x57a   :  { %3955 = vmatpush.bf16.msrb.mxu3 %v5189_v21 }
 0x57b   :  { %v8191_v12 = vpop.f32.mrf.mxu0 }
 0x57c   :  { %v8193_v22 = vpop.f32.mrf.mxu1 }
 0x57d   :  { %3931 = vmatpush.bf16.msrb.mxu1 %v5169_v36  ;;  %3942 = vmatpush.bf16.msrb.mxu2 %v5180_v28  ;;  %v3543_v26 = vpop.f32.mrf.mxu2 }
 0x57e   :  { %v3572_v8 = vpop.f32.mrf.mxu3  ;;  %3956 = vmatpush.bf16.msrb.mxu3 %v5188_v59 }
 0x581   :  { %3932 = vmatpush.bf16.msrb.mxu1 %v5168_v58  ;;  %v3250_v58 = vadd.f32 %v8043_v5, %v7973_v10 }
 0x583   :  { %v3463_v27 = vpop.f32.mrf.mxu0 }
 0x584   :  { %v3492_v11 = vpop.f32.mrf.mxu1  ;;  %v3512_v40 = vadd.f32 %v3463_v27, %v8098_v44 }
 0x585   :  { %v3513_v16 = vadd.f32 %v3492_v11, %v8100_v35 }
 0x586   :  { %v3587_v17 = vadd.f32 %v3538_v47, %v3512_v40  ;;  %v3440_v47 = vadd.f32 %v8078_v15, %v3334_v39  ;;  %v3251_v40 = vadd.f32 %v8045_v6, %v7975_v32  ;;  %v8236_v15 = vld [vmem:[%s8332_s4] ss:$0 sm:$0xff]  ;;  %v5178_v39 = vld [vmem:[%s8334_s5 + $0x90] sm:$0xff]  ;;  %v5177_v6 = vld [vmem:[%s8334_s5 + $0x88] sm:$0xff]  ;;  %v3574_v28 = vpop.f32.mrf.mxu3 }
 0x587   :  { %v3588_v21 = vadd.f32 %v3567_v1, %v3513_v16  ;;  %v3441_v1 = vadd.f32 %v8080_v2, %v3363_v29  ;;  %v5187_v16 = vld [vmem:[%s8334_s5 + $0xd8] sm:$0xff] }
 0x588   :  { %v3603_v44 = vmax.f32 %v8030_v53, %v3587_v17  ;;  %v5179_v53 = vld [vmem:[%s8334_s5 + $0x98] sm:$0xff]  ;;  %3957 = vmatpush.bf16.msrb.mxu3 %v5187_v16 }
 0x589   :  { %v3604_v35 = vmax.f32 %v8033_v25, %v3588_v21  ;;  %3943 = vmatpush.bf16.msrb.mxu2 %v5179_v53  ;;  %v3545_v21 = vpop.f32.mrf.mxu2 }
 0x58b   :  { %v3619_v41 = vmax.f32 %v3603_v44, %v3604_v35  ;;  %v3465_v36 = vpop.f32.mrf.mxu0 }
 0x58c   :  { %v3494_v25 = vpop.f32.mrf.mxu1  ;;  %v3514_v27 = vadd.f32 %v3465_v36, %v3440_v47  ;;  %v3339_v47 = vadd.f32 %v8119_v13, %v8013_v38  ;;  %v5186_v38 = vld [vmem:[%s8334_s5 + $0xd0] sm:$0xff] }
 0x58d   :  { %v3515_v11 = vadd.f32 %v3494_v25, %v3441_v1  ;;  %3944 = vmatpush.bf16.msrb.mxu2 %v5178_v39  ;;  %v3631_v32 = vadd.f32 %v8236_v15, %v3619_v41  ;;  %v3368_v41 = vadd.f32 %v8121_v54, %v8015_v0  ;;  %3958 = vmatpush.bf16.msrb.mxu3 %v5186_v38  ;;  %v5185_v39 = vld [vmem:[%s8334_s5 + $0xc8] sm:$0xff] }
 0x58e   :  { %v3589_v2 = vadd.f32 %v3540_v9, %v3514_v27  ;;  %v5176_v27 = vld [vmem:[%s8334_s5 + $0x80] sm:$0xff]  ;;  %v3444_v0 = vadd.f32 %v8092_v42, %v3339_v47 }
 0x58f   :  { %v3590_v29 = vadd.f32 %v3569_v23, %v3515_v11  ;;  %v3639_v1 = vmax.f32 %v3631_v32, 0.0  ;;  %v3445_v54 = vadd.f32 %v8094_v55, %v3368_v41 }
 0x590   :  { %v3605_v17 = vmax.f32 %v3250_v58, %v3589_v2  ;;  %v3577_v2 = vpop.f32.mrf.mxu3 }
 0x591   :  { %v3606_v10 = vmax.f32 %v3251_v40, %v3590_v29  ;;  %3945 = vmatpush.bf16.msrb.mxu2 %v5177_v6  ;;  %3959 = vmatpush.bf16.msrb.mxu3 %v5185_v39 }
 0x593   :  { %v3620_v5 = vmax.f32 %v3605_v17, %v3606_v10  ;;  %v3468_v9 = vpop.f32.mrf.mxu0 }
 0x594   :  { %v3497_v23 = vpop.f32.mrf.mxu1  ;;  %v3516_v35 = vadd.f32 %v3468_v9, %v8108_v62  ;;  %v3344_v9 = vadd.f32 %v8144_v18, %v8039_v57 }
 0x595   :  { %v3632_v44 = vadd.f32 %v8236_v15, %v3620_v5  ;;  %v3517_v59 = vadd.f32 %v3497_v23, %v8110_v33  ;;  %3946 = vmatpush.bf16.msrb.mxu2 %v5176_v27  ;;  %v3373_v23 = vadd.f32 %v8146_v3, %v8041_v31 }
 0x596   :  { %v3591_v36 = vadd.f32 %v3543_v26, %v3516_v35  ;;  %v5184_v35 = vld [vmem:[%s8334_s5 + $0xc0] sm:$0xff]  ;;  %v3448_v31 = vadd.f32 %v8112_v51, %v3344_v9  ;;  %v5194_v9 = vld [vmem:[%s8336_s7 + $0x10] sm:$0xff] }
 0x597   :  { %v3640_v53 = vmax.f32 %v3632_v44, 0.0  ;;  %v3592_v25 = vadd.f32 %v3572_v8, %v3517_v59  ;;  %3960 = vmatpush.bf16.msrb.mxu3 %v5184_v35  ;;  %v3449_v18 = vadd.f32 %v8114_v60, %v3373_v23  ;;  %v5193_v23 = vld [vmem:[%s8336_s7 + $0x8] sm:$0xff] }
 0x598   :  { %v3607_v62 = vmax.f32 %v8052_v49, %v3591_v36  ;;  %v3254_v49 = vadd.f32 %v8059_v37, %v7993_v46  ;;  %v3579_v47 = vpop.f32.mrf.mxu3 }
 0x599   :  { %v3647_v11 = vpack.c.bf16 %v3640_v53, %v3639_v1  ;;  %v3608_v33 = vmax.f32 %v8055_v48, %v3592_v25  ;;  %v3548_v48 = vpop.f32.mrf.mxu2 }
 0x59b   :  { %v3621_v13 = vmax.f32 %v3607_v62, %v3608_v33  ;;  %3919 = vmatmul.bf16.vlgmr.msrb.gmra.mxu0 %v3647_v11  ;;  %v3470_v26 = vpop.f32.mrf.mxu0 }
 0x59c   :  { %v3499_v8 = vpop.f32.mrf.mxu1  ;;  %v3518_v58 = vadd.f32 %v3470_v26, %v3444_v0  ;;  %v3349_v26 = vadd.f32 %v8191_v12, %v8061_v34 }
 0x59d   :  { %v3519_v40 = vadd.f32 %v3499_v8, %v3445_v54  ;;  %v3633_v55 = vadd.f32 %v8236_v15, %v3621_v13 }
 0x59e   :  { %v3593_v29 = vadd.f32 %v3545_v21, %v3518_v58 }
 0x59f   :  { %v3594_v16 = vadd.f32 %v3574_v28, %v3519_v40  ;;  %v3641_v21 = vmax.f32 %v3633_v55, 0.0  ;;  %v8648_v55 = vld [vmem:[#allocation21_spill] sm:$0xff] }
 0x5a0   :  { %v3609_v17 = vmax.f32 %v3254_v49, %v3593_v29  ;;  %v3582_v33 = vpop.f32.mrf.mxu3 }
 0x5a1   :  { %v3610_v42 = vmax.f32 %v8066_v19, %v3594_v16  ;;  %v3550_v59 = vpop.f32.mrf.mxu2 }
 0x5a3   :  { %v3622_v10 = vmax.f32 %v3609_v17, %v3610_v42  ;;  %v3473_v32 = vpop.f32.mrf.mxu0 }
 0x5a4   :  { %v3502_v5 = vpop.f32.mrf.mxu1  ;;  %v3520_v46 = vadd.f32 %v3473_v32, %v8134_v4  ;;  %v8649_v32 = vld [vmem:[#allocation43_spill] sm:$0xff] }
 0x5a5   :  { %v3634_v6 = vadd.f32 %v8236_v15, %v3622_v10  ;;  %v3521_v37 = vadd.f32 %v3502_v5, %v8136_v45 }
 0x5a6   :  { %v3595_v28 = vadd.f32 %v3548_v48, %v3520_v46 }
 0x5a7   :  { %v3642_v19 = vmax.f32 %v3634_v6, 0.0  ;;  %v3596_v44 = vadd.f32 %v3577_v2, %v3521_v37  ;;  %v5195_v37 = vld [vmem:[%s8336_s7 + $0x18] sm:$0xff] }
 0x5a8   :  { %v3611_v4 = vmax.f32 %v8068_v63, %v3595_v28  ;;  %4014 = vmatpush.bf16.msra.mxu0 %v5195_v37 }
 0x5a9   :  { %v3648_v41 = vpack.c.bf16 %v3642_v19, %v3641_v21  ;;  %v3612_v45 = vmax.f32 %v8070_v30, %v3596_v44  ;;  %v3553_v63 = vpop.f32.mrf.mxu2  ;;  %v5198_v44 = vld [vmem:[%s8333_s6] ss:$0 sm:$0xff] }
 0x5ab   :  { %v3623_v57 = vmax.f32 %v3611_v4, %v3612_v45  ;;  %3933 = vmatmul.bf16.vlgmr.msrb.gmra.mxu1 %v3648_v41  ;;  %v3475_v3 = vpop.f32.mrf.mxu0 }
 0x5ac   :  { %v3504_v1 = vpop.f32.mrf.mxu1  ;;  %v3522_v53 = vadd.f32 %v3475_v3, %v3448_v31  ;;  %4015 = vmatpush.bf16.msra.mxu0 %v5194_v9 }
 0x5ad   :  { %v3523_v36 = vadd.f32 %v3504_v1, %v3449_v18  ;;  %v3635_v30 = vadd.f32 %v8236_v15, %v3623_v57 }
 0x5ae   :  { %v3597_v25 = vadd.f32 %v3550_v59, %v3522_v53 }
 0x5af   :  { %v3598_v27 = vadd.f32 %v3579_v47, %v3523_v36 }
 0x5b0   :  { %v3613_v11 = vmax.f32 %v8074_v43, %v3597_v25  ;;  %v3378_v43 = vadd.f32 %v8193_v22, %v8063_v7  ;;  %v3584_v22 = vpop.f32.mrf.mxu3  ;;  %4016 = vmatpush.bf16.msra.mxu0 %v5193_v23 }
 0x5b1   :  { %v3614_v62 = vmax.f32 %v8076_v50, %v3598_v27  ;;  %v3643_v50 = vmax.f32 %v3635_v30, 0.0  ;;  %v3555_v7 = vpop.f32.mrf.mxu2 }
 0x5b3   :  { %v3624_v38 = vmax.f32 %v3613_v11, %v3614_v62  ;;  %v3478_v13 = vpop.f32.mrf.mxu0  ;;  %v4024_v62 = vlaneseq }
 0x5b4   :  { %v3507_v0 = vpop.f32.mrf.mxu1  ;;  %v3524_v60 = vadd.f32 %v3478_v13, %v8178_v20  ;;  %v3452_v20 = vadd.f32 %v8148_v61, %v3349_v26 }
 0x5b5   :  { %v3636_v51 = vadd.f32 %v8236_v15, %v3624_v38  ;;  %v3525_v54 = vadd.f32 %v3507_v0, %v8180_v14  ;;  %v3453_v14 = vadd.f32 %v8150_v24, %v3378_v43 }
 0x5b6   :  { %v3599_v58 = vadd.f32 %v3553_v63, %v3524_v60  ;;  %v4025_v63 = vand.u32 127, %v4024_v62 }
 0x5b7   :  { %v3644_v8 = vmax.f32 %v3636_v51, 0.0  ;;  %v3600_v40 = vadd.f32 %v3582_v33, %v3525_v54  ;;  %v5199_v33 = vld [vmem:[%s8335_s8] ss:$0 sm:$0xff] }
 0x5b8   :  { %v3615_v48 = vmax.f32 %v8082_v56, %v3599_v58  ;;  %vm4026_vm3 = vcmp.lt.s32.totalorder %v4025_v63, 10 }
 0x5b9   :  { %v3649_v49 = vpack.c.bf16 %v3644_v8, %v3643_v50  ;;  %v3616_v2 = vmax.f32 %v8084_v52, %v3600_v40 }
 0x5bb   :  { %v3625_v29 = vmax.f32 %v3615_v48, %v3616_v2  ;;  %3947 = vmatmul.bf16.vlgmr.msrb.gmra.mxu2 %v3649_v49  ;;  %v3480_v16 = vpop.f32.mrf.mxu0 }
 0x5bc   :  { %v3509_v34 = vpop.f32.mrf.mxu1  ;;  %v3526_v12 = vadd.f32 %v3480_v16, %v3452_v20 }
 0x5bd   :  { %v3527_v39 = vadd.f32 %v3509_v34, %v3453_v14  ;;  %v3637_v52 = vadd.f32 %v8236_v15, %v3625_v29 }
 0x5be   :  { %v3601_v17 = vadd.f32 %v3555_v7, %v3526_v12 }
 0x5bf   :  { %v3602_v42 = vadd.f32 %v3584_v22, %v3527_v39  ;;  %v3645_v61 = vmax.f32 %v3637_v52, 0.0 }
 0x5c0   :  { %v3617_v10 = vmax.f32 %v8648_v55, %v3601_v17 }
 0x5c1   :  { %v3618_v56 = vmax.f32 %v8649_v32, %v3602_v42 }
 0x5c3   :  { %v3626_v5 = vmax.f32 %v3617_v10, %v3618_v56 }
 0x5c5   :  { %v3638_v6 = vadd.f32 %v8236_v15, %v3626_v5  ;;  %v5192_v15 = vld [vmem:[%s8336_s7] sm:$0xff] }
 0x5c6   :  { %4017 = vmatpush.bf16.msra.mxu0 %v5192_v15 }
 0x5c7   :  { %v3646_v46 = vmax.f32 %v3638_v6, 0.0 }
 0x5c9   :  { %v3650_v24 = vpack.c.bf16 %v3646_v46, %v3645_v61 }
 0x5cb   :  { %3961 = vmatmul.bf16.vlgmr.msrb.gmra.mxu3 %v3650_v24 }
 0x618   :  { %v3920_v21 = vpop.f32.mrf.mxu0 }
 0x619   :  { %v3921_v47 = vadd.f32 %v5198_v44, %v3920_v21 }
 0x620   :  { %v3922_v35 = vpop.f32.mrf.mxu0 }
 0x621   :  { %v3923_v4 = vadd.f32 %v5198_v44, %v3922_v35 }
 0x628   :  { %v3934_v19 = vpop.f32.mrf.mxu1 }
 0x629   :  { %v3935_v45 = vadd.f32 %v3934_v19, %v3921_v47 }
 0x630   :  { %v3936_v41 = vpop.f32.mrf.mxu1 }
 0x631   :  { %v3937_v31 = vadd.f32 %v3936_v41, %v3923_v4 }
 0x63e   :  { %v3948_v28 = vpop.f32.mrf.mxu2 }
 0x63f   :  { %v3949_v18 = vadd.f32 %v3948_v28, %v3935_v45 }
 0x646   :  { %v3950_v57 = vpop.f32.mrf.mxu2 }
 0x647   :  { %v3951_v3 = vadd.f32 %v3950_v57, %v3937_v31 }
 0x64e   :  { %v3962_v59 = vpop.f32.mrf.mxu3 }
 0x64f   :  { %v3963_v1 = vadd.f32 %v3962_v59, %v3949_v18 }
 0x651   :  { %v3967_v25 = vmax.f32 %v3963_v1, 0.0 }
 0x656   :  { %v3964_v53 = vpop.f32.mrf.mxu3 }
 0x657   :  { %v3965_v36 = vadd.f32 %v3964_v53, %v3951_v3 }
 0x659   :  { %v3968_v27 = vmax.f32 %v3965_v36, 0.0 }
 0x65b   :  { %v3969_v11 = vpack.c.bf16 %v3968_v27, %v3967_v25 }
 0x65d   :  { %5031 = vmatmul.msk.bf16.vlgmr.msra.gmra.mxu0 %vm4006_vm2, %v3969_v11 }
 0x6da   :  { %v4019_v30 = vpop.f32.mrf.mxu0 }
 0x6db   :  { %v4020_v38 = vadd.f32 %v5199_v33, %v4019_v30 }
 0x6dd   :  { %v4027_v13 = vsel %vm4026_vm3, %v4020_v38, -1e+30 }
 0x6de   :  { %4029 = vmax.xlane.f32.xlu0 %v4027_v13 }
 0x6e2   :  { %v4021_v0 = vpop.f32.mrf.mxu0 }
 0x6e3   :  { %v4022_v51 = vadd.f32 %v5199_v33, %v4021_v0 }
 0x6e5   :  { %v4028_v60 = vsel %vm4026_vm3, %v4022_v51, -1e+30 }
 0x6e6   :  { %4031 = vmax.xlane.f32.xlu0 %v4028_v60 }
 0x751   :  { %v4030_v54 = vpop.xlane.xlu0 %4029 }
 0x752   :  { %v4033_v26 = vsub.f32 %v4027_v13, %v4030_v54 }
 0x754   :  { %v4035_v43 = vmul.f32 1.442695, %v4033_v26 }
 0x756   :  { %5200 = vpow2.f32 %v4035_v43 }
 0x759   :  { %v4032_v50 = vpop.xlane.xlu0 %4031 }
 0x75a   :  { %v4034_v8 = vsub.f32 %v4028_v60, %v4032_v50 }
 0x75c   :  { %v5201_v58 = vpop.eup %5200  ;;  %v4037_v40 = vmul.f32 1.442695, %v4034_v8 }
 0x75d   :  { %4039 = vadd.xlane.f32.xlu1 %v5201_v58 }
 0x75e   :  { %5202 = vpow2.f32 %v4037_v40 }
 0x764   :  { %v5203_v49 = vpop.eup %5202 }
 0x765   :  { %4041 = vadd.xlane.f32.xlu1 %v5203_v49 }
 0x7d0   :  { %v4040_v48 = vpop.xlane.xlu1 %4039 }
 0x7d1   :  { %5204 = vlog2.f32 %v4040_v48 }
 0x7d7   :  { %v5205_v2 = vpop.eup %5204 }
 0x7d8   :  { %v4044_v29 = vmul.f32 0.6931472, %v5205_v2  ;;  %v4042_v20 = vpop.xlane.xlu1 %4041 }
 0x7d9   :  { %5206 = vlog2.f32 %v4042_v20 }
 0x7da   :  { %v4047_v14 = vsub.f32 %v4033_v26, %v4044_v29 }
 0x7dc   :  { %4049 = vst [vmem:[%s8337_s9] sm:$0xff] %v4047_v14 }
 0x7df   :  { %v5207_v16 = vpop.eup %5206 }
 0x7e0   :  { %v4046_v34 = vmul.f32 0.6931472, %v5207_v16 }
 0x7e2   :  { %v4048_v12 = vsub.f32 %v4034_v8, %v4046_v34 }
 0x7e4   :  { %4050 = vst [vmem:[%s8337_s9 + $0x8] sm:$0xff] %v4048_v12 }

</bundles_post_ra>
